<compile_context>
chip_gen: v5e
topology: v5e:2x2
jax: 0.10.0
libtpu: 0.0.40
codegen_flags: <defaults>
</compile_context>

<pallas_src>
import functools
import math

import jax
import jax.numpy as jnp
from jax import lax
from jax.experimental import pallas as pl
from jax.experimental.pallas import tpu as pltpu

N_HEADS = 8
LN_EPS = 1e-6
MASK_NEG = -1e9


# ----------------------------- feature probe ------------------------------

@functools.lru_cache(maxsize=None)
def _single_buffer_supported():
    """Probe pipeline_mode=pl.Buffered(1) for grid-invariant inputs (compile + correctness)."""
    try:
        def _k(x_ref, w_ref, o_ref):
            o_ref[...] = x_ref[...] + w_ref[...]

        x = jnp.arange(2 * 8 * 128, dtype=jnp.float32).reshape(2, 8, 128)
        w = jnp.full((1, 8, 128), 3.0, jnp.float32)
        out = pl.pallas_call(
            _k,
            out_shape=jax.ShapeDtypeStruct((2, 8, 128), jnp.float32),
            grid=(2,),
            in_specs=[pl.BlockSpec((1, 8, 128), lambda i: (i, 0, 0)),
                      pl.BlockSpec((1, 8, 128), lambda i: (0, 0, 0),
                                   pipeline_mode=pl.Buffered(buffer_count=1))],
            out_specs=pl.BlockSpec((1, 8, 128), lambda i: (i, 0, 0)),
        )(x, w)
        out = jax.block_until_ready(out)
        return bool(jnp.max(jnp.abs(out - (x + 3.0))) < 1e-6)
    except Exception:
        return False


# ----------------------------- in-kernel building blocks ------------------------------

def _attention_heads(q_in, kv_in, mask2d, wqkv_ref, wm_ref, bqkv_ref, *, n_heads):
    """Multi-head attention core for one batch element (merge bias NOT added here).

    q_in: (Sq, D) bf16, kv_in: (Skv, D) bf16, mask2d: (Sq, Skv) f32 additive mask.
    wqkv_ref: (3H, D, hd) bf16 (q block pre-scaled by 1/sqrt(hd)), bqkv_ref: (3H, 1, hd) f32,
    wm_ref: (H, hd, D) bf16.  Returns (Sq, D) f32.
    """
    sq, d = q_in.shape
    bf16 = jnp.bfloat16

    def head_body(h, acc):
        # Per-head projections: weight refs are indexed only on their leading (untiled)
        # axis -> no lane slicing / relayouts.  MXU runs bf16 x bf16 -> f32.
        q_h = jnp.dot(q_in, wqkv_ref[h], preferred_element_type=jnp.float32) + bqkv_ref[h]
        k_h = (jnp.dot(kv_in, wqkv_ref[n_heads + h], preferred_element_type=jnp.float32)
               + bqkv_ref[n_heads + h])
        v_h = (jnp.dot(kv_in, wqkv_ref[2 * n_heads + h], preferred_element_type=jnp.float32)
               + bqkv_ref[2 * n_heads + h])
        # scores: contract head dims directly (transposed-RHS MXU path, no K transpose)
        s = lax.dot_general(q_h.astype(bf16), k_h.astype(bf16), (((1,), (1,)), ((), ())),
                            preferred_element_type=jnp.float32)            # (Sq, Skv)
        s = s + mask2d
        s = s - jnp.max(s, axis=-1, keepdims=True)
        p = jnp.exp(s)
        p = p * pl.reciprocal(jnp.sum(p, axis=-1, keepdims=True), approx=True)
        o_h = jnp.dot(p.astype(bf16), v_h.astype(bf16),
                      preferred_element_type=jnp.float32)                  # (Sq, hd)
        # merge projection folded per head: concat_h(o_h) @ wm == sum_h o_h @ wm[h]
        return acc + jnp.dot(o_h.astype(bf16), wm_ref[h],
                             preferred_element_type=jnp.float32)

    return lax.fori_loop(0, n_heads, head_body, jnp.zeros((sq, d), jnp.float32))


def _add_layernorm(x, delta, gamma, beta):
    """LayerNorm(x + delta) with torch-reference semantics: unbiased std, eps added to std."""
    d = x.shape[-1]
    h = x + delta
    mean = jnp.mean(h, axis=-1, keepdims=True)
    c = h - mean
    var = jnp.sum(c * c, axis=-1, keepdims=True) * (1.0 / float(d - 1))
    std = jnp.sqrt(var)
    return gamma * c / (std + LN_EPS) + beta


def _ffn_block(x, w1_ref, b1, w2_ref, b2):
    bf16 = jnp.bfloat16
    h = jnp.dot(x.astype(bf16), w1_ref[...], preferred_element_type=jnp.float32) + b1
    h = jnp.maximum(h, 0.0)
    return jnp.dot(h.astype(bf16), w2_ref[...], preferred_element_type=jnp.float32) + b2


# ----------------------------- fused per-layer kernel ------------------------------

def _bisga_layer_kernel(x_ref, y_ref, xm_ref, ym_ref,
                        a1_wqkv_ref, a1_wm_ref, a1_bqkv_ref,
                        a2_wqkv_ref, a2_wm_ref, a2_bqkv_ref,
                        f_w1_ref, f_b1_ref, f_w2_ref, vec_ref,
                        xo_ref, yo_ref, *, n_heads):
    bf16 = jnp.bfloat16
    x = x_ref[0]                       # (Sx, D) f32
    y = y_ref[0]                       # (Sy, D) f32
    sx, sy = x.shape[0], y.shape[0]

    xm = xm_ref[0]                     # (1, Sx) additive mask
    ym = ym_ref[0]                     # (1, Sy) additive mask
    # hoisted mask broadcasts: one per attention block instead of one per head
    xm_xx = jnp.broadcast_to(xm, (sx, sx))
    ym_yy = jnp.broadcast_to(ym, (sy, sy))
    ym_xy = jnp.broadcast_to(ym, (sx, sy))
    xm_yx = jnp.broadcast_to(xm, (sy, sx))

    vecs = vec_ref[...]                # (9, D) f32
    a1_bm, a2_bm, f_b2 = vecs[0:1], vecs[1:2], vecs[2:3]
    n1_g, n1_b = vecs[3:4], vecs[4:5]
    n2_g, n2_b = vecs[5:6], vecs[6:7]
    n3_g, n3_b = vecs[7:8], vecs[8:9]
    f_b1 = f_b1_ref[...]               # (1, FF) f32

    # --- self attention + norm1 (mhatt1 / norm1 shared between the two streams) ---
    x_b = x.astype(bf16)
    y_b = y.astype(bf16)
    x = _add_layernorm(
        x, _attention_heads(x_b, x_b, xm_xx, a1_wqkv_ref, a1_wm_ref, a1_bqkv_ref,
                            n_heads=n_heads) + a1_bm, n1_g, n1_b)
    y = _add_layernorm(
        y, _attention_heads(y_b, y_b, ym_yy, a1_wqkv_ref, a1_wm_ref, a1_bqkv_ref,
                            n_heads=n_heads) + a1_bm, n1_g, n1_b)

    # --- cross attention + norm2 (q from one stream, k/v + mask from the other) ---
    x_b = x.astype(bf16)
    y_b = y.astype(bf16)
    x = _add_layernorm(
        x, _attention_heads(x_b, y_b, ym_xy, a2_wqkv_ref, a2_wm_ref, a2_bqkv_ref,
                            n_heads=n_heads) + a2_bm, n2_g, n2_b)
    x_b = x.astype(bf16)               # y's cross attention keys/values use the UPDATED x
    y = _add_layernorm(
        y, _attention_heads(y_b, x_b, xm_yx, a2_wqkv_ref, a2_wm_ref, a2_bqkv_ref,
                            n_heads=n_heads) + a2_bm, n2_g, n2_b)

    # --- FFN + norm3 ---
    x = _add_layernorm(x, _ffn_block(x, f_w1_ref, f_b1, f_w2_ref, f_b2), n3_g, n3_b)
    y = _add_layernorm(y, _ffn_block(y, f_w1_ref, f_b1, f_w2_ref, f_b2), n3_g, n3_b)

    xo_ref[0] = x.astype(xo_ref.dtype)
    yo_ref[0] = y.astype(yo_ref.dtype)


def bisga_layer(pk, x, y, x_mask_add, y_mask_add):
    """One fused BISGA layer: a single pallas_call, grid=(B,) (one batch element per program)."""
    B, Sx, D = x.shape
    Sy = y.shape[1]
    FF = pk["f_w1"].shape[1]

    mode = pl.Buffered(buffer_count=1) if _single_buffer_supported() else None

    def rep(a):
        # grid-invariant parameter block: constant index_map, single-buffered when supported
        nd = a.ndim
        idx = lambda b, _nd=nd: (0,) * _nd
        if mode is None:
            return pl.BlockSpec(a.shape, idx)
        return pl.BlockSpec(a.shape, idx, pipeline_mode=mode)

    param_ops = [pk["a1_wqkv"], pk["a1_wm"], pk["a1_bqkv"],
                 pk["a2_wqkv"], pk["a2_wm"], pk["a2_bqkv"],
                 pk["f_w1"], pk["f_b1"], pk["f_w2"], pk["vecs"]]

    in_specs = [
        pl.BlockSpec((1, Sx, D), lambda b: (b, 0, 0)),       # x
        pl.BlockSpec((1, Sy, D), lambda b: (b, 0, 0)),       # y
        pl.BlockSpec((1, 1, Sx), lambda b: (b, 0, 0)),       # x additive mask
        pl.BlockSpec((1, 1, Sy), lambda b: (b, 0, 0)),       # y additive mask
    ] + [rep(a) for a in param_ops]

    out_specs = [
        pl.BlockSpec((1, Sx, D), lambda b: (b, 0, 0)),
        pl.BlockSpec((1, Sy, D), lambda b: (b, 0, 0)),
    ]
    out_shape = [
        jax.ShapeDtypeStruct((B, Sx, D), jnp.float32),
        jax.ShapeDtypeStruct((B, Sy, D), jnp.float32),
    ]

    # advisory cost estimate (helps XLA overlap the weight stream with neighbors)
    flops = 0
    for sq, skv in ((Sx, Sx), (Sy, Sy), (Sx, Sy), (Sy, Sx)):
        flops += 2 * sq * D * D          # q projection
        flops += 4 * skv * D * D         # k and v projections
        flops += 4 * sq * skv * D        # scores + p@v
        flops += 2 * sq * D * D          # merge projection
    flops += 4 * (Sx + Sy) * D * FF      # FFN
    flops *= B
    transcendentals = B * N_HEADS * (Sx * Sx + Sy * Sy + 2 * Sx * Sy)
    param_bytes = sum(int(a.size) * a.dtype.itemsize for a in param_ops)
    act_bytes = 4 * B * (2 * Sx * D + 2 * Sy * D + Sx + Sy)
    cost = pl.CostEstimate(flops=int(flops), transcendentals=int(transcendentals),
                           bytes_accessed=int(param_bytes + act_bytes))

    xo, yo = pl.pallas_call(
        functools.partial(_bisga_layer_kernel, n_heads=N_HEADS),
        out_shape=out_shape,
        grid=(B,),
        in_specs=in_specs,
        out_specs=out_specs,
        compiler_params=pltpu.CompilerParams(
            dimension_semantics=("parallel",),
            vmem_limit_bytes=48 * 1024 * 1024,   # explicit, stays under v7x's 64 MiB VMEM
        ),
        cost_estimate=cost,
    )(x, y, x_mask_add, y_mask_add, *param_ops)
    return xo, yo


# ----------------------------- model forward ------------------------------

def bimca_ed_forward(packed_params, y, x, y_mask, x_mask):
    # torch: for dec in dec_list: x, y = dec(x, y, x_mask, y_mask); return (y, x)
    B = x.shape[0]
    x_mask_add = (x_mask.reshape(B, 1, x_mask.shape[-1]).astype(jnp.float32)
                  * jnp.float32(MASK_NEG))
    y_mask_add = (y_mask.reshape(B, 1, y_mask.shape[-1]).astype(jnp.float32)
                  * jnp.float32(MASK_NEG))
    for pk in packed_params["layers"]:
        x, y = bisga_layer(pk, x, y, x_mask_add, y_mask_add)
    return y, x


# ----------------------------- parameter init (canonical, torch-like) ------------------------------

def init_linear_params(key, in_size, out_size):
    k1, k2 = jax.random.split(key)
    bound = 1.0 / math.sqrt(in_size)
    w = jax.random.uniform(k1, (in_size, out_size), jnp.float32, -bound, bound)
    b = jax.random.uniform(k2, (1, out_size), jnp.float32, -bound, bound)
    return w, b


def init_mhatt_params(key, hidden):
    ks = jax.random.split(key, 4)
    wq, bq = init_linear_params(ks[0], hidden, hidden)
    wk, bk = init_linear_params(ks[1], hidden, hidden)
    wv, bv = init_linear_params(ks[2], hidden, hidden)
    wm, bm = init_linear_params(ks[3], hidden, hidden)
    return {"wq": wq, "bq": bq, "wk": wk, "bk": bk, "wv": wv, "bv": bv, "wm": wm, "bm": bm}


def init_bisga_params(key, hidden, ff):
    ks = jax.random.split(key, 4)
    w1, b1 = init_linear_params(ks[2], hidden, ff)
    w2, b2 = init_linear_params(ks[3], ff, hidden)
    return {
        "mhatt1": init_mhatt_params(ks[0], hidden),
        "mhatt2": init_mhatt_params(ks[1], hidden),
        "ffn": {"w1": w1, "b1": b1, "w2": w2, "b2": b2},
        "n1_g": jnp.ones((1, hidden), jnp.float32), "n1_b": jnp.zeros((1, hidden), jnp.float32),
        "n2_g": jnp.ones((1, hidden), jnp.float32), "n2_b": jnp.zeros((1, hidden), jnp.float32),
        "n3_g": jnp.ones((1, hidden), jnp.float32), "n3_b": jnp.zeros((1, hidden), jnp.float32),
    }


def init_bimca_ed_params(key, hidden, ff, layers):
    ks = jax.random.split(key, layers)
    return {"layers": [init_bisga_params(ks[i], hidden, ff) for i in range(layers)]}


# ----------------------------- host-side packing (head-major, bf16, scale folded) -------------

def _pack_mhatt(p, hidden, n_heads):
    hd = hidden // n_heads
    scale = 1.0 / math.sqrt(hd)

    def w_hm(w):                         # (D, D) -> (H, D, hd): head h = its output columns
        return jnp.transpose(w.reshape(hidden, n_heads, hd), (1, 0, 2))

    def b_hm(b):                         # (1, D) -> (H, 1, hd)
        return b.reshape(n_heads, hd)[:, None, :]

    wqkv = jnp.concatenate([w_hm(p["wq"]) * scale, w_hm(p["wk"]), w_hm(p["wv"])],
                           axis=0).astype(jnp.bfloat16)                    # (3H, D, hd)
    bqkv = jnp.concatenate([b_hm(p["bq"]) * scale, b_hm(p["bk"]), b_hm(p["bv"])],
                           axis=0).astype(jnp.float32)                     # (3H, 1, hd)
    wm = p["wm"].reshape(n_heads, hd, hidden).astype(jnp.bfloat16)         # (H, hd, D)
    return wqkv, wm, bqkv


def pack_bisga_params(p, hidden, n_heads=N_HEADS):
    a1_wqkv, a1_wm, a1_bqkv = _pack_mhatt(p["mhatt1"], hidden, n_heads)
    a2_wqkv, a2_wm, a2_bqkv = _pack_mhatt(p["mhatt2"], hidden, n_heads)
    f = p["ffn"]
    vecs = jnp.concatenate([p["mhatt1"]["bm"], p["mhatt2"]["bm"], f["b2"],
                            p["n1_g"], p["n1_b"], p["n2_g"], p["n2_b"],
                            p["n3_g"], p["n3_b"]], axis=0)                 # (9, D) f32
    return {"a1_wqkv": a1_wqkv, "a1_wm": a1_wm, "a1_bqkv": a1_bqkv,
            "a2_wqkv": a2_wqkv, "a2_wm": a2_wm, "a2_bqkv": a2_bqkv,
            "f_w1": f["w1"].astype(jnp.bfloat16), "f_b1": f["b1"],
            "f_w2": f["w2"].astype(jnp.bfloat16), "vecs": vecs}


def pack_bimca_ed_params(params, hidden):
    return {"layers": [pack_bisga_params(p, hidden) for p in params["layers"]]}


# ----------------------------- pure-JAX f32 reference (torch semantics) ------------------------------

def _ref_mhatt(p, q_in, kv_in, mask):
    B, Sq, D = q_in.shape
    Skv = kv_in.shape[1]
    hd = D // N_HEADS
    q = (q_in @ p["wq"] + p["bq"]).reshape(B, Sq, N_HEADS, hd).transpose(0, 2, 1, 3)
    k = (kv_in @ p["wk"] + p["bk"]).reshape(B, Skv, N_HEADS, hd).transpose(0, 2, 1, 3)
    v = (kv_in @ p["wv"] + p["bv"]).reshape(B, Skv, N_HEADS, hd).transpose(0, 2, 1, 3)
    s = jnp.einsum("bhqd,bhkd->bhqk", q, k) / math.sqrt(hd)
    s = jnp.where(mask > 0.5, MASK_NEG, s)
    att = jax.nn.softmax(s, axis=-1)
    o = jnp.einsum("bhqk,bhkd->bhqd", att, v).transpose(0, 2, 1, 3).reshape(B, Sq, D)
    return o @ p["wm"] + p["bm"]


def _ref_ln(x, g, b):
    mean = jnp.mean(x, -1, keepdims=True)
    c = x - mean
    var = jnp.sum(c * c, -1, keepdims=True) / (x.shape[-1] - 1)
    return g * c / (jnp.sqrt(var) + LN_EPS) + b


def _ref_ffn(p, x):
    return jnp.maximum(x @ p["w1"] + p["b1"], 0.0) @ p["w2"] + p["b2"]


def _ref_forward(params, y, x, y_mask, x_mask):
    for p in params["layers"]:
        x = _ref_ln(x + _ref_mhatt(p["mhatt1"], x, x, x_mask), p["n1_g"], p["n1_b"])
        y = _ref_ln(y + _ref_mhatt(p["mhatt1"], y, y, y_mask), p["n1_g"], p["n1_b"])
        x = _ref_ln(x + _ref_mhatt(p["mhatt2"], x, y, y_mask), p["n2_g"], p["n2_b"])
        y = _ref_ln(y + _ref_mhatt(p["mhatt2"], y, x, x_mask), p["n2_g"], p["n2_b"])
        x = _ref_ln(x + _ref_ffn(p["ffn"], x), p["n3_g"], p["n3_b"])
        y = _ref_ln(y + _ref_ffn(p["ffn"], y), p["n3_g"], p["n3_b"])
    return y, x


# ----------------------------- main ------------------------------

if __name__ == "__main__":
    B, Sx, Sy, D, FFD, LAYERS = 2, 8, 8, 32, 64, 2

    root = jax.random.PRNGKey(0)
    k_param, k_x, k_y = jax.random.split(root, 3)
    params = init_bimca_ed_params(k_param, D, FFD, LAYERS)
    packed = pack_bimca_ed_params(params, D)

    x = jax.random.normal(k_x, (B, Sx, D), jnp.float32)   # "x" stream
    y = jax.random.normal(k_y, (B, Sy, D), jnp.float32)   # "y" stream

    # masks: (B, 1, 1, S), 1.0 == padded/masked
    x_lens = jnp.array([Sx, Sx - 2])
    y_lens = jnp.array([Sy, Sy - 3])
    x_mask = (jnp.arange(Sx)[None, :] >= x_lens[:, None]).astype(jnp.float32).reshape(B, 1, 1, Sx)
    y_mask = (jnp.arange(Sy)[None, :] >= y_lens[:, None]).astype(jnp.float32).reshape(B, 1, 1, Sy)

    # run the feature probe once outside of jit tracing
    _single_buffer_supported()

    fwd = jax.jit(bimca_ed_forward)
    y_out, x_out = fwd(packed, y, x, y_mask, x_mask)
    y_out = jax.block_until_ready(y_out)
    x_out = jax.block_until_ready(x_out)

    assert y_out.shape == (B, Sy, D) and x_out.shape == (B, Sx, D)
    assert bool(jnp.all(jnp.isfinite(y_out))) and bool(jnp.all(jnp.isfinite(x_out)))

    # Numerical sanity check against a pure-f32 JAX reference with torch semantics.
    # The kernel feeds the MXU with bf16 operands (per perf review), so a bf16-level
    # absolute tolerance is used; structural bugs would produce O(1) discrepancies.
    y_ref, x_ref = _ref_forward(params, y, x, y_mask, x_mask)
    max_diff = float(jnp.maximum(jnp.max(jnp.abs(y_out - y_ref)),
                                 jnp.max(jnp.abs(x_out - x_ref))))
    assert max_diff < 0.15, f"mismatch vs reference: {max_diff}"

    print("KERNEL_OK")
</pallas_src>

<mosaic_0001>
module attributes {stable_mosaic.version = 11 : i64} {
  func.func @_k(%arg0: i32, %arg1: memref<1x8x128xf32, #tpu.memory_space<vmem>>, %arg2: memref<1x8x128xf32, #tpu.memory_space<vmem>>, %arg3: memref<1x8x128xf32, #tpu.memory_space<vmem>>) attributes {dimension_semantics = [#tpu.dimension_semantics<arbitrary>], iteration_bounds = array<i64: 2>, scalar_prefetch = 0 : i64, scratch_operands = 0 : i64, tpu.core_type = #tpu.core_type<tc>, window_params = [{transform_indices = @transform_0, window_bounds = array<i64: 1, 8, 128>}, {pipeline_mode = #tpu.pipeline_mode<synchronous>, transform_indices = @transform_1, window_bounds = array<i64: 1, 8, 128>}, {transform_indices = @transform_2, window_bounds = array<i64: 1, 8, 128>}]} {
    %c0 = arith.constant 0 : index
    %c0_0 = arith.constant 0 : index
    %c0_1 = arith.constant 0 : index
    %0 = vector.load %arg1[%c0, %c0_0, %c0_1] : memref<1x8x128xf32, #tpu.memory_space<vmem>>, vector<1x8x128xf32>
    %c0_2 = arith.constant 0 : index
    %c0_3 = arith.constant 0 : index
    %c0_4 = arith.constant 0 : index
    %1 = vector.load %arg2[%c0_2, %c0_3, %c0_4] : memref<1x8x128xf32, #tpu.memory_space<vmem>>, vector<1x8x128xf32>
    %2 = arith.addf %0, %1 : vector<1x8x128xf32>
    %c0_5 = arith.constant 0 : index
    %c0_6 = arith.constant 0 : index
    %c0_7 = arith.constant 0 : index
    %3 = vector.load %arg3[%c0_5, %c0_6, %c0_7] : memref<1x8x128xf32, #tpu.memory_space<vmem>>, vector<1x8x128xf32>
    tpu.vector_store %arg3[%c0_5, %c0_6, %c0_7], %2 {strides = array<i32>} : memref<1x8x128xf32, #tpu.memory_space<vmem>>, vector<1x8x128xf32>,
    return
  }
  func.func @transform_0(%arg0: i32) -> (i32, i32, i32) {
    %c0_i32 = arith.constant 0 : i32
    %c0_i32_0 = arith.constant 0 : i32
    %c0_i32_1 = arith.constant 0 : i32
    return %arg0, %c0_i32, %c0_i32_0 : i32, i32, i32
  }
  func.func @transform_1(%arg0: i32) -> (i32, i32, i32) {
    %c0_i32 = arith.constant 0 : i32
    %c0_i32_0 = arith.constant 0 : i32
    %c0_i32_1 = arith.constant 0 : i32
    %c0_i32_2 = arith.constant 0 : i32
    return %c0_i32, %c0_i32_0, %c0_i32_1 : i32, i32, i32
  }
  func.func @transform_2(%arg0: i32) -> (i32, i32, i32) {
    %c0_i32 = arith.constant 0 : i32
    %c0_i32_0 = arith.constant 0 : i32
    %c0_i32_1 = arith.constant 0 : i32
    return %arg0, %c0_i32, %c0_i32_0 : i32, i32, i32
  }
}

module attributes {stable_mosaic.version = 11 : i64} {
  func.func @_bisga_layer_kernel(%arg0: i32, %arg1: memref<1x8x32xf32, #tpu.memory_space<vmem>>, %arg2: memref<1x8x32xf32, #tpu.memory_space<vmem>>, %arg3: memref<1x1x8xf32, #tpu.memory_space<vmem>>, %arg4: memref<1x1x8xf32, #tpu.memory_space<vmem>>, %arg5: memref<24x32x4xbf16, #tpu.memory_space<vmem>>, %arg6: memref<8x4x32xbf16, #tpu.memory_space<vmem>>, %arg7: memref<24x1x4xf32, #tpu.memory_space<vmem>>, %arg8: memref<24x32x4xbf16, #tpu.memory_space<vmem>>, %arg9: memref<8x4x32xbf16, #tpu.memory_space<vmem>>, %arg10: memref<24x1x4xf32, #tpu.memory_space<vmem>>, %arg11: memref<32x64xbf16, #tpu.memory_space<vmem>>, %arg12: memref<1x64xf32, #tpu.memory_space<vmem>>, %arg13: memref<64x32xbf16, #tpu.memory_space<vmem>>, %arg14: memref<9x32xf32, #tpu.memory_space<vmem>>, %arg15: memref<1x8x32xf32, #tpu.memory_space<vmem>>, %arg16: memref<1x8x32xf32, #tpu.memory_space<vmem>>) attributes {dimension_semantics = [#tpu.dimension_semantics<parallel>], iteration_bounds = array<i64: 2>, scalar_prefetch = 0 : i64, scratch_operands = 0 : i64, tpu.core_type = #tpu.core_type<tc>, window_params = [{transform_indices = @transform_0, window_bounds = array<i64: 1, 8, 32>}, {transform_indices = @transform_1, window_bounds = array<i64: 1, 8, 32>}, {transform_indices = @transform_2, window_bounds = array<i64: 1, 1, 8>}, {transform_indices = @transform_3, window_bounds = array<i64: 1, 1, 8>}, {pipeline_mode = #tpu.pipeline_mode<synchronous>, transform_indices = @transform_4, window_bounds = array<i64: 24, 32, 4>}, {pipeline_mode = #tpu.pipeline_mode<synchronous>, transform_indices = @transform_5, window_bounds = array<i64: 8, 4, 32>}, {pipeline_mode = #tpu.pipeline_mode<synchronous>, transform_indices = @transform_6, window_bounds = array<i64: 24, 1, 4>}, {pipeline_mode = #tpu.pipeline_mode<synchronous>, transform_indices = @transform_7, window_bounds = array<i64: 24, 32, 4>}, {pipeline_mode = #tpu.pipeline_mode<synchronous>, transform_indices = @transform_8, window_bounds = array<i64: 8, 4, 32>}, {pipeline_mode = #tpu.pipeline_mode<synchronous>, transform_indices = @transform_9, window_bounds = array<i64: 24, 1, 4>}, {pipeline_mode = #tpu.pipeline_mode<synchronous>, transform_indices = @transform_10, window_bounds = array<i64: 32, 64>}, {pipeline_mode = #tpu.pipeline_mode<synchronous>, transform_indices = @transform_11, window_bounds = array<i64: 1, 64>}, {pipeline_mode = #tpu.pipeline_mode<synchronous>, transform_indices = @transform_12, window_bounds = array<i64: 64, 32>}, {pipeline_mode = #tpu.pipeline_mode<synchronous>, transform_indices = @transform_13, window_bounds = array<i64: 9, 32>}, {transform_indices = @transform_14, window_bounds = array<i64: 1, 8, 32>}, {transform_indices = @transform_15, window_bounds = array<i64: 1, 8, 32>}]} {
    %c0 = arith.constant 0 : index
    %c0_0 = arith.constant 0 : index
    %c0_1 = arith.constant 0 : index
    %0 = vector.load %arg1[%c0, %c0_0, %c0_1] : memref<1x8x32xf32, #tpu.memory_space<vmem>>, vector<1x8x32xf32>
    %1 = vector.shape_cast %0 : vector<1x8x32xf32> to vector<8x32xf32>
    %c0_2 = arith.constant 0 : index
    %c0_3 = arith.constant 0 : index
    %c0_4 = arith.constant 0 : index
    %2 = vector.load %arg2[%c0_2, %c0_3, %c0_4] : memref<1x8x32xf32, #tpu.memory_space<vmem>>, vector<1x8x32xf32>
    %3 = vector.shape_cast %2 : vector<1x8x32xf32> to vector<8x32xf32>
    %c0_5 = arith.constant 0 : index
    %c0_6 = arith.constant 0 : index
    %c0_7 = arith.constant 0 : index
    %4 = vector.load %arg3[%c0_5, %c0_6, %c0_7] : memref<1x1x8xf32, #tpu.memory_space<vmem>>, vector<1x1x8xf32>
    %5 = vector.shape_cast %4 : vector<1x1x8xf32> to vector<1x8xf32>
    %c0_8 = arith.constant 0 : index
    %c0_9 = arith.constant 0 : index
    %c0_10 = arith.constant 0 : index
    %6 = vector.load %arg4[%c0_8, %c0_9, %c0_10] : memref<1x1x8xf32, #tpu.memory_space<vmem>>, vector<1x1x8xf32>
    %7 = vector.shape_cast %6 : vector<1x1x8xf32> to vector<1x8xf32>
    %8 = vector.shape_cast %5 : vector<1x8xf32> to vector<1x8xf32>
    %9 = vector.broadcast %8 : vector<1x8xf32> to vector<8x8xf32>
    %10 = vector.shape_cast %7 : vector<1x8xf32> to vector<1x8xf32>
    %11 = vector.broadcast %10 : vector<1x8xf32> to vector<8x8xf32>
    %12 = vector.shape_cast %7 : vector<1x8xf32> to vector<1x8xf32>
    %13 = vector.broadcast %12 : vector<1x8xf32> to vector<8x8xf32>
    %14 = vector.shape_cast %5 : vector<1x8xf32> to vector<1x8xf32>
    %15 = vector.broadcast %14 : vector<1x8xf32> to vector<8x8xf32>
    %c0_11 = arith.constant 0 : index
    %c0_12 = arith.constant 0 : index
    %16 = vector.load %arg14[%c0_11, %c0_12] : memref<9x32xf32, #tpu.memory_space<vmem>>, vector<9x32xf32>
    %17 = vector.extract_strided_slice %16 {offsets = [0, 0], sizes = [1, 32], strides = [1, 1]} : vector<9x32xf32> to vector<1x32xf32>
    %18 = vector.extract_strided_slice %16 {offsets = [1, 0], sizes = [1, 32], strides = [1, 1]} : vector<9x32xf32> to vector<1x32xf32>
    %19 = vector.extract_strided_slice %16 {offsets = [2, 0], sizes = [1, 32], strides = [1, 1]} : vector<9x32xf32> to vector<1x32xf32>
    %20 = vector.extract_strided_slice %16 {offsets = [3, 0], sizes = [1, 32], strides = [1, 1]} : vector<9x32xf32> to vector<1x32xf32>
    %21 = vector.extract_strided_slice %16 {offsets = [4, 0], sizes = [1, 32], strides = [1, 1]} : vector<9x32xf32> to vector<1x32xf32>
    %22 = vector.extract_strided_slice %16 {offsets = [5, 0], sizes = [1, 32], strides = [1, 1]} : vector<9x32xf32> to vector<1x32xf32>
    %23 = vector.extract_strided_slice %16 {offsets = [6, 0], sizes = [1, 32], strides = [1, 1]} : vector<9x32xf32> to vector<1x32xf32>
    %24 = vector.extract_strided_slice %16 {offsets = [7, 0], sizes = [1, 32], strides = [1, 1]} : vector<9x32xf32> to vector<1x32xf32>
    %25 = vector.extract_strided_slice %16 {offsets = [8, 0], sizes = [1, 32], strides = [1, 1]} : vector<9x32xf32> to vector<1x32xf32>
    %c0_13 = arith.constant 0 : index
    %c0_14 = arith.constant 0 : index
    %26 = vector.load %arg12[%c0_13, %c0_14] : memref<1x64xf32, #tpu.memory_space<vmem>>, vector<1x64xf32>
    %27 = arith.truncf %1 : vector<8x32xf32> to vector<8x32xbf16>
    %28 = arith.truncf %3 : vector<8x32xf32> to vector<8x32xbf16>
    %cst = arith.constant 0.000000e+00 : f32
    %29 = vector.broadcast %cst : f32 to vector<8x32xf32>
    %c0_i32 = arith.constant 0 : i32
    %c8_i32 = arith.constant 8 : i32
    %30 = arith.addi %c0_i32, %c8_i32 : i32
    %c1_i32 = arith.constant 1 : i32
    %31 = scf.for %arg17 = %c0_i32 to %30 step %c1_i32 iter_args(%arg18 = %29) -> (vector<8x32xf32>)  : i32 {
      %208 = arith.index_cast %arg17 : i32 to index
      %c0_81 = arith.constant 0 : index
      %c0_82 = arith.constant 0 : index
      %209 = vector.load %arg5[%208, %c0_81, %c0_82] : memref<24x32x4xbf16, #tpu.memory_space<vmem>>, vector<1x32x4xbf16>
      %210 = vector.shape_cast %209 : vector<1x32x4xbf16> to vector<32x4xbf16>
      %cst_83 = arith.constant dense<0.000000e+00> : vector<8x4xf32>
      %211 = tpu.matmul %27, %210, %cst_83 {dimension_numbers = #tpu.dot_dimension_numbers<[1], [0], [0], [1], [0, 0, 1, 1], [], []>} : vector<8x32xbf16>, vector<32x4xbf16>, vector<8x4xf32> -> vector<8x4xf32>
      %212 = arith.index_cast %arg17 : i32 to index
      %c0_84 = arith.constant 0 : index
      %c0_85 = arith.constant 0 : index
      %213 = vector.load %arg7[%212, %c0_84, %c0_85] : memref<24x1x4xf32, #tpu.memory_space<vmem>>, vector<1x1x4xf32>
      %214 = vector.shape_cast %213 : vector<1x1x4xf32> to vector<1x4xf32>
      %215 = vector.broadcast %214 : vector<1x4xf32> to vector<8x4xf32>
      %216 = arith.addf %211, %215 : vector<8x4xf32>
      %c8_i32_86 = arith.constant 8 : i32
      %217 = arith.addi %c8_i32_86, %arg17 : i32
      %218 = arith.index_cast %217 : i32 to index
      %c0_87 = arith.constant 0 : index
      %c0_88 = arith.constant 0 : index
      %219 = vector.load %arg5[%218, %c0_87, %c0_88] : memref<24x32x4xbf16, #tpu.memory_space<vmem>>, vector<1x32x4xbf16>
      %220 = vector.shape_cast %219 : vector<1x32x4xbf16> to vector<32x4xbf16>
      %cst_89 = arith.constant dense<0.000000e+00> : vector<8x4xf32>
      %221 = tpu.matmul %27, %220, %cst_89 {dimension_numbers = #tpu.dot_dimension_numbers<[1], [0], [0], [1], [0, 0, 1, 1], [], []>} : vector<8x32xbf16>, vector<32x4xbf16>, vector<8x4xf32> -> vector<8x4xf32>
      %c8_i32_90 = arith.constant 8 : i32
      %222 = arith.addi %c8_i32_90, %arg17 : i32
      %223 = arith.index_cast %222 : i32 to index
      %c0_91 = arith.constant 0 : index
      %c0_92 = arith.constant 0 : index
      %224 = vector.load %arg7[%223, %c0_91, %c0_92] : memref<24x1x4xf32, #tpu.memory_space<vmem>>, vector<1x1x4xf32>
      %225 = vector.shape_cast %224 : vector<1x1x4xf32> to vector<1x4xf32>
      %226 = vector.broadcast %225 : vector<1x4xf32> to vector<8x4xf32>
      %227 = arith.addf %221, %226 : vector<8x4xf32>
      %c16_i32 = arith.constant 16 : i32
      %228 = arith.addi %c16_i32, %arg17 : i32
      %229 = arith.index_cast %228 : i32 to index
      %c0_93 = arith.constant 0 : index
      %c0_94 = arith.constant 0 : index
      %230 = vector.load %arg5[%229, %c0_93, %c0_94] : memref<24x32x4xbf16, #tpu.memory_space<vmem>>, vector<1x32x4xbf16>
      %231 = vector.shape_cast %230 : vector<1x32x4xbf16> to vector<32x4xbf16>
      %cst_95 = arith.constant dense<0.000000e+00> : vector<8x4xf32>
      %232 = tpu.matmul %27, %231, %cst_95 {dimension_numbers = #tpu.dot_dimension_numbers<[1], [0], [0], [1], [0, 0, 1, 1], [], []>} : vector<8x32xbf16>, vector<32x4xbf16>, vector<8x4xf32> -> vector<8x4xf32>
      %c16_i32_96 = arith.constant 16 : i32
      %233 = arith.addi %c16_i32_96, %arg17 : i32
      %234 = arith.index_cast %233 : i32 to index
      %c0_97 = arith.constant 0 : index
      %c0_98 = arith.constant 0 : index
      %235 = vector.load %arg7[%234, %c0_97, %c0_98] : memref<24x1x4xf32, #tpu.memory_space<vmem>>, vector<1x1x4xf32>
      %236 = vector.shape_cast %235 : vector<1x1x4xf32> to vector<1x4xf32>
      %237 = vector.broadcast %236 : vector<1x4xf32> to vector<8x4xf32>
      %238 = arith.addf %232, %237 : vector<8x4xf32>
      %239 = arith.truncf %216 : vector<8x4xf32> to vector<8x4xbf16>
      %240 = arith.truncf %227 : vector<8x4xf32> to vector<8x4xbf16>
      %cst_99 = arith.constant dense<0.000000e+00> : vector<8x8xf32>
      %241 = tpu.matmul %239, %240, %cst_99 {dimension_numbers = #tpu.dot_dimension_numbers<[1], [1], [0], [0], [0, 0, 1, 0], [], []>} : vector<8x4xbf16>, vector<8x4xbf16>, vector<8x8xf32> -> vector<8x8xf32>
      %242 = arith.addf %241, %9 : vector<8x8xf32>
      %cst_100 = arith.constant dense<0xFF800000> : vector<8xf32>
      %243 = vector.multi_reduction <maximumf>, %242, %cst_100 [1] : vector<8x8xf32> to vector<8xf32>
      %244 = vector.shape_cast %243 : vector<8xf32> to vector<8x1xf32>
      %245 = vector.broadcast %244 : vector<8x1xf32> to vector<8x8xf32>
      %246 = arith.subf %242, %245 : vector<8x8xf32>
      %247 = math.exp %246 : vector<8x8xf32>
      %cst_101 = arith.constant dense<0.000000e+00> : vector<8xf32>
      %248 = vector.multi_reduction <add>, %247, %cst_101 [1] : vector<8x8xf32> to vector<8xf32>
      %249 = vector.shape_cast %248 : vector<8xf32> to vector<8x1xf32>
      %250 = tpu.reciprocal %249 {approx = true} : vector<8x1xf32> -> vector<8x1xf32>
      %251 = vector.broadcast %250 : vector<8x1xf32> to vector<8x8xf32>
      %252 = arith.mulf %247, %251 : vector<8x8xf32>
      %253 = arith.truncf %252 : vector<8x8xf32> to vector<8x8xbf16>
      %254 = arith.truncf %238 : vector<8x4xf32> to vector<8x4xbf16>
      %cst_102 = arith.constant dense<0.000000e+00> : vector<8x4xf32>
      %255 = tpu.matmul %253, %254, %cst_102 {dimension_numbers = #tpu.dot_dimension_numbers<[1], [0], [0], [1], [0, 0, 1, 1], [], []>} : vector<8x8xbf16>, vector<8x4xbf16>, vector<8x4xf32> -> vector<8x4xf32>
      %256 = arith.truncf %255 : vector<8x4xf32> to vector<8x4xbf16>
      %257 = arith.index_cast %arg17 : i32 to index
      %c0_103 = arith.constant 0 : index
      %c0_104 = arith.constant 0 : index
      %258 = vector.load %arg6[%257, %c0_103, %c0_104] : memref<8x4x32xbf16, #tpu.memory_space<vmem>>, vector<1x4x32xbf16>
      %259 = vector.shape_cast %258 : vector<1x4x32xbf16> to vector<4x32xbf16>
      %cst_105 = arith.constant dense<0.000000e+00> : vector<8x32xf32>
      %260 = tpu.matmul %256, %259, %cst_105 {dimension_numbers = #tpu.dot_dimension_numbers<[1], [0], [0], [1], [0, 0, 1, 1], [], []>} : vector<8x4xbf16>, vector<4x32xbf16>, vector<8x32xf32> -> vector<8x32xf32>
      %261 = arith.addf %arg18, %260 : vector<8x32xf32>
      scf.yield %261 : vector<8x32xf32>
    }
    %c8_i32_15 = arith.constant 8 : i32
    %32 = vector.broadcast %17 : vector<1x32xf32> to vector<8x32xf32>
    %33 = arith.addf %31, %32 : vector<8x32xf32>
    %34 = arith.addf %1, %33 : vector<8x32xf32>
    %cst_16 = arith.constant dense<0.000000e+00> : vector<8xf32>
    %35 = vector.multi_reduction <add>, %34, %cst_16 [1] : vector<8x32xf32> to vector<8xf32>
    %36 = vector.shape_cast %35 : vector<8xf32> to vector<8x1xf32>
    %cst_17 = arith.constant 3.200000e+01 : f32
    %37 = vector.broadcast %cst_17 : f32 to vector<8x1xf32>
    %38 = arith.divf %36, %37 : vector<8x1xf32>
    %39 = vector.broadcast %38 : vector<8x1xf32> to vector<8x32xf32>
    %40 = arith.subf %34, %39 : vector<8x32xf32>
    %41 = arith.mulf %40, %40 : vector<8x32xf32>
    %cst_18 = arith.constant dense<0.000000e+00> : vector<8xf32>
    %42 = vector.multi_reduction <add>, %41, %cst_18 [1] : vector<8x32xf32> to vector<8xf32>
    %43 = vector.shape_cast %42 : vector<8xf32> to vector<8x1xf32>
    %cst_19 = arith.constant 0.0322580636 : f32
    %44 = vector.broadcast %cst_19 : f32 to vector<8x1xf32>
    %45 = arith.mulf %43, %44 : vector<8x1xf32>
    %46 = math.sqrt %45 : vector<8x1xf32>
    %47 = vector.broadcast %20 : vector<1x32xf32> to vector<8x32xf32>
    %48 = arith.mulf %47, %40 : vector<8x32xf32>
    %cst_20 = arith.constant 9.99999997E-7 : f32
    %49 = vector.broadcast %cst_20 : f32 to vector<8x1xf32>
    %50 = arith.addf %46, %49 : vector<8x1xf32>
    %51 = vector.broadcast %50 : vector<8x1xf32> to vector<8x32xf32>
    %52 = arith.divf %48, %51 : vector<8x32xf32>
    %53 = vector.broadcast %21 : vector<1x32xf32> to vector<8x32xf32>
    %54 = arith.addf %52, %53 : vector<8x32xf32>
    %cst_21 = arith.constant 0.000000e+00 : f32
    %55 = vector.broadcast %cst_21 : f32 to vector<8x32xf32>
    %c0_i32_22 = arith.constant 0 : i32
    %c8_i32_23 = arith.constant 8 : i32
    %56 = arith.addi %c0_i32_22, %c8_i32_23 : i32
    %c1_i32_24 = arith.constant 1 : i32
    %57 = scf.for %arg17 = %c0_i32_22 to %56 step %c1_i32_24 iter_args(%arg18 = %55) -> (vector<8x32xf32>)  : i32 {
      %208 = arith.index_cast %arg17 : i32 to index
      %c0_81 = arith.constant 0 : index
      %c0_82 = arith.constant 0 : index
      %209 = vector.load %arg5[%208, %c0_81, %c0_82] : memref<24x32x4xbf16, #tpu.memory_space<vmem>>, vector<1x32x4xbf16>
      %210 = vector.shape_cast %209 : vector<1x32x4xbf16> to vector<32x4xbf16>
      %cst_83 = arith.constant dense<0.000000e+00> : vector<8x4xf32>
      %211 = tpu.matmul %28, %210, %cst_83 {dimension_numbers = #tpu.dot_dimension_numbers<[1], [0], [0], [1], [0, 0, 1, 1], [], []>} : vector<8x32xbf16>, vector<32x4xbf16>, vector<8x4xf32> -> vector<8x4xf32>
      %212 = arith.index_cast %arg17 : i32 to index
      %c0_84 = arith.constant 0 : index
      %c0_85 = arith.constant 0 : index
      %213 = vector.load %arg7[%212, %c0_84, %c0_85] : memref<24x1x4xf32, #tpu.memory_space<vmem>>, vector<1x1x4xf32>
      %214 = vector.shape_cast %213 : vector<1x1x4xf32> to vector<1x4xf32>
      %215 = vector.broadcast %214 : vector<1x4xf32> to vector<8x4xf32>
      %216 = arith.addf %211, %215 : vector<8x4xf32>
      %c8_i32_86 = arith.constant 8 : i32
      %217 = arith.addi %c8_i32_86, %arg17 : i32
      %218 = arith.index_cast %217 : i32 to index
      %c0_87 = arith.constant 0 : index
      %c0_88 = arith.constant 0 : index
      %219 = vector.load %arg5[%218, %c0_87, %c0_88] : memref<24x32x4xbf16, #tpu.memory_space<vmem>>, vector<1x32x4xbf16>
      %220 = vector.shape_cast %219 : vector<1x32x4xbf16> to vector<32x4xbf16>
      %cst_89 = arith.constant dense<0.000000e+00> : vector<8x4xf32>
      %221 = tpu.matmul %28, %220, %cst_89 {dimension_numbers = #tpu.dot_dimension_numbers<[1], [0], [0], [1], [0, 0, 1, 1], [], []>} : vector<8x32xbf16>, vector<32x4xbf16>, vector<8x4xf32> -> vector<8x4xf32>
      %c8_i32_90 = arith.constant 8 : i32
      %222 = arith.addi %c8_i32_90, %arg17 : i32
      %223 = arith.index_cast %222 : i32 to index
      %c0_91 = arith.constant 0 : index
      %c0_92 = arith.constant 0 : index
      %224 = vector.load %arg7[%223, %c0_91, %c0_92] : memref<24x1x4xf32, #tpu.memory_space<vmem>>, vector<1x1x4xf32>
      %225 = vector.shape_cast %224 : vector<1x1x4xf32> to vector<1x4xf32>
      %226 = vector.broadcast %225 : vector<1x4xf32> to vector<8x4xf32>
      %227 = arith.addf %221, %226 : vector<8x4xf32>
      %c16_i32 = arith.constant 16 : i32
      %228 = arith.addi %c16_i32, %arg17 : i32
      %229 = arith.index_cast %228 : i32 to index
      %c0_93 = arith.constant 0 : index
      %c0_94 = arith.constant 0 : index
      %230 = vector.load %arg5[%229, %c0_93, %c0_94] : memref<24x32x4xbf16, #tpu.memory_space<vmem>>, vector<1x32x4xbf16>
      %231 = vector.shape_cast %230 : vector<1x32x4xbf16> to vector<32x4xbf16>
      %cst_95 = arith.constant dense<0.000000e+00> : vector<8x4xf32>
      %232 = tpu.matmul %28, %231, %cst_95 {dimension_numbers = #tpu.dot_dimension_numbers<[1], [0], [0], [1], [0, 0, 1, 1], [], []>} : vector<8x32xbf16>, vector<32x4xbf16>, vector<8x4xf32> -> vector<8x4xf32>
      %c16_i32_96 = arith.constant 16 : i32
      %233 = arith.addi %c16_i32_96, %arg17 : i32
      %234 = arith.index_cast %233 : i32 to index
      %c0_97 = arith.constant 0 : index
      %c0_98 = arith.constant 0 : index
      %235 = vector.load %arg7[%234, %c0_97, %c0_98] : memref<24x1x4xf32, #tpu.memory_space<vmem>>, vector<1x1x4xf32>
      %236 = vector.shape_cast %235 : vector<1x1x4xf32> to vector<1x4xf32>
      %237 = vector.broadcast %236 : vector<1x4xf32> to vector<8x4xf32>
      %238 = arith.addf %232, %237 : vector<8x4xf32>
      %239 = arith.truncf %216 : vector<8x4xf32> to vector<8x4xbf16>
      %240 = arith.truncf %227 : vector<8x4xf32> to vector<8x4xbf16>
      %cst_99 = arith.constant dense<0.000000e+00> : vector<8x8xf32>
      %241 = tpu.matmul %239, %240, %cst_99 {dimension_numbers = #tpu.dot_dimension_numbers<[1], [1], [0], [0], [0, 0, 1, 0], [], []>} : vector<8x4xbf16>, vector<8x4xbf16>, vector<8x8xf32> -> vector<8x8xf32>
      %242 = arith.addf %241, %11 : vector<8x8xf32>
      %cst_100 = arith.constant dense<0xFF800000> : vector<8xf32>
      %243 = vector.multi_reduction <maximumf>, %242, %cst_100 [1] : vector<8x8xf32> to vector<8xf32>
      %244 = vector.shape_cast %243 : vector<8xf32> to vector<8x1xf32>
      %245 = vector.broadcast %244 : vector<8x1xf32> to vector<8x8xf32>
      %246 = arith.subf %242, %245 : vector<8x8xf32>
      %247 = math.exp %246 : vector<8x8xf32>
      %cst_101 = arith.constant dense<0.000000e+00> : vector<8xf32>
      %248 = vector.multi_reduction <add>, %247, %cst_101 [1] : vector<8x8xf32> to vector<8xf32>
      %249 = vector.shape_cast %248 : vector<8xf32> to vector<8x1xf32>
      %250 = tpu.reciprocal %249 {approx = true} : vector<8x1xf32> -> vector<8x1xf32>
      %251 = vector.broadcast %250 : vector<8x1xf32> to vector<8x8xf32>
      %252 = arith.mulf %247, %251 : vector<8x8xf32>
      %253 = arith.truncf %252 : vector<8x8xf32> to vector<8x8xbf16>
      %254 = arith.truncf %238 : vector<8x4xf32> to vector<8x4xbf16>
      %cst_102 = arith.constant dense<0.000000e+00> : vector<8x4xf32>
      %255 = tpu.matmul %253, %254, %cst_102 {dimension_numbers = #tpu.dot_dimension_numbers<[1], [0], [0], [1], [0, 0, 1, 1], [], []>} : vector<8x8xbf16>, vector<8x4xbf16>, vector<8x4xf32> -> vector<8x4xf32>
      %256 = arith.truncf %255 : vector<8x4xf32> to vector<8x4xbf16>
      %257 = arith.index_cast %arg17 : i32 to index
      %c0_103 = arith.constant 0 : index
      %c0_104 = arith.constant 0 : index
      %258 = vector.load %arg6[%257, %c0_103, %c0_104] : memref<8x4x32xbf16, #tpu.memory_space<vmem>>, vector<1x4x32xbf16>
      %259 = vector.shape_cast %258 : vector<1x4x32xbf16> to vector<4x32xbf16>
      %cst_105 = arith.constant dense<0.000000e+00> : vector<8x32xf32>
      %260 = tpu.matmul %256, %259, %cst_105 {dimension_numbers = #tpu.dot_dimension_numbers<[1], [0], [0], [1], [0, 0, 1, 1], [], []>} : vector<8x4xbf16>, vector<4x32xbf16>, vector<8x32xf32> -> vector<8x32xf32>
      %261 = arith.addf %arg18, %260 : vector<8x32xf32>
      scf.yield %261 : vector<8x32xf32>
    }
    %c8_i32_25 = arith.constant 8 : i32
    %58 = vector.broadcast %17 : vector<1x32xf32> to vector<8x32xf32>
    %59 = arith.addf %57, %58 : vector<8x32xf32>
    %60 = arith.addf %3, %59 : vector<8x32xf32>
    %cst_26 = arith.constant dense<0.000000e+00> : vector<8xf32>
    %61 = vector.multi_reduction <add>, %60, %cst_26 [1] : vector<8x32xf32> to vector<8xf32>
    %62 = vector.shape_cast %61 : vector<8xf32> to vector<8x1xf32>
    %cst_27 = arith.constant 3.200000e+01 : f32
    %63 = vector.broadcast %cst_27 : f32 to vector<8x1xf32>
    %64 = arith.divf %62, %63 : vector<8x1xf32>
    %65 = vector.broadcast %64 : vector<8x1xf32> to vector<8x32xf32>
    %66 = arith.subf %60, %65 : vector<8x32xf32>
    %67 = arith.mulf %66, %66 : vector<8x32xf32>
    %cst_28 = arith.constant dense<0.000000e+00> : vector<8xf32>
    %68 = vector.multi_reduction <add>, %67, %cst_28 [1] : vector<8x32xf32> to vector<8xf32>
    %69 = vector.shape_cast %68 : vector<8xf32> to vector<8x1xf32>
    %cst_29 = arith.constant 0.0322580636 : f32
    %70 = vector.broadcast %cst_29 : f32 to vector<8x1xf32>
    %71 = arith.mulf %69, %70 : vector<8x1xf32>
    %72 = math.sqrt %71 : vector<8x1xf32>
    %73 = vector.broadcast %20 : vector<1x32xf32> to vector<8x32xf32>
    %74 = arith.mulf %73, %66 : vector<8x32xf32>
    %cst_30 = arith.constant 9.99999997E-7 : f32
    %75 = vector.broadcast %cst_30 : f32 to vector<8x1xf32>
    %76 = arith.addf %72, %75 : vector<8x1xf32>
    %77 = vector.broadcast %76 : vector<8x1xf32> to vector<8x32xf32>
    %78 = arith.divf %74, %77 : vector<8x32xf32>
    %79 = vector.broadcast %21 : vector<1x32xf32> to vector<8x32xf32>
    %80 = arith.addf %78, %79 : vector<8x32xf32>
    %81 = arith.truncf %54 : vector<8x32xf32> to vector<8x32xbf16>
    %82 = arith.truncf %80 : vector<8x32xf32> to vector<8x32xbf16>
    %cst_31 = arith.constant 0.000000e+00 : f32
    %83 = vector.broadcast %cst_31 : f32 to vector<8x32xf32>
    %c0_i32_32 = arith.constant 0 : i32
    %c8_i32_33 = arith.constant 8 : i32
    %84 = arith.addi %c0_i32_32, %c8_i32_33 : i32
    %c1_i32_34 = arith.constant 1 : i32
    %85 = scf.for %arg17 = %c0_i32_32 to %84 step %c1_i32_34 iter_args(%arg18 = %83) -> (vector<8x32xf32>)  : i32 {
      %208 = arith.index_cast %arg17 : i32 to index
      %c0_81 = arith.constant 0 : index
      %c0_82 = arith.constant 0 : index
      %209 = vector.load %arg8[%208, %c0_81, %c0_82] : memref<24x32x4xbf16, #tpu.memory_space<vmem>>, vector<1x32x4xbf16>
      %210 = vector.shape_cast %209 : vector<1x32x4xbf16> to vector<32x4xbf16>
      %cst_83 = arith.constant dense<0.000000e+00> : vector<8x4xf32>
      %211 = tpu.matmul %81, %210, %cst_83 {dimension_numbers = #tpu.dot_dimension_numbers<[1], [0], [0], [1], [0, 0, 1, 1], [], []>} : vector<8x32xbf16>, vector<32x4xbf16>, vector<8x4xf32> -> vector<8x4xf32>
      %212 = arith.index_cast %arg17 : i32 to index
      %c0_84 = arith.constant 0 : index
      %c0_85 = arith.constant 0 : index
      %213 = vector.load %arg10[%212, %c0_84, %c0_85] : memref<24x1x4xf32, #tpu.memory_space<vmem>>, vector<1x1x4xf32>
      %214 = vector.shape_cast %213 : vector<1x1x4xf32> to vector<1x4xf32>
      %215 = vector.broadcast %214 : vector<1x4xf32> to vector<8x4xf32>
      %216 = arith.addf %211, %215 : vector<8x4xf32>
      %c8_i32_86 = arith.constant 8 : i32
      %217 = arith.addi %c8_i32_86, %arg17 : i32
      %218 = arith.index_cast %217 : i32 to index
      %c0_87 = arith.constant 0 : index
      %c0_88 = arith.constant 0 : index
      %219 = vector.load %arg8[%218, %c0_87, %c0_88] : memref<24x32x4xbf16, #tpu.memory_space<vmem>>, vector<1x32x4xbf16>
      %220 = vector.shape_cast %219 : vector<1x32x4xbf16> to vector<32x4xbf16>
      %cst_89 = arith.constant dense<0.000000e+00> : vector<8x4xf32>
      %221 = tpu.matmul %82, %220, %cst_89 {dimension_numbers = #tpu.dot_dimension_numbers<[1], [0], [0], [1], [0, 0, 1, 1], [], []>} : vector<8x32xbf16>, vector<32x4xbf16>, vector<8x4xf32> -> vector<8x4xf32>
      %c8_i32_90 = arith.constant 8 : i32
      %222 = arith.addi %c8_i32_90, %arg17 : i32
      %223 = arith.index_cast %222 : i32 to index
      %c0_91 = arith.constant 0 : index
      %c0_92 = arith.constant 0 : index
      %224 = vector.load %arg10[%223, %c0_91, %c0_92] : memref<24x1x4xf32, #tpu.memory_space<vmem>>, vector<1x1x4xf32>
      %225 = vector.shape_cast %224 : vector<1x1x4xf32> to vector<1x4xf32>
      %226 = vector.broadcast %225 : vector<1x4xf32> to vector<8x4xf32>
      %227 = arith.addf %221, %226 : vector<8x4xf32>
      %c16_i32 = arith.constant 16 : i32
      %228 = arith.addi %c16_i32, %arg17 : i32
      %229 = arith.index_cast %228 : i32 to index
      %c0_93 = arith.constant 0 : index
      %c0_94 = arith.constant 0 : index
      %230 = vector.load %arg8[%229, %c0_93, %c0_94] : memref<24x32x4xbf16, #tpu.memory_space<vmem>>, vector<1x32x4xbf16>
      %231 = vector.shape_cast %230 : vector<1x32x4xbf16> to vector<32x4xbf16>
      %cst_95 = arith.constant dense<0.000000e+00> : vector<8x4xf32>
      %232 = tpu.matmul %82, %231, %cst_95 {dimension_numbers = #tpu.dot_dimension_numbers<[1], [0], [0], [1], [0, 0, 1, 1], [], []>} : vector<8x32xbf16>, vector<32x4xbf16>, vector<8x4xf32> -> vector<8x4xf32>
      %c16_i32_96 = arith.constant 16 : i32
      %233 = arith.addi %c16_i32_96, %arg17 : i32
      %234 = arith.index_cast %233 : i32 to index
      %c0_97 = arith.constant 0 : index
      %c0_98 = arith.constant 0 : index
      %235 = vector.load %arg10[%234, %c0_97, %c0_98] : memref<24x1x4xf32, #tpu.memory_space<vmem>>, vector<1x1x4xf32>
      %236 = vector.shape_cast %235 : vector<1x1x4xf32> to vector<1x4xf32>
      %237 = vector.broadcast %236 : vector<1x4xf32> to vector<8x4xf32>
      %238 = arith.addf %232, %237 : vector<8x4xf32>
      %239 = arith.truncf %216 : vector<8x4xf32> to vector<8x4xbf16>
      %240 = arith.truncf %227 : vector<8x4xf32> to vector<8x4xbf16>
      %cst_99 = arith.constant dense<0.000000e+00> : vector<8x8xf32>
      %241 = tpu.matmul %239, %240, %cst_99 {dimension_numbers = #tpu.dot_dimension_numbers<[1], [1], [0], [0], [0, 0, 1, 0], [], []>} : vector<8x4xbf16>, vector<8x4xbf16>, vector<8x8xf32> -> vector<8x8xf32>
      %242 = arith.addf %241, %13 : vector<8x8xf32>
      %cst_100 = arith.constant dense<0xFF800000> : vector<8xf32>
      %243 = vector.multi_reduction <maximumf>, %242, %cst_100 [1] : vector<8x8xf32> to vector<8xf32>
      %244 = vector.shape_cast %243 : vector<8xf32> to vector<8x1xf32>
      %245 = vector.broadcast %244 : vector<8x1xf32> to vector<8x8xf32>
      %246 = arith.subf %242, %245 : vector<8x8xf32>
      %247 = math.exp %246 : vector<8x8xf32>
      %cst_101 = arith.constant dense<0.000000e+00> : vector<8xf32>
      %248 = vector.multi_reduction <add>, %247, %cst_101 [1] : vector<8x8xf32> to vector<8xf32>
      %249 = vector.shape_cast %248 : vector<8xf32> to vector<8x1xf32>
      %250 = tpu.reciprocal %249 {approx = true} : vector<8x1xf32> -> vector<8x1xf32>
      %251 = vector.broadcast %250 : vector<8x1xf32> to vector<8x8xf32>
      %252 = arith.mulf %247, %251 : vector<8x8xf32>
      %253 = arith.truncf %252 : vector<8x8xf32> to vector<8x8xbf16>
      %254 = arith.truncf %238 : vector<8x4xf32> to vector<8x4xbf16>
      %cst_102 = arith.constant dense<0.000000e+00> : vector<8x4xf32>
      %255 = tpu.matmul %253, %254, %cst_102 {dimension_numbers = #tpu.dot_dimension_numbers<[1], [0], [0], [1], [0, 0, 1, 1], [], []>} : vector<8x8xbf16>, vector<8x4xbf16>, vector<8x4xf32> -> vector<8x4xf32>
      %256 = arith.truncf %255 : vector<8x4xf32> to vector<8x4xbf16>
      %257 = arith.index_cast %arg17 : i32 to index
      %c0_103 = arith.constant 0 : index
      %c0_104 = arith.constant 0 : index
      %258 = vector.load %arg9[%257, %c0_103, %c0_104] : memref<8x4x32xbf16, #tpu.memory_space<vmem>>, vector<1x4x32xbf16>
      %259 = vector.shape_cast %258 : vector<1x4x32xbf16> to vector<4x32xbf16>
      %cst_105 = arith.constant dense<0.000000e+00> : vector<8x32xf32>
      %260 = tpu.matmul %256, %259, %cst_105 {dimension_numbers = #tpu.dot_dimension_numbers<[1], [0], [0], [1], [0, 0, 1, 1], [], []>} : vector<8x4xbf16>, vector<4x32xbf16>, vector<8x32xf32> -> vector<8x32xf32>
      %261 = arith.addf %arg18, %260 : vector<8x32xf32>
      scf.yield %261 : vector<8x32xf32>
    }
    %c8_i32_35 = arith.constant 8 : i32
    %86 = vector.broadcast %18 : vector<1x32xf32> to vector<8x32xf32>
    %87 = arith.addf %85, %86 : vector<8x32xf32>
    %88 = arith.addf %54, %87 : vector<8x32xf32>
    %cst_36 = arith.constant dense<0.000000e+00> : vector<8xf32>
    %89 = vector.multi_reduction <add>, %88, %cst_36 [1] : vector<8x32xf32> to vector<8xf32>
    %90 = vector.shape_cast %89 : vector<8xf32> to vector<8x1xf32>
    %cst_37 = arith.constant 3.200000e+01 : f32
    %91 = vector.broadcast %cst_37 : f32 to vector<8x1xf32>
    %92 = arith.divf %90, %91 : vector<8x1xf32>
    %93 = vector.broadcast %92 : vector<8x1xf32> to vector<8x32xf32>
    %94 = arith.subf %88, %93 : vector<8x32xf32>
    %95 = arith.mulf %94, %94 : vector<8x32xf32>
    %cst_38 = arith.constant dense<0.000000e+00> : vector<8xf32>
    %96 = vector.multi_reduction <add>, %95, %cst_38 [1] : vector<8x32xf32> to vector<8xf32>
    %97 = vector.shape_cast %96 : vector<8xf32> to vector<8x1xf32>
    %cst_39 = arith.constant 0.0322580636 : f32
    %98 = vector.broadcast %cst_39 : f32 to vector<8x1xf32>
    %99 = arith.mulf %97, %98 : vector<8x1xf32>
    %100 = math.sqrt %99 : vector<8x1xf32>
    %101 = vector.broadcast %22 : vector<1x32xf32> to vector<8x32xf32>
    %102 = arith.mulf %101, %94 : vector<8x32xf32>
    %cst_40 = arith.constant 9.99999997E-7 : f32
    %103 = vector.broadcast %cst_40 : f32 to vector<8x1xf32>
    %104 = arith.addf %100, %103 : vector<8x1xf32>
    %105 = vector.broadcast %104 : vector<8x1xf32> to vector<8x32xf32>
    %106 = arith.divf %102, %105 : vector<8x32xf32>
    %107 = vector.broadcast %23 : vector<1x32xf32> to vector<8x32xf32>
    %108 = arith.addf %106, %107 : vector<8x32xf32>
    %109 = arith.truncf %108 : vector<8x32xf32> to vector<8x32xbf16>
    %cst_41 = arith.constant 0.000000e+00 : f32
    %110 = vector.broadcast %cst_41 : f32 to vector<8x32xf32>
    %c0_i32_42 = arith.constant 0 : i32
    %c8_i32_43 = arith.constant 8 : i32
    %111 = arith.addi %c0_i32_42, %c8_i32_43 : i32
    %c1_i32_44 = arith.constant 1 : i32
    %112 = scf.for %arg17 = %c0_i32_42 to %111 step %c1_i32_44 iter_args(%arg18 = %110) -> (vector<8x32xf32>)  : i32 {
      %208 = arith.index_cast %arg17 : i32 to index
      %c0_81 = arith.constant 0 : index
      %c0_82 = arith.constant 0 : index
      %209 = vector.load %arg8[%208, %c0_81, %c0_82] : memref<24x32x4xbf16, #tpu.memory_space<vmem>>, vector<1x32x4xbf16>
      %210 = vector.shape_cast %209 : vector<1x32x4xbf16> to vector<32x4xbf16>
      %cst_83 = arith.constant dense<0.000000e+00> : vector<8x4xf32>
      %211 = tpu.matmul %82, %210, %cst_83 {dimension_numbers = #tpu.dot_dimension_numbers<[1], [0], [0], [1], [0, 0, 1, 1], [], []>} : vector<8x32xbf16>, vector<32x4xbf16>, vector<8x4xf32> -> vector<8x4xf32>
      %212 = arith.index_cast %arg17 : i32 to index
      %c0_84 = arith.constant 0 : index
      %c0_85 = arith.constant 0 : index
      %213 = vector.load %arg10[%212, %c0_84, %c0_85] : memref<24x1x4xf32, #tpu.memory_space<vmem>>, vector<1x1x4xf32>
      %214 = vector.shape_cast %213 : vector<1x1x4xf32> to vector<1x4xf32>
      %215 = vector.broadcast %214 : vector<1x4xf32> to vector<8x4xf32>
      %216 = arith.addf %211, %215 : vector<8x4xf32>
      %c8_i32_86 = arith.constant 8 : i32
      %217 = arith.addi %c8_i32_86, %arg17 : i32
      %218 = arith.index_cast %217 : i32 to index
      %c0_87 = arith.constant 0 : index
      %c0_88 = arith.constant 0 : index
      %219 = vector.load %arg8[%218, %c0_87, %c0_88] : memref<24x32x4xbf16, #tpu.memory_space<vmem>>, vector<1x32x4xbf16>
      %220 = vector.shape_cast %219 : vector<1x32x4xbf16> to vector<32x4xbf16>
      %cst_89 = arith.constant dense<0.000000e+00> : vector<8x4xf32>
      %221 = tpu.matmul %109, %220, %cst_89 {dimension_numbers = #tpu.dot_dimension_numbers<[1], [0], [0], [1], [0, 0, 1, 1], [], []>} : vector<8x32xbf16>, vector<32x4xbf16>, vector<8x4xf32> -> vector<8x4xf32>
      %c8_i32_90 = arith.constant 8 : i32
      %222 = arith.addi %c8_i32_90, %arg17 : i32
      %223 = arith.index_cast %222 : i32 to index
      %c0_91 = arith.constant 0 : index
      %c0_92 = arith.constant 0 : index
      %224 = vector.load %arg10[%223, %c0_91, %c0_92] : memref<24x1x4xf32, #tpu.memory_space<vmem>>, vector<1x1x4xf32>
      %225 = vector.shape_cast %224 : vector<1x1x4xf32> to vector<1x4xf32>
      %226 = vector.broadcast %225 : vector<1x4xf32> to vector<8x4xf32>
      %227 = arith.addf %221, %226 : vector<8x4xf32>
      %c16_i32 = arith.constant 16 : i32
      %228 = arith.addi %c16_i32, %arg17 : i32
      %229 = arith.index_cast %228 : i32 to index
      %c0_93 = arith.constant 0 : index
      %c0_94 = arith.constant 0 : index
      %230 = vector.load %arg8[%229, %c0_93, %c0_94] : memref<24x32x4xbf16, #tpu.memory_space<vmem>>, vector<1x32x4xbf16>
      %231 = vector.shape_cast %230 : vector<1x32x4xbf16> to vector<32x4xbf16>
      %cst_95 = arith.constant dense<0.000000e+00> : vector<8x4xf32>
      %232 = tpu.matmul %109, %231, %cst_95 {dimension_numbers = #tpu.dot_dimension_numbers<[1], [0], [0], [1], [0, 0, 1, 1], [], []>} : vector<8x32xbf16>, vector<32x4xbf16>, vector<8x4xf32> -> vector<8x4xf32>
      %c16_i32_96 = arith.constant 16 : i32
      %233 = arith.addi %c16_i32_96, %arg17 : i32
      %234 = arith.index_cast %233 : i32 to index
      %c0_97 = arith.constant 0 : index
      %c0_98 = arith.constant 0 : index
      %235 = vector.load %arg10[%234, %c0_97, %c0_98] : memref<24x1x4xf32, #tpu.memory_space<vmem>>, vector<1x1x4xf32>
      %236 = vector.shape_cast %235 : vector<1x1x4xf32> to vector<1x4xf32>
      %237 = vector.broadcast %236 : vector<1x4xf32> to vector<8x4xf32>
      %238 = arith.addf %232, %237 : vector<8x4xf32>
      %239 = arith.truncf %216 : vector<8x4xf32> to vector<8x4xbf16>
      %240 = arith.truncf %227 : vector<8x4xf32> to vector<8x4xbf16>
      %cst_99 = arith.constant dense<0.000000e+00> : vector<8x8xf32>
      %241 = tpu.matmul %239, %240, %cst_99 {dimension_numbers = #tpu.dot_dimension_numbers<[1], [1], [0], [0], [0, 0, 1, 0], [], []>} : vector<8x4xbf16>, vector<8x4xbf16>, vector<8x8xf32> -> vector<8x8xf32>
      %242 = arith.addf %241, %15 : vector<8x8xf32>
      %cst_100 = arith.constant dense<0xFF800000> : vector<8xf32>
      %243 = vector.multi_reduction <maximumf>, %242, %cst_100 [1] : vector<8x8xf32> to vector<8xf32>
      %244 = vector.shape_cast %243 : vector<8xf32> to vector<8x1xf32>
      %245 = vector.broadcast %244 : vector<8x1xf32> to vector<8x8xf32>
      %246 = arith.subf %242, %245 : vector<8x8xf32>
      %247 = math.exp %246 : vector<8x8xf32>
      %cst_101 = arith.constant dense<0.000000e+00> : vector<8xf32>
      %248 = vector.multi_reduction <add>, %247, %cst_101 [1] : vector<8x8xf32> to vector<8xf32>
      %249 = vector.shape_cast %248 : vector<8xf32> to vector<8x1xf32>
      %250 = tpu.reciprocal %249 {approx = true} : vector<8x1xf32> -> vector<8x1xf32>
      %251 = vector.broadcast %250 : vector<8x1xf32> to vector<8x8xf32>
      %252 = arith.mulf %247, %251 : vector<8x8xf32>
      %253 = arith.truncf %252 : vector<8x8xf32> to vector<8x8xbf16>
      %254 = arith.truncf %238 : vector<8x4xf32> to vector<8x4xbf16>
      %cst_102 = arith.constant dense<0.000000e+00> : vector<8x4xf32>
      %255 = tpu.matmul %253, %254, %cst_102 {dimension_numbers = #tpu.dot_dimension_numbers<[1], [0], [0], [1], [0, 0, 1, 1], [], []>} : vector<8x8xbf16>, vector<8x4xbf16>, vector<8x4xf32> -> vector<8x4xf32>
      %256 = arith.truncf %255 : vector<8x4xf32> to vector<8x4xbf16>
      %257 = arith.index_cast %arg17 : i32 to index
      %c0_103 = arith.constant 0 : index
      %c0_104 = arith.constant 0 : index
      %258 = vector.load %arg9[%257, %c0_103, %c0_104] : memref<8x4x32xbf16, #tpu.memory_space<vmem>>, vector<1x4x32xbf16>
      %259 = vector.shape_cast %258 : vector<1x4x32xbf16> to vector<4x32xbf16>
      %cst_105 = arith.constant dense<0.000000e+00> : vector<8x32xf32>
      %260 = tpu.matmul %256, %259, %cst_105 {dimension_numbers = #tpu.dot_dimension_numbers<[1], [0], [0], [1], [0, 0, 1, 1], [], []>} : vector<8x4xbf16>, vector<4x32xbf16>, vector<8x32xf32> -> vector<8x32xf32>
      %261 = arith.addf %arg18, %260 : vector<8x32xf32>
      scf.yield %261 : vector<8x32xf32>
    }
    %c8_i32_45 = arith.constant 8 : i32
    %113 = vector.broadcast %18 : vector<1x32xf32> to vector<8x32xf32>
    %114 = arith.addf %112, %113 : vector<8x32xf32>
    %115 = arith.addf %80, %114 : vector<8x32xf32>
    %cst_46 = arith.constant dense<0.000000e+00> : vector<8xf32>
    %116 = vector.multi_reduction <add>, %115, %cst_46 [1] : vector<8x32xf32> to vector<8xf32>
    %117 = vector.shape_cast %116 : vector<8xf32> to vector<8x1xf32>
    %cst_47 = arith.constant 3.200000e+01 : f32
    %118 = vector.broadcast %cst_47 : f32 to vector<8x1xf32>
    %119 = arith.divf %117, %118 : vector<8x1xf32>
    %120 = vector.broadcast %119 : vector<8x1xf32> to vector<8x32xf32>
    %121 = arith.subf %115, %120 : vector<8x32xf32>
    %122 = arith.mulf %121, %121 : vector<8x32xf32>
    %cst_48 = arith.constant dense<0.000000e+00> : vector<8xf32>
    %123 = vector.multi_reduction <add>, %122, %cst_48 [1] : vector<8x32xf32> to vector<8xf32>
    %124 = vector.shape_cast %123 : vector<8xf32> to vector<8x1xf32>
    %cst_49 = arith.constant 0.0322580636 : f32
    %125 = vector.broadcast %cst_49 : f32 to vector<8x1xf32>
    %126 = arith.mulf %124, %125 : vector<8x1xf32>
    %127 = math.sqrt %126 : vector<8x1xf32>
    %128 = vector.broadcast %22 : vector<1x32xf32> to vector<8x32xf32>
    %129 = arith.mulf %128, %121 : vector<8x32xf32>
    %cst_50 = arith.constant 9.99999997E-7 : f32
    %130 = vector.broadcast %cst_50 : f32 to vector<8x1xf32>
    %131 = arith.addf %127, %130 : vector<8x1xf32>
    %132 = vector.broadcast %131 : vector<8x1xf32> to vector<8x32xf32>
    %133 = arith.divf %129, %132 : vector<8x32xf32>
    %134 = vector.broadcast %23 : vector<1x32xf32> to vector<8x32xf32>
    %135 = arith.addf %133, %134 : vector<8x32xf32>
    %136 = arith.truncf %108 : vector<8x32xf32> to vector<8x32xbf16>
    %c0_51 = arith.constant 0 : index
    %c0_52 = arith.constant 0 : index
    %137 = vector.load %arg11[%c0_51, %c0_52] : memref<32x64xbf16, #tpu.memory_space<vmem>>, vector<32x64xbf16>
    %cst_53 = arith.constant dense<0.000000e+00> : vector<8x64xf32>
    %138 = tpu.matmul %136, %137, %cst_53 {dimension_numbers = #tpu.dot_dimension_numbers<[1], [0], [0], [1], [0, 0, 1, 1], [], []>} : vector<8x32xbf16>, vector<32x64xbf16>, vector<8x64xf32> -> vector<8x64xf32>
    %139 = vector.broadcast %26 : vector<1x64xf32> to vector<8x64xf32>
    %140 = arith.addf %138, %139 : vector<8x64xf32>
    %cst_54 = arith.constant 0.000000e+00 : f32
    %141 = vector.broadcast %cst_54 : f32 to vector<8x64xf32>
    %142 = arith.maximumf %140, %141 : vector<8x64xf32>
    %143 = arith.truncf %142 : vector<8x64xf32> to vector<8x64xbf16>
    %c0_55 = arith.constant 0 : index
    %c0_56 = arith.constant 0 : index
    %144 = vector.load %arg13[%c0_55, %c0_56] : memref<64x32xbf16, #tpu.memory_space<vmem>>, vector<64x32xbf16>
    %cst_57 = arith.constant dense<0.000000e+00> : vector<8x32xf32>
    %145 = tpu.matmul %143, %144, %cst_57 {dimension_numbers = #tpu.dot_dimension_numbers<[1], [0], [0], [1], [0, 0, 1, 1], [], []>} : vector<8x64xbf16>, vector<64x32xbf16>, vector<8x32xf32> -> vector<8x32xf32>
    %146 = vector.broadcast %19 : vector<1x32xf32> to vector<8x32xf32>
    %147 = arith.addf %145, %146 : vector<8x32xf32>
    %148 = arith.addf %108, %147 : vector<8x32xf32>
    %cst_58 = arith.constant dense<0.000000e+00> : vector<8xf32>
    %149 = vector.multi_reduction <add>, %148, %cst_58 [1] : vector<8x32xf32> to vector<8xf32>
    %150 = vector.shape_cast %149 : vector<8xf32> to vector<8x1xf32>
    %cst_59 = arith.constant 3.200000e+01 : f32
    %151 = vector.broadcast %cst_59 : f32 to vector<8x1xf32>
    %152 = arith.divf %150, %151 : vector<8x1xf32>
    %153 = vector.broadcast %152 : vector<8x1xf32> to vector<8x32xf32>
    %154 = arith.subf %148, %153 : vector<8x32xf32>
    %155 = arith.mulf %154, %154 : vector<8x32xf32>
    %cst_60 = arith.constant dense<0.000000e+00> : vector<8xf32>
    %156 = vector.multi_reduction <add>, %155, %cst_60 [1] : vector<8x32xf32> to vector<8xf32>
    %157 = vector.shape_cast %156 : vector<8xf32> to vector<8x1xf32>
    %cst_61 = arith.constant 0.0322580636 : f32
    %158 = vector.broadcast %cst_61 : f32 to vector<8x1xf32>
    %159 = arith.mulf %157, %158 : vector<8x1xf32>
    %160 = math.sqrt %159 : vector<8x1xf32>
    %161 = vector.broadcast %24 : vector<1x32xf32> to vector<8x32xf32>
    %162 = arith.mulf %161, %154 : vector<8x32xf32>
    %cst_62 = arith.constant 9.99999997E-7 : f32
    %163 = vector.broadcast %cst_62 : f32 to vector<8x1xf32>
    %164 = arith.addf %160, %163 : vector<8x1xf32>
    %165 = vector.broadcast %164 : vector<8x1xf32> to vector<8x32xf32>
    %166 = arith.divf %162, %165 : vector<8x32xf32>
    %167 = vector.broadcast %25 : vector<1x32xf32> to vector<8x32xf32>
    %168 = arith.addf %166, %167 : vector<8x32xf32>
    %169 = arith.truncf %135 : vector<8x32xf32> to vector<8x32xbf16>
    %c0_63 = arith.constant 0 : index
    %c0_64 = arith.constant 0 : index
    %170 = vector.load %arg11[%c0_63, %c0_64] : memref<32x64xbf16, #tpu.memory_space<vmem>>, vector<32x64xbf16>
    %cst_65 = arith.constant dense<0.000000e+00> : vector<8x64xf32>
    %171 = tpu.matmul %169, %170, %cst_65 {dimension_numbers = #tpu.dot_dimension_numbers<[1], [0], [0], [1], [0, 0, 1, 1], [], []>} : vector<8x32xbf16>, vector<32x64xbf16>, vector<8x64xf32> -> vector<8x64xf32>
    %172 = vector.broadcast %26 : vector<1x64xf32> to vector<8x64xf32>
    %173 = arith.addf %171, %172 : vector<8x64xf32>
    %cst_66 = arith.constant 0.000000e+00 : f32
    %174 = vector.broadcast %cst_66 : f32 to vector<8x64xf32>
    %175 = arith.maximumf %173, %174 : vector<8x64xf32>
    %176 = arith.truncf %175 : vector<8x64xf32> to vector<8x64xbf16>
    %c0_67 = arith.constant 0 : index
    %c0_68 = arith.constant 0 : index
    %177 = vector.load %arg13[%c0_67, %c0_68] : memref<64x32xbf16, #tpu.memory_space<vmem>>, vector<64x32xbf16>
    %cst_69 = arith.constant dense<0.000000e+00> : vector<8x32xf32>
    %178 = tpu.matmul %176, %177, %cst_69 {dimension_numbers = #tpu.dot_dimension_numbers<[1], [0], [0], [1], [0, 0, 1, 1], [], []>} : vector<8x64xbf16>, vector<64x32xbf16>, vector<8x32xf32> -> vector<8x32xf32>
    %179 = vector.broadcast %19 : vector<1x32xf32> to vector<8x32xf32>
    %180 = arith.addf %178, %179 : vector<8x32xf32>
    %181 = arith.addf %135, %180 : vector<8x32xf32>
    %cst_70 = arith.constant dense<0.000000e+00> : vector<8xf32>
    %182 = vector.multi_reduction <add>, %181, %cst_70 [1] : vector<8x32xf32> to vector<8xf32>
    %183 = vector.shape_cast %182 : vector<8xf32> to vector<8x1xf32>
    %cst_71 = arith.constant 3.200000e+01 : f32
    %184 = vector.broadcast %cst_71 : f32 to vector<8x1xf32>
    %185 = arith.divf %183, %184 : vector<8x1xf32>
    %186 = vector.broadcast %185 : vector<8x1xf32> to vector<8x32xf32>
    %187 = arith.subf %181, %186 : vector<8x32xf32>
    %188 = arith.mulf %187, %187 : vector<8x32xf32>
    %cst_72 = arith.constant dense<0.000000e+00> : vector<8xf32>
    %189 = vector.multi_reduction <add>, %188, %cst_72 [1] : vector<8x32xf32> to vector<8xf32>
    %190 = vector.shape_cast %189 : vector<8xf32> to vector<8x1xf32>
    %cst_73 = arith.constant 0.0322580636 : f32
    %191 = vector.broadcast %cst_73 : f32 to vector<8x1xf32>
    %192 = arith.mulf %190, %191 : vector<8x1xf32>
    %193 = math.sqrt %192 : vector<8x1xf32>
    %194 = vector.broadcast %24 : vector<1x32xf32> to vector<8x32xf32>
    %195 = arith.mulf %194, %187 : vector<8x32xf32>
    %cst_74 = arith.constant 9.99999997E-7 : f32
    %196 = vector.broadcast %cst_74 : f32 to vector<8x1xf32>
    %197 = arith.addf %193, %196 : vector<8x1xf32>
    %198 = vector.broadcast %197 : vector<8x1xf32> to vector<8x32xf32>
    %199 = arith.divf %195, %198 : vector<8x32xf32>
    %200 = vector.broadcast %25 : vector<1x32xf32> to vector<8x32xf32>
    %201 = arith.addf %199, %200 : vector<8x32xf32>
    %c0_75 = arith.constant 0 : index
    %c0_76 = arith.constant 0 : index
    %c0_77 = arith.constant 0 : index
    %202 = vector.load %arg15[%c0_75, %c0_76, %c0_77] : memref<1x8x32xf32, #tpu.memory_space<vmem>>, vector<1x8x32xf32>
    %203 = vector.shape_cast %202 : vector<1x8x32xf32> to vector<8x32xf32>
    %204 = vector.shape_cast %168 : vector<8x32xf32> to vector<1x8x32xf32>
    tpu.vector_store %arg15[%c0_75, %c0_76, %c0_77], %204 {strides = array<i32>} : memref<1x8x32xf32, #tpu.memory_space<vmem>>, vector<1x8x32xf32>,
    %c0_78 = arith.constant 0 : index
    %c0_79 = arith.constant 0 : index
    %c0_80 = arith.constant 0 : index
    %205 = vector.load %arg16[%c0_78, %c0_79, %c0_80] : memref<1x8x32xf32, #tpu.memory_space<vmem>>, vector<1x8x32xf32>
    %206 = vector.shape_cast %205 : vector<1x8x32xf32> to vector<8x32xf32>
    %207 = vector.shape_cast %201 : vector<8x32xf32> to vector<1x8x32xf32>
    tpu.vector_store %arg16[%c0_78, %c0_79, %c0_80], %207 {strides = array<i32>} : memref<1x8x32xf32, #tpu.memory_space<vmem>>, vector<1x8x32xf32>,
    return
  }
  func.func @transform_0(%arg0: i32) -> (i32, i32, i32) {
    %c0_i32 = arith.constant 0 : i32
    %c0_i32_0 = arith.constant 0 : i32
    %c0_i32_1 = arith.constant 0 : i32
    return %arg0, %c0_i32, %c0_i32_0 : i32, i32, i32
  }
  func.func @transform_1(%arg0: i32) -> (i32, i32, i32) {
    %c0_i32 = arith.constant 0 : i32
    %c0_i32_0 = arith.constant 0 : i32
    %c0_i32_1 = arith.constant 0 : i32
    return %arg0, %c0_i32, %c0_i32_0 : i32, i32, i32
  }
  func.func @transform_2(%arg0: i32) -> (i32, i32, i32) {
    %c0_i32 = arith.constant 0 : i32
    %c0_i32_0 = arith.constant 0 : i32
    %c0_i32_1 = arith.constant 0 : i32
    return %arg0, %c0_i32, %c0_i32_0 : i32, i32, i32
  }
  func.func @transform_3(%arg0: i32) -> (i32, i32, i32) {
    %c0_i32 = arith.constant 0 : i32
    %c0_i32_0 = arith.constant 0 : i32
    %c0_i32_1 = arith.constant 0 : i32
    return %arg0, %c0_i32, %c0_i32_0 : i32, i32, i32
  }
  func.func @transform_4(%arg0: i32) -> (i32, i32, i32) {
    %c0_i32 = arith.constant 0 : i32
    %c0_i32_0 = arith.constant 0 : i32
    %c0_i32_1 = arith.constant 0 : i32
    %c0_i32_2 = arith.constant 0 : i32
    return %c0_i32, %c0_i32_0, %c0_i32_1 : i32, i32, i32
  }
  func.func @transform_5(%arg0: i32) -> (i32, i32, i32) {
    %c0_i32 = arith.constant 0 : i32
    %c0_i32_0 = arith.constant 0 : i32
    %c0_i32_1 = arith.constant 0 : i32
    %c0_i32_2 = arith.constant 0 : i32
    return %c0_i32, %c0_i32_0, %c0_i32_1 : i32, i32, i32
  }
  func.func @transform_6(%arg0: i32) -> (i32, i32, i32) {
    %c0_i32 = arith.constant 0 : i32
    %c0_i32_0 = arith.constant 0 : i32
    %c0_i32_1 = arith.constant 0 : i32
    %c0_i32_2 = arith.constant 0 : i32
    return %c0_i32, %c0_i32_0, %c0_i32_1 : i32, i32, i32
  }
  func.func @transform_7(%arg0: i32) -> (i32, i32, i32) {
    %c0_i32 = arith.constant 0 : i32
    %c0_i32_0 = arith.constant 0 : i32
    %c0_i32_1 = arith.constant 0 : i32
    %c0_i32_2 = arith.constant 0 : i32
    return %c0_i32, %c0_i32_0, %c0_i32_1 : i32, i32, i32
  }
  func.func @transform_8(%arg0: i32) -> (i32, i32, i32) {
    %c0_i32 = arith.constant 0 : i32
    %c0_i32_0 = arith.constant 0 : i32
    %c0_i32_1 = arith.constant 0 : i32
    %c0_i32_2 = arith.constant 0 : i32
    return %c0_i32, %c0_i32_0, %c0_i32_1 : i32, i32, i32
  }
  func.func @transform_9(%arg0: i32) -> (i32, i32, i32) {
    %c0_i32 = arith.constant 0 : i32
    %c0_i32_0 = arith.constant 0 : i32
    %c0_i32_1 = arith.constant 0 : i32
    %c0_i32_2 = arith.constant 0 : i32
    return %c0_i32, %c0_i32_0, %c0_i32_1 : i32, i32, i32
  }
  func.func @transform_10(%arg0: i32) -> (i32, i32) {
    %c0_i32 = arith.constant 0 : i32
    %c0_i32_0 = arith.constant 0 : i32
    %c0_i32_1 = arith.constant 0 : i32
    return %c0_i32, %c0_i32_0 : i32, i32
  }
  func.func @transform_11(%arg0: i32) -> (i32, i32) {
    %c0_i32 = arith.constant 0 : i32
    %c0_i32_0 = arith.constant 0 : i32
    %c0_i32_1 = arith.constant 0 : i32
    return %c0_i32, %c0_i32_0 : i32, i32
  }
  func.func @transform_12(%arg0: i32) -> (i32, i32) {
    %c0_i32 = arith.constant 0 : i32
    %c0_i32_0 = arith.constant 0 : i32
    %c0_i32_1 = arith.constant 0 : i32
    return %c0_i32, %c0_i32_0 : i32, i32
  }
  func.func @transform_13(%arg0: i32) -> (i32, i32) {
    %c0_i32 = arith.constant 0 : i32
    %c0_i32_0 = arith.constant 0 : i32
    %c0_i32_1 = arith.constant 0 : i32
    return %c0_i32, %c0_i32_0 : i32, i32
  }
  func.func @transform_14(%arg0: i32) -> (i32, i32, i32) {
    %c0_i32 = arith.constant 0 : i32
    %c0_i32_0 = arith.constant 0 : i32
    %c0_i32_1 = arith.constant 0 : i32
    return %arg0, %c0_i32, %c0_i32_0 : i32, i32, i32
  }
  func.func @transform_15(%arg0: i32) -> (i32, i32, i32) {
    %c0_i32 = arith.constant 0 : i32
    %c0_i32_0 = arith.constant 0 : i32
    %c0_i32_1 = arith.constant 0 : i32
    return %arg0, %c0_i32, %c0_i32_0 : i32, i32, i32
  }
}

module attributes {stable_mosaic.version = 11 : i64} {
  func.func @_bisga_layer_kernel(%arg0: i32, %arg1: memref<1x8x32xf32, #tpu.memory_space<vmem>>, %arg2: memref<1x8x32xf32, #tpu.memory_space<vmem>>, %arg3: memref<1x1x8xf32, #tpu.memory_space<vmem>>, %arg4: memref<1x1x8xf32, #tpu.memory_space<vmem>>, %arg5: memref<24x32x4xbf16, #tpu.memory_space<vmem>>, %arg6: memref<8x4x32xbf16, #tpu.memory_space<vmem>>, %arg7: memref<24x1x4xf32, #tpu.memory_space<vmem>>, %arg8: memref<24x32x4xbf16, #tpu.memory_space<vmem>>, %arg9: memref<8x4x32xbf16, #tpu.memory_space<vmem>>, %arg10: memref<24x1x4xf32, #tpu.memory_space<vmem>>, %arg11: memref<32x64xbf16, #tpu.memory_space<vmem>>, %arg12: memref<1x64xf32, #tpu.memory_space<vmem>>, %arg13: memref<64x32xbf16, #tpu.memory_space<vmem>>, %arg14: memref<9x32xf32, #tpu.memory_space<vmem>>, %arg15: memref<1x8x32xf32, #tpu.memory_space<vmem>>, %arg16: memref<1x8x32xf32, #tpu.memory_space<vmem>>) attributes {dimension_semantics = [#tpu.dimension_semantics<parallel>], iteration_bounds = array<i64: 2>, scalar_prefetch = 0 : i64, scratch_operands = 0 : i64, tpu.core_type = #tpu.core_type<tc>, window_params = [{transform_indices = @transform_0, window_bounds = array<i64: 1, 8, 32>}, {transform_indices = @transform_1, window_bounds = array<i64: 1, 8, 32>}, {transform_indices = @transform_2, window_bounds = array<i64: 1, 1, 8>}, {transform_indices = @transform_3, window_bounds = array<i64: 1, 1, 8>}, {pipeline_mode = #tpu.pipeline_mode<synchronous>, transform_indices = @transform_4, window_bounds = array<i64: 24, 32, 4>}, {pipeline_mode = #tpu.pipeline_mode<synchronous>, transform_indices = @transform_5, window_bounds = array<i64: 8, 4, 32>}, {pipeline_mode = #tpu.pipeline_mode<synchronous>, transform_indices = @transform_6, window_bounds = array<i64: 24, 1, 4>}, {pipeline_mode = #tpu.pipeline_mode<synchronous>, transform_indices = @transform_7, window_bounds = array<i64: 24, 32, 4>}, {pipeline_mode = #tpu.pipeline_mode<synchronous>, transform_indices = @transform_8, window_bounds = array<i64: 8, 4, 32>}, {pipeline_mode = #tpu.pipeline_mode<synchronous>, transform_indices = @transform_9, window_bounds = array<i64: 24, 1, 4>}, {pipeline_mode = #tpu.pipeline_mode<synchronous>, transform_indices = @transform_10, window_bounds = array<i64: 32, 64>}, {pipeline_mode = #tpu.pipeline_mode<synchronous>, transform_indices = @transform_11, window_bounds = array<i64: 1, 64>}, {pipeline_mode = #tpu.pipeline_mode<synchronous>, transform_indices = @transform_12, window_bounds = array<i64: 64, 32>}, {pipeline_mode = #tpu.pipeline_mode<synchronous>, transform_indices = @transform_13, window_bounds = array<i64: 9, 32>}, {transform_indices = @transform_14, window_bounds = array<i64: 1, 8, 32>}, {transform_indices = @transform_15, window_bounds = array<i64: 1, 8, 32>}]} {
    %c0 = arith.constant 0 : index
    %c0_0 = arith.constant 0 : index
    %c0_1 = arith.constant 0 : index
    %0 = vector.load %arg1[%c0, %c0_0, %c0_1] : memref<1x8x32xf32, #tpu.memory_space<vmem>>, vector<1x8x32xf32>
    %1 = vector.shape_cast %0 : vector<1x8x32xf32> to vector<8x32xf32>
    %c0_2 = arith.constant 0 : index
    %c0_3 = arith.constant 0 : index
    %c0_4 = arith.constant 0 : index
    %2 = vector.load %arg2[%c0_2, %c0_3, %c0_4] : memref<1x8x32xf32, #tpu.memory_space<vmem>>, vector<1x8x32xf32>
    %3 = vector.shape_cast %2 : vector<1x8x32xf32> to vector<8x32xf32>
    %c0_5 = arith.constant 0 : index
    %c0_6 = arith.constant 0 : index
    %c0_7 = arith.constant 0 : index
    %4 = vector.load %arg3[%c0_5, %c0_6, %c0_7] : memref<1x1x8xf32, #tpu.memory_space<vmem>>, vector<1x1x8xf32>
    %5 = vector.shape_cast %4 : vector<1x1x8xf32> to vector<1x8xf32>
    %c0_8 = arith.constant 0 : index
    %c0_9 = arith.constant 0 : index
    %c0_10 = arith.constant 0 : index
    %6 = vector.load %arg4[%c0_8, %c0_9, %c0_10] : memref<1x1x8xf32, #tpu.memory_space<vmem>>, vector<1x1x8xf32>
    %7 = vector.shape_cast %6 : vector<1x1x8xf32> to vector<1x8xf32>
    %8 = vector.shape_cast %5 : vector<1x8xf32> to vector<1x8xf32>
    %9 = vector.broadcast %8 : vector<1x8xf32> to vector<8x8xf32>
    %10 = vector.shape_cast %7 : vector<1x8xf32> to vector<1x8xf32>
    %11 = vector.broadcast %10 : vector<1x8xf32> to vector<8x8xf32>
    %12 = vector.shape_cast %7 : vector<1x8xf32> to vector<1x8xf32>
    %13 = vector.broadcast %12 : vector<1x8xf32> to vector<8x8xf32>
    %14 = vector.shape_cast %5 : vector<1x8xf32> to vector<1x8xf32>
    %15 = vector.broadcast %14 : vector<1x8xf32> to vector<8x8xf32>
    %c0_11 = arith.constant 0 : index
    %c0_12 = arith.constant 0 : index
    %16 = vector.load %arg14[%c0_11, %c0_12] : memref<9x32xf32, #tpu.memory_space<vmem>>, vector<9x32xf32>
    %17 = vector.extract_strided_slice %16 {offsets = [0, 0], sizes = [1, 32], strides = [1, 1]} : vector<9x32xf32> to vector<1x32xf32>
    %18 = vector.extract_strided_slice %16 {offsets = [1, 0], sizes = [1, 32], strides = [1, 1]} : vector<9x32xf32> to vector<1x32xf32>
    %19 = vector.extract_strided_slice %16 {offsets = [2, 0], sizes = [1, 32], strides = [1, 1]} : vector<9x32xf32> to vector<1x32xf32>
    %20 = vector.extract_strided_slice %16 {offsets = [3, 0], sizes = [1, 32], strides = [1, 1]} : vector<9x32xf32> to vector<1x32xf32>
    %21 = vector.extract_strided_slice %16 {offsets = [4, 0], sizes = [1, 32], strides = [1, 1]} : vector<9x32xf32> to vector<1x32xf32>
    %22 = vector.extract_strided_slice %16 {offsets = [5, 0], sizes = [1, 32], strides = [1, 1]} : vector<9x32xf32> to vector<1x32xf32>
    %23 = vector.extract_strided_slice %16 {offsets = [6, 0], sizes = [1, 32], strides = [1, 1]} : vector<9x32xf32> to vector<1x32xf32>
    %24 = vector.extract_strided_slice %16 {offsets = [7, 0], sizes = [1, 32], strides = [1, 1]} : vector<9x32xf32> to vector<1x32xf32>
    %25 = vector.extract_strided_slice %16 {offsets = [8, 0], sizes = [1, 32], strides = [1, 1]} : vector<9x32xf32> to vector<1x32xf32>
    %c0_13 = arith.constant 0 : index
    %c0_14 = arith.constant 0 : index
    %26 = vector.load %arg12[%c0_13, %c0_14] : memref<1x64xf32, #tpu.memory_space<vmem>>, vector<1x64xf32>
    %27 = arith.truncf %1 : vector<8x32xf32> to vector<8x32xbf16>
    %28 = arith.truncf %3 : vector<8x32xf32> to vector<8x32xbf16>
    %cst = arith.constant 0.000000e+00 : f32
    %29 = vector.broadcast %cst : f32 to vector<8x32xf32>
    %c0_i32 = arith.constant 0 : i32
    %c8_i32 = arith.constant 8 : i32
    %30 = arith.addi %c0_i32, %c8_i32 : i32
    %c1_i32 = arith.constant 1 : i32
    %31 = scf.for %arg17 = %c0_i32 to %30 step %c1_i32 iter_args(%arg18 = %29) -> (vector<8x32xf32>)  : i32 {
      %208 = arith.index_cast %arg17 : i32 to index
      %c0_81 = arith.constant 0 : index
      %c0_82 = arith.constant 0 : index
      %209 = vector.load %arg5[%208, %c0_81, %c0_82] : memref<24x32x4xbf16, #tpu.memory_space<vmem>>, vector<1x32x4xbf16>
      %210 = vector.shape_cast %209 : vector<1x32x4xbf16> to vector<32x4xbf16>
      %cst_83 = arith.constant dense<0.000000e+00> : vector<8x4xf32>
      %211 = tpu.matmul %27, %210, %cst_83 {dimension_numbers = #tpu.dot_dimension_numbers<[1], [0], [0], [1], [0, 0, 1, 1], [], []>} : vector<8x32xbf16>, vector<32x4xbf16>, vector<8x4xf32> -> vector<8x4xf32>
      %212 = arith.index_cast %arg17 : i32 to index
      %c0_84 = arith.constant 0 : index
      %c0_85 = arith.constant 0 : index
      %213 = vector.load %arg7[%212, %c0_84, %c0_85] : memref<24x1x4xf32, #tpu.memory_space<vmem>>, vector<1x1x4xf32>
      %214 = vector.shape_cast %213 : vector<1x1x4xf32> to vector<1x4xf32>
      %215 = vector.broadcast %214 : vector<1x4xf32> to vector<8x4xf32>
      %216 = arith.addf %211, %215 : vector<8x4xf32>
      %c8_i32_86 = arith.constant 8 : i32
      %217 = arith.addi %c8_i32_86, %arg17 : i32
      %218 = arith.index_cast %217 : i32 to index
      %c0_87 = arith.constant 0 : index
      %c0_88 = arith.constant 0 : index
      %219 = vector.load %arg5[%218, %c0_87, %c0_88] : memref<24x32x4xbf16, #tpu.memory_space<vmem>>, vector<1x32x4xbf16>
      %220 = vector.shape_cast %219 : vector<1x32x4xbf16> to vector<32x4xbf16>
      %cst_89 = arith.constant dense<0.000000e+00> : vector<8x4xf32>
      %221 = tpu.matmul %27, %220, %cst_89 {dimension_numbers = #tpu.dot_dimension_numbers<[1], [0], [0], [1], [0, 0, 1, 1], [], []>} : vector<8x32xbf16>, vector<32x4xbf16>, vector<8x4xf32> -> vector<8x4xf32>
      %c8_i32_90 = arith.constant 8 : i32
      %222 = arith.addi %c8_i32_90, %arg17 : i32
      %223 = arith.index_cast %222 : i32 to index
      %c0_91 = arith.constant 0 : index
      %c0_92 = arith.constant 0 : index
      %224 = vector.load %arg7[%223, %c0_91, %c0_92] : memref<24x1x4xf32, #tpu.memory_space<vmem>>, vector<1x1x4xf32>
      %225 = vector.shape_cast %224 : vector<1x1x4xf32> to vector<1x4xf32>
      %226 = vector.broadcast %225 : vector<1x4xf32> to vector<8x4xf32>
      %227 = arith.addf %221, %226 : vector<8x4xf32>
      %c16_i32 = arith.constant 16 : i32
      %228 = arith.addi %c16_i32, %arg17 : i32
      %229 = arith.index_cast %228 : i32 to index
      %c0_93 = arith.constant 0 : index
      %c0_94 = arith.constant 0 : index
      %230 = vector.load %arg5[%229, %c0_93, %c0_94] : memref<24x32x4xbf16, #tpu.memory_space<vmem>>, vector<1x32x4xbf16>
      %231 = vector.shape_cast %230 : vector<1x32x4xbf16> to vector<32x4xbf16>
      %cst_95 = arith.constant dense<0.000000e+00> : vector<8x4xf32>
      %232 = tpu.matmul %27, %231, %cst_95 {dimension_numbers = #tpu.dot_dimension_numbers<[1], [0], [0], [1], [0, 0, 1, 1], [], []>} : vector<8x32xbf16>, vector<32x4xbf16>, vector<8x4xf32> -> vector<8x4xf32>
      %c16_i32_96 = arith.constant 16 : i32
      %233 = arith.addi %c16_i32_96, %arg17 : i32
      %234 = arith.index_cast %233 : i32 to index
      %c0_97 = arith.constant 0 : index
      %c0_98 = arith.constant 0 : index
      %235 = vector.load %arg7[%234, %c0_97, %c0_98] : memref<24x1x4xf32, #tpu.memory_space<vmem>>, vector<1x1x4xf32>
      %236 = vector.shape_cast %235 : vector<1x1x4xf32> to vector<1x4xf32>
      %237 = vector.broadcast %236 : vector<1x4xf32> to vector<8x4xf32>
      %238 = arith.addf %232, %237 : vector<8x4xf32>
      %239 = arith.truncf %216 : vector<8x4xf32> to vector<8x4xbf16>
      %240 = arith.truncf %227 : vector<8x4xf32> to vector<8x4xbf16>
      %cst_99 = arith.constant dense<0.000000e+00> : vector<8x8xf32>
      %241 = tpu.matmul %239, %240, %cst_99 {dimension_numbers = #tpu.dot_dimension_numbers<[1], [1], [0], [0], [0, 0, 1, 0], [], []>} : vector<8x4xbf16>, vector<8x4xbf16>, vector<8x8xf32> -> vector<8x8xf32>
      %242 = arith.addf %241, %9 : vector<8x8xf32>
      %cst_100 = arith.constant dense<0xFF800000> : vector<8xf32>
      %243 = vector.multi_reduction <maximumf>, %242, %cst_100 [1] : vector<8x8xf32> to vector<8xf32>
      %244 = vector.shape_cast %243 : vector<8xf32> to vector<8x1xf32>
      %245 = vector.broadcast %244 : vector<8x1xf32> to vector<8x8xf32>
      %246 = arith.subf %242, %245 : vector<8x8xf32>
      %247 = math.exp %246 : vector<8x8xf32>
      %cst_101 = arith.constant dense<0.000000e+00> : vector<8xf32>
      %248 = vector.multi_reduction <add>, %247, %cst_101 [1] : vector<8x8xf32> to vector<8xf32>
      %249 = vector.shape_cast %248 : vector<8xf32> to vector<8x1xf32>
      %250 = tpu.reciprocal %249 {approx = true} : vector<8x1xf32> -> vector<8x1xf32>
      %251 = vector.broadcast %250 : vector<8x1xf32> to vector<8x8xf32>
      %252 = arith.mulf %247, %251 : vector<8x8xf32>
      %253 = arith.truncf %252 : vector<8x8xf32> to vector<8x8xbf16>
      %254 = arith.truncf %238 : vector<8x4xf32> to vector<8x4xbf16>
      %cst_102 = arith.constant dense<0.000000e+00> : vector<8x4xf32>
      %255 = tpu.matmul %253, %254, %cst_102 {dimension_numbers = #tpu.dot_dimension_numbers<[1], [0], [0], [1], [0, 0, 1, 1], [], []>} : vector<8x8xbf16>, vector<8x4xbf16>, vector<8x4xf32> -> vector<8x4xf32>
      %256 = arith.truncf %255 : vector<8x4xf32> to vector<8x4xbf16>
      %257 = arith.index_cast %arg17 : i32 to index
      %c0_103 = arith.constant 0 : index
      %c0_104 = arith.constant 0 : index
      %258 = vector.load %arg6[%257, %c0_103, %c0_104] : memref<8x4x32xbf16, #tpu.memory_space<vmem>>, vector<1x4x32xbf16>
      %259 = vector.shape_cast %258 : vector<1x4x32xbf16> to vector<4x32xbf16>
      %cst_105 = arith.constant dense<0.000000e+00> : vector<8x32xf32>
      %260 = tpu.matmul %256, %259, %cst_105 {dimension_numbers = #tpu.dot_dimension_numbers<[1], [0], [0], [1], [0, 0, 1, 1], [], []>} : vector<8x4xbf16>, vector<4x32xbf16>, vector<8x32xf32> -> vector<8x32xf32>
      %261 = arith.addf %arg18, %260 : vector<8x32xf32>
      scf.yield %261 : vector<8x32xf32>
    }
    %c8_i32_15 = arith.constant 8 : i32
    %32 = vector.broadcast %17 : vector<1x32xf32> to vector<8x32xf32>
    %33 = arith.addf %31, %32 : vector<8x32xf32>
    %34 = arith.addf %1, %33 : vector<8x32xf32>
    %cst_16 = arith.constant dense<0.000000e+00> : vector<8xf32>
    %35 = vector.multi_reduction <add>, %34, %cst_16 [1] : vector<8x32xf32> to vector<8xf32>
    %36 = vector.shape_cast %35 : vector<8xf32> to vector<8x1xf32>
    %cst_17 = arith.constant 3.200000e+01 : f32
    %37 = vector.broadcast %cst_17 : f32 to vector<8x1xf32>
    %38 = arith.divf %36, %37 : vector<8x1xf32>
    %39 = vector.broadcast %38 : vector<8x1xf32> to vector<8x32xf32>
    %40 = arith.subf %34, %39 : vector<8x32xf32>
    %41 = arith.mulf %40, %40 : vector<8x32xf32>
    %cst_18 = arith.constant dense<0.000000e+00> : vector<8xf32>
    %42 = vector.multi_reduction <add>, %41, %cst_18 [1] : vector<8x32xf32> to vector<8xf32>
    %43 = vector.shape_cast %42 : vector<8xf32> to vector<8x1xf32>
    %cst_19 = arith.constant 0.0322580636 : f32
    %44 = vector.broadcast %cst_19 : f32 to vector<8x1xf32>
    %45 = arith.mulf %43, %44 : vector<8x1xf32>
    %46 = math.sqrt %45 : vector<8x1xf32>
    %47 = vector.broadcast %20 : vector<1x32xf32> to vector<8x32xf32>
    %48 = arith.mulf %47, %40 : vector<8x32xf32>
    %cst_20 = arith.constant 9.99999997E-7 : f32
    %49 = vector.broadcast %cst_20 : f32 to vector<8x1xf32>
    %50 = arith.addf %46, %49 : vector<8x1xf32>
    %51 = vector.broadcast %50 : vector<8x1xf32> to vector<8x32xf32>
    %52 = arith.divf %48, %51 : vector<8x32xf32>
    %53 = vector.broadcast %21 : vector<1x32xf32> to vector<8x32xf32>
    %54 = arith.addf %52, %53 : vector<8x32xf32>
    %cst_21 = arith.constant 0.000000e+00 : f32
    %55 = vector.broadcast %cst_21 : f32 to vector<8x32xf32>
    %c0_i32_22 = arith.constant 0 : i32
    %c8_i32_23 = arith.constant 8 : i32
    %56 = arith.addi %c0_i32_22, %c8_i32_23 : i32
    %c1_i32_24 = arith.constant 1 : i32
    %57 = scf.for %arg17 = %c0_i32_22 to %56 step %c1_i32_24 iter_args(%arg18 = %55) -> (vector<8x32xf32>)  : i32 {
      %208 = arith.index_cast %arg17 : i32 to index
      %c0_81 = arith.constant 0 : index
      %c0_82 = arith.constant 0 : index
      %209 = vector.load %arg5[%208, %c0_81, %c0_82] : memref<24x32x4xbf16, #tpu.memory_space<vmem>>, vector<1x32x4xbf16>
      %210 = vector.shape_cast %209 : vector<1x32x4xbf16> to vector<32x4xbf16>
      %cst_83 = arith.constant dense<0.000000e+00> : vector<8x4xf32>
      %211 = tpu.matmul %28, %210, %cst_83 {dimension_numbers = #tpu.dot_dimension_numbers<[1], [0], [0], [1], [0, 0, 1, 1], [], []>} : vector<8x32xbf16>, vector<32x4xbf16>, vector<8x4xf32> -> vector<8x4xf32>
      %212 = arith.index_cast %arg17 : i32 to index
      %c0_84 = arith.constant 0 : index
      %c0_85 = arith.constant 0 : index
      %213 = vector.load %arg7[%212, %c0_84, %c0_85] : memref<24x1x4xf32, #tpu.memory_space<vmem>>, vector<1x1x4xf32>
      %214 = vector.shape_cast %213 : vector<1x1x4xf32> to vector<1x4xf32>
      %215 = vector.broadcast %214 : vector<1x4xf32> to vector<8x4xf32>
      %216 = arith.addf %211, %215 : vector<8x4xf32>
      %c8_i32_86 = arith.constant 8 : i32
      %217 = arith.addi %c8_i32_86, %arg17 : i32
      %218 = arith.index_cast %217 : i32 to index
      %c0_87 = arith.constant 0 : index
      %c0_88 = arith.constant 0 : index
      %219 = vector.load %arg5[%218, %c0_87, %c0_88] : memref<24x32x4xbf16, #tpu.memory_space<vmem>>, vector<1x32x4xbf16>
      %220 = vector.shape_cast %219 : vector<1x32x4xbf16> to vector<32x4xbf16>
      %cst_89 = arith.constant dense<0.000000e+00> : vector<8x4xf32>
      %221 = tpu.matmul %28, %220, %cst_89 {dimension_numbers = #tpu.dot_dimension_numbers<[1], [0], [0], [1], [0, 0, 1, 1], [], []>} : vector<8x32xbf16>, vector<32x4xbf16>, vector<8x4xf32> -> vector<8x4xf32>
      %c8_i32_90 = arith.constant 8 : i32
      %222 = arith.addi %c8_i32_90, %arg17 : i32
      %223 = arith.index_cast %222 : i32 to index
      %c0_91 = arith.constant 0 : index
      %c0_92 = arith.constant 0 : index
      %224 = vector.load %arg7[%223, %c0_91, %c0_92] : memref<24x1x4xf32, #tpu.memory_space<vmem>>, vector<1x1x4xf32>
      %225 = vector.shape_cast %224 : vector<1x1x4xf32> to vector<1x4xf32>
      %226 = vector.broadcast %225 : vector<1x4xf32> to vector<8x4xf32>
      %227 = arith.addf %221, %226 : vector<8x4xf32>
      %c16_i32 = arith.constant 16 : i32
      %228 = arith.addi %c16_i32, %arg17 : i32
      %229 = arith.index_cast %228 : i32 to index
      %c0_93 = arith.constant 0 : index
      %c0_94 = arith.constant 0 : index
      %230 = vector.load %arg5[%229, %c0_93, %c0_94] : memref<24x32x4xbf16, #tpu.memory_space<vmem>>, vector<1x32x4xbf16>
      %231 = vector.shape_cast %230 : vector<1x32x4xbf16> to vector<32x4xbf16>
      %cst_95 = arith.constant dense<0.000000e+00> : vector<8x4xf32>
      %232 = tpu.matmul %28, %231, %cst_95 {dimension_numbers = #tpu.dot_dimension_numbers<[1], [0], [0], [1], [0, 0, 1, 1], [], []>} : vector<8x32xbf16>, vector<32x4xbf16>, vector<8x4xf32> -> vector<8x4xf32>
      %c16_i32_96 = arith.constant 16 : i32
      %233 = arith.addi %c16_i32_96, %arg17 : i32
      %234 = arith.index_cast %233 : i32 to index
      %c0_97 = arith.constant 0 : index
      %c0_98 = arith.constant 0 : index
      %235 = vector.load %arg7[%234, %c0_97, %c0_98] : memref<24x1x4xf32, #tpu.memory_space<vmem>>, vector<1x1x4xf32>
      %236 = vector.shape_cast %235 : vector<1x1x4xf32> to vector<1x4xf32>
      %237 = vector.broadcast %236 : vector<1x4xf32> to vector<8x4xf32>
      %238 = arith.addf %232, %237 : vector<8x4xf32>
      %239 = arith.truncf %216 : vector<8x4xf32> to vector<8x4xbf16>
      %240 = arith.truncf %227 : vector<8x4xf32> to vector<8x4xbf16>
      %cst_99 = arith.constant dense<0.000000e+00> : vector<8x8xf32>
      %241 = tpu.matmul %239, %240, %cst_99 {dimension_numbers = #tpu.dot_dimension_numbers<[1], [1], [0], [0], [0, 0, 1, 0], [], []>} : vector<8x4xbf16>, vector<8x4xbf16>, vector<8x8xf32> -> vector<8x8xf32>
      %242 = arith.addf %241, %11 : vector<8x8xf32>
      %cst_100 = arith.constant dense<0xFF800000> : vector<8xf32>
      %243 = vector.multi_reduction <maximumf>, %242, %cst_100 [1] : vector<8x8xf32> to vector<8xf32>
      %244 = vector.shape_cast %243 : vector<8xf32> to vector<8x1xf32>
      %245 = vector.broadcast %244 : vector<8x1xf32> to vector<8x8xf32>
      %246 = arith.subf %242, %245 : vector<8x8xf32>
      %247 = math.exp %246 : vector<8x8xf32>
      %cst_101 = arith.constant dense<0.000000e+00> : vector<8xf32>
      %248 = vector.multi_reduction <add>, %247, %cst_101 [1] : vector<8x8xf32> to vector<8xf32>
      %249 = vector.shape_cast %248 : vector<8xf32> to vector<8x1xf32>
      %250 = tpu.reciprocal %249 {approx = true} : vector<8x1xf32> -> vector<8x1xf32>
      %251 = vector.broadcast %250 : vector<8x1xf32> to vector<8x8xf32>
      %252 = arith.mulf %247, %251 : vector<8x8xf32>
      %253 = arith.truncf %252 : vector<8x8xf32> to vector<8x8xbf16>
      %254 = arith.truncf %238 : vector<8x4xf32> to vector<8x4xbf16>
      %cst_102 = arith.constant dense<0.000000e+00> : vector<8x4xf32>
      %255 = tpu.matmul %253, %254, %cst_102 {dimension_numbers = #tpu.dot_dimension_numbers<[1], [0], [0], [1], [0, 0, 1, 1], [], []>} : vector<8x8xbf16>, vector<8x4xbf16>, vector<8x4xf32> -> vector<8x4xf32>
      %256 = arith.truncf %255 : vector<8x4xf32> to vector<8x4xbf16>
      %257 = arith.index_cast %arg17 : i32 to index
      %c0_103 = arith.constant 0 : index
      %c0_104 = arith.constant 0 : index
      %258 = vector.load %arg6[%257, %c0_103, %c0_104] : memref<8x4x32xbf16, #tpu.memory_space<vmem>>, vector<1x4x32xbf16>
      %259 = vector.shape_cast %258 : vector<1x4x32xbf16> to vector<4x32xbf16>
      %cst_105 = arith.constant dense<0.000000e+00> : vector<8x32xf32>
      %260 = tpu.matmul %256, %259, %cst_105 {dimension_numbers = #tpu.dot_dimension_numbers<[1], [0], [0], [1], [0, 0, 1, 1], [], []>} : vector<8x4xbf16>, vector<4x32xbf16>, vector<8x32xf32> -> vector<8x32xf32>
      %261 = arith.addf %arg18, %260 : vector<8x32xf32>
      scf.yield %261 : vector<8x32xf32>
    }
    %c8_i32_25 = arith.constant 8 : i32
    %58 = vector.broadcast %17 : vector<1x32xf32> to vector<8x32xf32>
    %59 = arith.addf %57, %58 : vector<8x32xf32>
    %60 = arith.addf %3, %59 : vector<8x32xf32>
    %cst_26 = arith.constant dense<0.000000e+00> : vector<8xf32>
    %61 = vector.multi_reduction <add>, %60, %cst_26 [1] : vector<8x32xf32> to vector<8xf32>
    %62 = vector.shape_cast %61 : vector<8xf32> to vector<8x1xf32>
    %cst_27 = arith.constant 3.200000e+01 : f32
    %63 = vector.broadcast %cst_27 : f32 to vector<8x1xf32>
    %64 = arith.divf %62, %63 : vector<8x1xf32>
    %65 = vector.broadcast %64 : vector<8x1xf32> to vector<8x32xf32>
    %66 = arith.subf %60, %65 : vector<8x32xf32>
    %67 = arith.mulf %66, %66 : vector<8x32xf32>
    %cst_28 = arith.constant dense<0.000000e+00> : vector<8xf32>
    %68 = vector.multi_reduction <add>, %67, %cst_28 [1] : vector<8x32xf32> to vector<8xf32>
    %69 = vector.shape_cast %68 : vector<8xf32> to vector<8x1xf32>
    %cst_29 = arith.constant 0.0322580636 : f32
    %70 = vector.broadcast %cst_29 : f32 to vector<8x1xf32>
    %71 = arith.mulf %69, %70 : vector<8x1xf32>
    %72 = math.sqrt %71 : vector<8x1xf32>
    %73 = vector.broadcast %20 : vector<1x32xf32> to vector<8x32xf32>
    %74 = arith.mulf %73, %66 : vector<8x32xf32>
    %cst_30 = arith.constant 9.99999997E-7 : f32
    %75 = vector.broadcast %cst_30 : f32 to vector<8x1xf32>
    %76 = arith.addf %72, %75 : vector<8x1xf32>
    %77 = vector.broadcast %76 : vector<8x1xf32> to vector<8x32xf32>
    %78 = arith.divf %74, %77 : vector<8x32xf32>
    %79 = vector.broadcast %21 : vector<1x32xf32> to vector<8x32xf32>
    %80 = arith.addf %78, %79 : vector<8x32xf32>
    %81 = arith.truncf %54 : vector<8x32xf32> to vector<8x32xbf16>
    %82 = arith.truncf %80 : vector<8x32xf32> to vector<8x32xbf16>
    %cst_31 = arith.constant 0.000000e+00 : f32
    %83 = vector.broadcast %cst_31 : f32 to vector<8x32xf32>
    %c0_i32_32 = arith.constant 0 : i32
    %c8_i32_33 = arith.constant 8 : i32
    %84 = arith.addi %c0_i32_32, %c8_i32_33 : i32
    %c1_i32_34 = arith.constant 1 : i32
    %85 = scf.for %arg17 = %c0_i32_32 to %84 step %c1_i32_34 iter_args(%arg18 = %83) -> (vector<8x32xf32>)  : i32 {
      %208 = arith.index_cast %arg17 : i32 to index
      %c0_81 = arith.constant 0 : index
      %c0_82 = arith.constant 0 : index
      %209 = vector.load %arg8[%208, %c0_81, %c0_82] : memref<24x32x4xbf16, #tpu.memory_space<vmem>>, vector<1x32x4xbf16>
      %210 = vector.shape_cast %209 : vector<1x32x4xbf16> to vector<32x4xbf16>
      %cst_83 = arith.constant dense<0.000000e+00> : vector<8x4xf32>
      %211 = tpu.matmul %81, %210, %cst_83 {dimension_numbers = #tpu.dot_dimension_numbers<[1], [0], [0], [1], [0, 0, 1, 1], [], []>} : vector<8x32xbf16>, vector<32x4xbf16>, vector<8x4xf32> -> vector<8x4xf32>
      %212 = arith.index_cast %arg17 : i32 to index
      %c0_84 = arith.constant 0 : index
      %c0_85 = arith.constant 0 : index
      %213 = vector.load %arg10[%212, %c0_84, %c0_85] : memref<24x1x4xf32, #tpu.memory_space<vmem>>, vector<1x1x4xf32>
      %214 = vector.shape_cast %213 : vector<1x1x4xf32> to vector<1x4xf32>
      %215 = vector.broadcast %214 : vector<1x4xf32> to vector<8x4xf32>
      %216 = arith.addf %211, %215 : vector<8x4xf32>
      %c8_i32_86 = arith.constant 8 : i32
      %217 = arith.addi %c8_i32_86, %arg17 : i32
      %218 = arith.index_cast %217 : i32 to index
      %c0_87 = arith.constant 0 : index
      %c0_88 = arith.constant 0 : index
      %219 = vector.load %arg8[%218, %c0_87, %c0_88] : memref<24x32x4xbf16, #tpu.memory_space<vmem>>, vector<1x32x4xbf16>
      %220 = vector.shape_cast %219 : vector<1x32x4xbf16> to vector<32x4xbf16>
      %cst_89 = arith.constant dense<0.000000e+00> : vector<8x4xf32>
      %221 = tpu.matmul %82, %220, %cst_89 {dimension_numbers = #tpu.dot_dimension_numbers<[1], [0], [0], [1], [0, 0, 1, 1], [], []>} : vector<8x32xbf16>, vector<32x4xbf16>, vector<8x4xf32> -> vector<8x4xf32>
      %c8_i32_90 = arith.constant 8 : i32
      %222 = arith.addi %c8_i32_90, %arg17 : i32
      %223 = arith.index_cast %222 : i32 to index
      %c0_91 = arith.constant 0 : index
      %c0_92 = arith.constant 0 : index
      %224 = vector.load %arg10[%223, %c0_91, %c0_92] : memref<24x1x4xf32, #tpu.memory_space<vmem>>, vector<1x1x4xf32>
      %225 = vector.shape_cast %224 : vector<1x1x4xf32> to vector<1x4xf32>
      %226 = vector.broadcast %225 : vector<1x4xf32> to vector<8x4xf32>
      %227 = arith.addf %221, %226 : vector<8x4xf32>
      %c16_i32 = arith.constant 16 : i32
      %228 = arith.addi %c16_i32, %arg17 : i32
      %229 = arith.index_cast %228 : i32 to index
      %c0_93 = arith.constant 0 : index
      %c0_94 = arith.constant 0 : index
      %230 = vector.load %arg8[%229, %c0_93, %c0_94] : memref<24x32x4xbf16, #tpu.memory_space<vmem>>, vector<1x32x4xbf16>
      %231 = vector.shape_cast %230 : vector<1x32x4xbf16> to vector<32x4xbf16>
      %cst_95 = arith.constant dense<0.000000e+00> : vector<8x4xf32>
      %232 = tpu.matmul %82, %231, %cst_95 {dimension_numbers = #tpu.dot_dimension_numbers<[1], [0], [0], [1], [0, 0, 1, 1], [], []>} : vector<8x32xbf16>, vector<32x4xbf16>, vector<8x4xf32> -> vector<8x4xf32>
      %c16_i32_96 = arith.constant 16 : i32
      %233 = arith.addi %c16_i32_96, %arg17 : i32
      %234 = arith.index_cast %233 : i32 to index
      %c0_97 = arith.constant 0 : index
      %c0_98 = arith.constant 0 : index
      %235 = vector.load %arg10[%234, %c0_97, %c0_98] : memref<24x1x4xf32, #tpu.memory_space<vmem>>, vector<1x1x4xf32>
      %236 = vector.shape_cast %235 : vector<1x1x4xf32> to vector<1x4xf32>
      %237 = vector.broadcast %236 : vector<1x4xf32> to vector<8x4xf32>
      %238 = arith.addf %232, %237 : vector<8x4xf32>
      %239 = arith.truncf %216 : vector<8x4xf32> to vector<8x4xbf16>
      %240 = arith.truncf %227 : vector<8x4xf32> to vector<8x4xbf16>
      %cst_99 = arith.constant dense<0.000000e+00> : vector<8x8xf32>
      %241 = tpu.matmul %239, %240, %cst_99 {dimension_numbers = #tpu.dot_dimension_numbers<[1], [1], [0], [0], [0, 0, 1, 0], [], []>} : vector<8x4xbf16>, vector<8x4xbf16>, vector<8x8xf32> -> vector<8x8xf32>
      %242 = arith.addf %241, %13 : vector<8x8xf32>
      %cst_100 = arith.constant dense<0xFF800000> : vector<8xf32>
      %243 = vector.multi_reduction <maximumf>, %242, %cst_100 [1] : vector<8x8xf32> to vector<8xf32>
      %244 = vector.shape_cast %243 : vector<8xf32> to vector<8x1xf32>
      %245 = vector.broadcast %244 : vector<8x1xf32> to vector<8x8xf32>
      %246 = arith.subf %242, %245 : vector<8x8xf32>
      %247 = math.exp %246 : vector<8x8xf32>
      %cst_101 = arith.constant dense<0.000000e+00> : vector<8xf32>
      %248 = vector.multi_reduction <add>, %247, %cst_101 [1] : vector<8x8xf32> to vector<8xf32>
      %249 = vector.shape_cast %248 : vector<8xf32> to vector<8x1xf32>
      %250 = tpu.reciprocal %249 {approx = true} : vector<8x1xf32> -> vector<8x1xf32>
      %251 = vector.broadcast %250 : vector<8x1xf32> to vector<8x8xf32>
      %252 = arith.mulf %247, %251 : vector<8x8xf32>
      %253 = arith.truncf %252 : vector<8x8xf32> to vector<8x8xbf16>
      %254 = arith.truncf %238 : vector<8x4xf32> to vector<8x4xbf16>
      %cst_102 = arith.constant dense<0.000000e+00> : vector<8x4xf32>
      %255 = tpu.matmul %253, %254, %cst_102 {dimension_numbers = #tpu.dot_dimension_numbers<[1], [0], [0], [1], [0, 0, 1, 1], [], []>} : vector<8x8xbf16>, vector<8x4xbf16>, vector<8x4xf32> -> vector<8x4xf32>
      %256 = arith.truncf %255 : vector<8x4xf32> to vector<8x4xbf16>
      %257 = arith.index_cast %arg17 : i32 to index
      %c0_103 = arith.constant 0 : index
      %c0_104 = arith.constant 0 : index
      %258 = vector.load %arg9[%257, %c0_103, %c0_104] : memref<8x4x32xbf16, #tpu.memory_space<vmem>>, vector<1x4x32xbf16>
      %259 = vector.shape_cast %258 : vector<1x4x32xbf16> to vector<4x32xbf16>
      %cst_105 = arith.constant dense<0.000000e+00> : vector<8x32xf32>
      %260 = tpu.matmul %256, %259, %cst_105 {dimension_numbers = #tpu.dot_dimension_numbers<[1], [0], [0], [1], [0, 0, 1, 1], [], []>} : vector<8x4xbf16>, vector<4x32xbf16>, vector<8x32xf32> -> vector<8x32xf32>
      %261 = arith.addf %arg18, %260 : vector<8x32xf32>
      scf.yield %261 : vector<8x32xf32>
    }
    %c8_i32_35 = arith.constant 8 : i32
    %86 = vector.broadcast %18 : vector<1x32xf32> to vector<8x32xf32>
    %87 = arith.addf %85, %86 : vector<8x32xf32>
    %88 = arith.addf %54, %87 : vector<8x32xf32>
    %cst_36 = arith.constant dense<0.000000e+00> : vector<8xf32>
    %89 = vector.multi_reduction <add>, %88, %cst_36 [1] : vector<8x32xf32> to vector<8xf32>
    %90 = vector.shape_cast %89 : vector<8xf32> to vector<8x1xf32>
    %cst_37 = arith.constant 3.200000e+01 : f32
    %91 = vector.broadcast %cst_37 : f32 to vector<8x1xf32>
    %92 = arith.divf %90, %91 : vector<8x1xf32>
    %93 = vector.broadcast %92 : vector<8x1xf32> to vector<8x32xf32>
    %94 = arith.subf %88, %93 : vector<8x32xf32>
    %95 = arith.mulf %94, %94 : vector<8x32xf32>
    %cst_38 = arith.constant dense<0.000000e+00> : vector<8xf32>
    %96 = vector.multi_reduction <add>, %95, %cst_38 [1] : vector<8x32xf32> to vector<8xf32>
    %97 = vector.shape_cast %96 : vector<8xf32> to vector<8x1xf32>
    %cst_39 = arith.constant 0.0322580636 : f32
    %98 = vector.broadcast %cst_39 : f32 to vector<8x1xf32>
    %99 = arith.mulf %97, %98 : vector<8x1xf32>
    %100 = math.sqrt %99 : vector<8x1xf32>
    %101 = vector.broadcast %22 : vector<1x32xf32> to vector<8x32xf32>
    %102 = arith.mulf %101, %94 : vector<8x32xf32>
    %cst_40 = arith.constant 9.99999997E-7 : f32
    %103 = vector.broadcast %cst_40 : f32 to vector<8x1xf32>
    %104 = arith.addf %100, %103 : vector<8x1xf32>
    %105 = vector.broadcast %104 : vector<8x1xf32> to vector<8x32xf32>
    %106 = arith.divf %102, %105 : vector<8x32xf32>
    %107 = vector.broadcast %23 : vector<1x32xf32> to vector<8x32xf32>
    %108 = arith.addf %106, %107 : vector<8x32xf32>
    %109 = arith.truncf %108 : vector<8x32xf32> to vector<8x32xbf16>
    %cst_41 = arith.constant 0.000000e+00 : f32
    %110 = vector.broadcast %cst_41 : f32 to vector<8x32xf32>
    %c0_i32_42 = arith.constant 0 : i32
    %c8_i32_43 = arith.constant 8 : i32
    %111 = arith.addi %c0_i32_42, %c8_i32_43 : i32
    %c1_i32_44 = arith.constant 1 : i32
    %112 = scf.for %arg17 = %c0_i32_42 to %111 step %c1_i32_44 iter_args(%arg18 = %110) -> (vector<8x32xf32>)  : i32 {
      %208 = arith.index_cast %arg17 : i32 to index
      %c0_81 = arith.constant 0 : index
      %c0_82 = arith.constant 0 : index
      %209 = vector.load %arg8[%208, %c0_81, %c0_82] : memref<24x32x4xbf16, #tpu.memory_space<vmem>>, vector<1x32x4xbf16>
      %210 = vector.shape_cast %209 : vector<1x32x4xbf16> to vector<32x4xbf16>
      %cst_83 = arith.constant dense<0.000000e+00> : vector<8x4xf32>
      %211 = tpu.matmul %82, %210, %cst_83 {dimension_numbers = #tpu.dot_dimension_numbers<[1], [0], [0], [1], [0, 0, 1, 1], [], []>} : vector<8x32xbf16>, vector<32x4xbf16>, vector<8x4xf32> -> vector<8x4xf32>
      %212 = arith.index_cast %arg17 : i32 to index
      %c0_84 = arith.constant 0 : index
      %c0_85 = arith.constant 0 : index
      %213 = vector.load %arg10[%212, %c0_84, %c0_85] : memref<24x1x4xf32, #tpu.memory_space<vmem>>, vector<1x1x4xf32>
      %214 = vector.shape_cast %213 : vector<1x1x4xf32> to vector<1x4xf32>
      %215 = vector.broadcast %214 : vector<1x4xf32> to vector<8x4xf32>
      %216 = arith.addf %211, %215 : vector<8x4xf32>
      %c8_i32_86 = arith.constant 8 : i32
      %217 = arith.addi %c8_i32_86, %arg17 : i32
      %218 = arith.index_cast %217 : i32 to index
      %c0_87 = arith.constant 0 : index
      %c0_88 = arith.constant 0 : index
      %219 = vector.load %arg8[%218, %c0_87, %c0_88] : memref<24x32x4xbf16, #tpu.memory_space<vmem>>, vector<1x32x4xbf16>
      %220 = vector.shape_cast %219 : vector<1x32x4xbf16> to vector<32x4xbf16>
      %cst_89 = arith.constant dense<0.000000e+00> : vector<8x4xf32>
      %221 = tpu.matmul %109, %220, %cst_89 {dimension_numbers = #tpu.dot_dimension_numbers<[1], [0], [0], [1], [0, 0, 1, 1], [], []>} : vector<8x32xbf16>, vector<32x4xbf16>, vector<8x4xf32> -> vector<8x4xf32>
      %c8_i32_90 = arith.constant 8 : i32
      %222 = arith.addi %c8_i32_90, %arg17 : i32
      %223 = arith.index_cast %222 : i32 to index
      %c0_91 = arith.constant 0 : index
      %c0_92 = arith.constant 0 : index
      %224 = vector.load %arg10[%223, %c0_91, %c0_92] : memref<24x1x4xf32, #tpu.memory_space<vmem>>, vector<1x1x4xf32>
      %225 = vector.shape_cast %224 : vector<1x1x4xf32> to vector<1x4xf32>
      %226 = vector.broadcast %225 : vector<1x4xf32> to vector<8x4xf32>
      %227 = arith.addf %221, %226 : vector<8x4xf32>
      %c16_i32 = arith.constant 16 : i32
      %228 = arith.addi %c16_i32, %arg17 : i32
      %229 = arith.index_cast %228 : i32 to index
      %c0_93 = arith.constant 0 : index
      %c0_94 = arith.constant 0 : index
      %230 = vector.load %arg8[%229, %c0_93, %c0_94] : memref<24x32x4xbf16, #tpu.memory_space<vmem>>, vector<1x32x4xbf16>
      %231 = vector.shape_cast %230 : vector<1x32x4xbf16> to vector<32x4xbf16>
      %cst_95 = arith.constant dense<0.000000e+00> : vector<8x4xf32>
      %232 = tpu.matmul %109, %231, %cst_95 {dimension_numbers = #tpu.dot_dimension_numbers<[1], [0], [0], [1], [0, 0, 1, 1], [], []>} : vector<8x32xbf16>, vector<32x4xbf16>, vector<8x4xf32> -> vector<8x4xf32>
      %c16_i32_96 = arith.constant 16 : i32
      %233 = arith.addi %c16_i32_96, %arg17 : i32
      %234 = arith.index_cast %233 : i32 to index
      %c0_97 = arith.constant 0 : index
      %c0_98 = arith.constant 0 : index
      %235 = vector.load %arg10[%234, %c0_97, %c0_98] : memref<24x1x4xf32, #tpu.memory_space<vmem>>, vector<1x1x4xf32>
      %236 = vector.shape_cast %235 : vector<1x1x4xf32> to vector<1x4xf32>
      %237 = vector.broadcast %236 : vector<1x4xf32> to vector<8x4xf32>
      %238 = arith.addf %232, %237 : vector<8x4xf32>
      %239 = arith.truncf %216 : vector<8x4xf32> to vector<8x4xbf16>
      %240 = arith.truncf %227 : vector<8x4xf32> to vector<8x4xbf16>
      %cst_99 = arith.constant dense<0.000000e+00> : vector<8x8xf32>
      %241 = tpu.matmul %239, %240, %cst_99 {dimension_numbers = #tpu.dot_dimension_numbers<[1], [1], [0], [0], [0, 0, 1, 0], [], []>} : vector<8x4xbf16>, vector<8x4xbf16>, vector<8x8xf32> -> vector<8x8xf32>
      %242 = arith.addf %241, %15 : vector<8x8xf32>
      %cst_100 = arith.constant dense<0xFF800000> : vector<8xf32>
      %243 = vector.multi_reduction <maximumf>, %242, %cst_100 [1] : vector<8x8xf32> to vector<8xf32>
      %244 = vector.shape_cast %243 : vector<8xf32> to vector<8x1xf32>
      %245 = vector.broadcast %244 : vector<8x1xf32> to vector<8x8xf32>
      %246 = arith.subf %242, %245 : vector<8x8xf32>
      %247 = math.exp %246 : vector<8x8xf32>
      %cst_101 = arith.constant dense<0.000000e+00> : vector<8xf32>
      %248 = vector.multi_reduction <add>, %247, %cst_101 [1] : vector<8x8xf32> to vector<8xf32>
      %249 = vector.shape_cast %248 : vector<8xf32> to vector<8x1xf32>
      %250 = tpu.reciprocal %249 {approx = true} : vector<8x1xf32> -> vector<8x1xf32>
      %251 = vector.broadcast %250 : vector<8x1xf32> to vector<8x8xf32>
      %252 = arith.mulf %247, %251 : vector<8x8xf32>
      %253 = arith.truncf %252 : vector<8x8xf32> to vector<8x8xbf16>
      %254 = arith.truncf %238 : vector<8x4xf32> to vector<8x4xbf16>
      %cst_102 = arith.constant dense<0.000000e+00> : vector<8x4xf32>
      %255 = tpu.matmul %253, %254, %cst_102 {dimension_numbers = #tpu.dot_dimension_numbers<[1], [0], [0], [1], [0, 0, 1, 1], [], []>} : vector<8x8xbf16>, vector<8x4xbf16>, vector<8x4xf32> -> vector<8x4xf32>
      %256 = arith.truncf %255 : vector<8x4xf32> to vector<8x4xbf16>
      %257 = arith.index_cast %arg17 : i32 to index
      %c0_103 = arith.constant 0 : index
      %c0_104 = arith.constant 0 : index
      %258 = vector.load %arg9[%257, %c0_103, %c0_104] : memref<8x4x32xbf16, #tpu.memory_space<vmem>>, vector<1x4x32xbf16>
      %259 = vector.shape_cast %258 : vector<1x4x32xbf16> to vector<4x32xbf16>
      %cst_105 = arith.constant dense<0.000000e+00> : vector<8x32xf32>
      %260 = tpu.matmul %256, %259, %cst_105 {dimension_numbers = #tpu.dot_dimension_numbers<[1], [0], [0], [1], [0, 0, 1, 1], [], []>} : vector<8x4xbf16>, vector<4x32xbf16>, vector<8x32xf32> -> vector<8x32xf32>
      %261 = arith.addf %arg18, %260 : vector<8x32xf32>
      scf.yield %261 : vector<8x32xf32>
    }
    %c8_i32_45 = arith.constant 8 : i32
    %113 = vector.broadcast %18 : vector<1x32xf32> to vector<8x32xf32>
    %114 = arith.addf %112, %113 : vector<8x32xf32>
    %115 = arith.addf %80, %114 : vector<8x32xf32>
    %cst_46 = arith.constant dense<0.000000e+00> : vector<8xf32>
    %116 = vector.multi_reduction <add>, %115, %cst_46 [1] : vector<8x32xf32> to vector<8xf32>
    %117 = vector.shape_cast %116 : vector<8xf32> to vector<8x1xf32>
    %cst_47 = arith.constant 3.200000e+01 : f32
    %118 = vector.broadcast %cst_47 : f32 to vector<8x1xf32>
    %119 = arith.divf %117, %118 : vector<8x1xf32>
    %120 = vector.broadcast %119 : vector<8x1xf32> to vector<8x32xf32>
    %121 = arith.subf %115, %120 : vector<8x32xf32>
    %122 = arith.mulf %121, %121 : vector<8x32xf32>
    %cst_48 = arith.constant dense<0.000000e+00> : vector<8xf32>
    %123 = vector.multi_reduction <add>, %122, %cst_48 [1] : vector<8x32xf32> to vector<8xf32>
    %124 = vector.shape_cast %123 : vector<8xf32> to vector<8x1xf32>
    %cst_49 = arith.constant 0.0322580636 : f32
    %125 = vector.broadcast %cst_49 : f32 to vector<8x1xf32>
    %126 = arith.mulf %124, %125 : vector<8x1xf32>
    %127 = math.sqrt %126 : vector<8x1xf32>
    %128 = vector.broadcast %22 : vector<1x32xf32> to vector<8x32xf32>
    %129 = arith.mulf %128, %121 : vector<8x32xf32>
    %cst_50 = arith.constant 9.99999997E-7 : f32
    %130 = vector.broadcast %cst_50 : f32 to vector<8x1xf32>
    %131 = arith.addf %127, %130 : vector<8x1xf32>
    %132 = vector.broadcast %131 : vector<8x1xf32> to vector<8x32xf32>
    %133 = arith.divf %129, %132 : vector<8x32xf32>
    %134 = vector.broadcast %23 : vector<1x32xf32> to vector<8x32xf32>
    %135 = arith.addf %133, %134 : vector<8x32xf32>
    %136 = arith.truncf %108 : vector<8x32xf32> to vector<8x32xbf16>
    %c0_51 = arith.constant 0 : index
    %c0_52 = arith.constant 0 : index
    %137 = vector.load %arg11[%c0_51, %c0_52] : memref<32x64xbf16, #tpu.memory_space<vmem>>, vector<32x64xbf16>
    %cst_53 = arith.constant dense<0.000000e+00> : vector<8x64xf32>
    %138 = tpu.matmul %136, %137, %cst_53 {dimension_numbers = #tpu.dot_dimension_numbers<[1], [0], [0], [1], [0, 0, 1, 1], [], []>} : vector<8x32xbf16>, vector<32x64xbf16>, vector<8x64xf32> -> vector<8x64xf32>
    %139 = vector.broadcast %26 : vector<1x64xf32> to vector<8x64xf32>
    %140 = arith.addf %138, %139 : vector<8x64xf32>
    %cst_54 = arith.constant 0.000000e+00 : f32
    %141 = vector.broadcast %cst_54 : f32 to vector<8x64xf32>
    %142 = arith.maximumf %140, %141 : vector<8x64xf32>
    %143 = arith.truncf %142 : vector<8x64xf32> to vector<8x64xbf16>
    %c0_55 = arith.constant 0 : index
    %c0_56 = arith.constant 0 : index
    %144 = vector.load %arg13[%c0_55, %c0_56] : memref<64x32xbf16, #tpu.memory_space<vmem>>, vector<64x32xbf16>
    %cst_57 = arith.constant dense<0.000000e+00> : vector<8x32xf32>
    %145 = tpu.matmul %143, %144, %cst_57 {dimension_numbers = #tpu.dot_dimension_numbers<[1], [0], [0], [1], [0, 0, 1, 1], [], []>} : vector<8x64xbf16>, vector<64x32xbf16>, vector<8x32xf32> -> vector<8x32xf32>
    %146 = vector.broadcast %19 : vector<1x32xf32> to vector<8x32xf32>
    %147 = arith.addf %145, %146 : vector<8x32xf32>
    %148 = arith.addf %108, %147 : vector<8x32xf32>
    %cst_58 = arith.constant dense<0.000000e+00> : vector<8xf32>
    %149 = vector.multi_reduction <add>, %148, %cst_58 [1] : vector<8x32xf32> to vector<8xf32>
    %150 = vector.shape_cast %149 : vector<8xf32> to vector<8x1xf32>
    %cst_59 = arith.constant 3.200000e+01 : f32
    %151 = vector.broadcast %cst_59 : f32 to vector<8x1xf32>
    %152 = arith.divf %150, %151 : vector<8x1xf32>
    %153 = vector.broadcast %152 : vector<8x1xf32> to vector<8x32xf32>
    %154 = arith.subf %148, %153 : vector<8x32xf32>
    %155 = arith.mulf %154, %154 : vector<8x32xf32>
    %cst_60 = arith.constant dense<0.000000e+00> : vector<8xf32>
    %156 = vector.multi_reduction <add>, %155, %cst_60 [1] : vector<8x32xf32> to vector<8xf32>
    %157 = vector.shape_cast %156 : vector<8xf32> to vector<8x1xf32>
    %cst_61 = arith.constant 0.0322580636 : f32
    %158 = vector.broadcast %cst_61 : f32 to vector<8x1xf32>
    %159 = arith.mulf %157, %158 : vector<8x1xf32>
    %160 = math.sqrt %159 : vector<8x1xf32>
    %161 = vector.broadcast %24 : vector<1x32xf32> to vector<8x32xf32>
    %162 = arith.mulf %161, %154 : vector<8x32xf32>
    %cst_62 = arith.constant 9.99999997E-7 : f32
    %163 = vector.broadcast %cst_62 : f32 to vector<8x1xf32>
    %164 = arith.addf %160, %163 : vector<8x1xf32>
    %165 = vector.broadcast %164 : vector<8x1xf32> to vector<8x32xf32>
    %166 = arith.divf %162, %165 : vector<8x32xf32>
    %167 = vector.broadcast %25 : vector<1x32xf32> to vector<8x32xf32>
    %168 = arith.addf %166, %167 : vector<8x32xf32>
    %169 = arith.truncf %135 : vector<8x32xf32> to vector<8x32xbf16>
    %c0_63 = arith.constant 0 : index
    %c0_64 = arith.constant 0 : index
    %170 = vector.load %arg11[%c0_63, %c0_64] : memref<32x64xbf16, #tpu.memory_space<vmem>>, vector<32x64xbf16>
    %cst_65 = arith.constant dense<0.000000e+00> : vector<8x64xf32>
    %171 = tpu.matmul %169, %170, %cst_65 {dimension_numbers = #tpu.dot_dimension_numbers<[1], [0], [0], [1], [0, 0, 1, 1], [], []>} : vector<8x32xbf16>, vector<32x64xbf16>, vector<8x64xf32> -> vector<8x64xf32>
    %172 = vector.broadcast %26 : vector<1x64xf32> to vector<8x64xf32>
    %173 = arith.addf %171, %172 : vector<8x64xf32>
    %cst_66 = arith.constant 0.000000e+00 : f32
    %174 = vector.broadcast %cst_66 : f32 to vector<8x64xf32>
    %175 = arith.maximumf %173, %174 : vector<8x64xf32>
    %176 = arith.truncf %175 : vector<8x64xf32> to vector<8x64xbf16>
    %c0_67 = arith.constant 0 : index
    %c0_68 = arith.constant 0 : index
    %177 = vector.load %arg13[%c0_67, %c0_68] : memref<64x32xbf16, #tpu.memory_space<vmem>>, vector<64x32xbf16>
    %cst_69 = arith.constant dense<0.000000e+00> : vector<8x32xf32>
    %178 = tpu.matmul %176, %177, %cst_69 {dimension_numbers = #tpu.dot_dimension_numbers<[1], [0], [0], [1], [0, 0, 1, 1], [], []>} : vector<8x64xbf16>, vector<64x32xbf16>, vector<8x32xf32> -> vector<8x32xf32>
    %179 = vector.broadcast %19 : vector<1x32xf32> to vector<8x32xf32>
    %180 = arith.addf %178, %179 : vector<8x32xf32>
    %181 = arith.addf %135, %180 : vector<8x32xf32>
    %cst_70 = arith.constant dense<0.000000e+00> : vector<8xf32>
    %182 = vector.multi_reduction <add>, %181, %cst_70 [1] : vector<8x32xf32> to vector<8xf32>
    %183 = vector.shape_cast %182 : vector<8xf32> to vector<8x1xf32>
    %cst_71 = arith.constant 3.200000e+01 : f32
    %184 = vector.broadcast %cst_71 : f32 to vector<8x1xf32>
    %185 = arith.divf %183, %184 : vector<8x1xf32>
    %186 = vector.broadcast %185 : vector<8x1xf32> to vector<8x32xf32>
    %187 = arith.subf %181, %186 : vector<8x32xf32>
    %188 = arith.mulf %187, %187 : vector<8x32xf32>
    %cst_72 = arith.constant dense<0.000000e+00> : vector<8xf32>
    %189 = vector.multi_reduction <add>, %188, %cst_72 [1] : vector<8x32xf32> to vector<8xf32>
    %190 = vector.shape_cast %189 : vector<8xf32> to vector<8x1xf32>
    %cst_73 = arith.constant 0.0322580636 : f32
    %191 = vector.broadcast %cst_73 : f32 to vector<8x1xf32>
    %192 = arith.mulf %190, %191 : vector<8x1xf32>
    %193 = math.sqrt %192 : vector<8x1xf32>
    %194 = vector.broadcast %24 : vector<1x32xf32> to vector<8x32xf32>
    %195 = arith.mulf %194, %187 : vector<8x32xf32>
    %cst_74 = arith.constant 9.99999997E-7 : f32
    %196 = vector.broadcast %cst_74 : f32 to vector<8x1xf32>
    %197 = arith.addf %193, %196 : vector<8x1xf32>
    %198 = vector.broadcast %197 : vector<8x1xf32> to vector<8x32xf32>
    %199 = arith.divf %195, %198 : vector<8x32xf32>
    %200 = vector.broadcast %25 : vector<1x32xf32> to vector<8x32xf32>
    %201 = arith.addf %199, %200 : vector<8x32xf32>
    %c0_75 = arith.constant 0 : index
    %c0_76 = arith.constant 0 : index
    %c0_77 = arith.constant 0 : index
    %202 = vector.load %arg15[%c0_75, %c0_76, %c0_77] : memref<1x8x32xf32, #tpu.memory_space<vmem>>, vector<1x8x32xf32>
    %203 = vector.shape_cast %202 : vector<1x8x32xf32> to vector<8x32xf32>
    %204 = vector.shape_cast %168 : vector<8x32xf32> to vector<1x8x32xf32>
    tpu.vector_store %arg15[%c0_75, %c0_76, %c0_77], %204 {strides = array<i32>} : memref<1x8x32xf32, #tpu.memory_space<vmem>>, vector<1x8x32xf32>,
    %c0_78 = arith.constant 0 : index
    %c0_79 = arith.constant 0 : index
    %c0_80 = arith.constant 0 : index
    %205 = vector.load %arg16[%c0_78, %c0_79, %c0_80] : memref<1x8x32xf32, #tpu.memory_space<vmem>>, vector<1x8x32xf32>
    %206 = vector.shape_cast %205 : vector<1x8x32xf32> to vector<8x32xf32>
    %207 = vector.shape_cast %201 : vector<8x32xf32> to vector<1x8x32xf32>
    tpu.vector_store %arg16[%c0_78, %c0_79, %c0_80], %207 {strides = array<i32>} : memref<1x8x32xf32, #tpu.memory_space<vmem>>, vector<1x8x32xf32>,
    return
  }
  func.func @transform_0(%arg0: i32) -> (i32, i32, i32) {
    %c0_i32 = arith.constant 0 : i32
    %c0_i32_0 = arith.constant 0 : i32
    %c0_i32_1 = arith.constant 0 : i32
    return %arg0, %c0_i32, %c0_i32_0 : i32, i32, i32
  }
  func.func @transform_1(%arg0: i32) -> (i32, i32, i32) {
    %c0_i32 = arith.constant 0 : i32
    %c0_i32_0 = arith.constant 0 : i32
    %c0_i32_1 = arith.constant 0 : i32
    return %arg0, %c0_i32, %c0_i32_0 : i32, i32, i32
  }
  func.func @transform_2(%arg0: i32) -> (i32, i32, i32) {
    %c0_i32 = arith.constant 0 : i32
    %c0_i32_0 = arith.constant 0 : i32
    %c0_i32_1 = arith.constant 0 : i32
    return %arg0, %c0_i32, %c0_i32_0 : i32, i32, i32
  }
  func.func @transform_3(%arg0: i32) -> (i32, i32, i32) {
    %c0_i32 = arith.constant 0 : i32
    %c0_i32_0 = arith.constant 0 : i32
    %c0_i32_1 = arith.constant 0 : i32
    return %arg0, %c0_i32, %c0_i32_0 : i32, i32, i32
  }
  func.func @transform_4(%arg0: i32) -> (i32, i32, i32) {
    %c0_i32 = arith.constant 0 : i32
    %c0_i32_0 = arith.constant 0 : i32
    %c0_i32_1 = arith.constant 0 : i32
    %c0_i32_2 = arith.constant 0 : i32
    return %c0_i32, %c0_i32_0, %c0_i32_1 : i32, i32, i32
  }
  func.func @transform_5(%arg0: i32) -> (i32, i32, i32) {
    %c0_i32 = arith.constant 0 : i32
    %c0_i32_0 = arith.constant 0 : i32
    %c0_i32_1 = arith.constant 0 : i32
    %c0_i32_2 = arith.constant 0 : i32
    return %c0_i32, %c0_i32_0, %c0_i32_1 : i32, i32, i32
  }
  func.func @transform_6(%arg0: i32) -> (i32, i32, i32) {
    %c0_i32 = arith.constant 0 : i32
    %c0_i32_0 = arith.constant 0 : i32
    %c0_i32_1 = arith.constant 0 : i32
    %c0_i32_2 = arith.constant 0 : i32
    return %c0_i32, %c0_i32_0, %c0_i32_1 : i32, i32, i32
  }
  func.func @transform_7(%arg0: i32) -> (i32, i32, i32) {
    %c0_i32 = arith.constant 0 : i32
    %c0_i32_0 = arith.constant 0 : i32
    %c0_i32_1 = arith.constant 0 : i32
    %c0_i32_2 = arith.constant 0 : i32
    return %c0_i32, %c0_i32_0, %c0_i32_1 : i32, i32, i32
  }
  func.func @transform_8(%arg0: i32) -> (i32, i32, i32) {
    %c0_i32 = arith.constant 0 : i32
    %c0_i32_0 = arith.constant 0 : i32
    %c0_i32_1 = arith.constant 0 : i32
    %c0_i32_2 = arith.constant 0 : i32
    return %c0_i32, %c0_i32_0, %c0_i32_1 : i32, i32, i32
  }
  func.func @transform_9(%arg0: i32) -> (i32, i32, i32) {
    %c0_i32 = arith.constant 0 : i32
    %c0_i32_0 = arith.constant 0 : i32
    %c0_i32_1 = arith.constant 0 : i32
    %c0_i32_2 = arith.constant 0 : i32
    return %c0_i32, %c0_i32_0, %c0_i32_1 : i32, i32, i32
  }
  func.func @transform_10(%arg0: i32) -> (i32, i32) {
    %c0_i32 = arith.constant 0 : i32
    %c0_i32_0 = arith.constant 0 : i32
    %c0_i32_1 = arith.constant 0 : i32
    return %c0_i32, %c0_i32_0 : i32, i32
  }
  func.func @transform_11(%arg0: i32) -> (i32, i32) {
    %c0_i32 = arith.constant 0 : i32
    %c0_i32_0 = arith.constant 0 : i32
    %c0_i32_1 = arith.constant 0 : i32
    return %c0_i32, %c0_i32_0 : i32, i32
  }
  func.func @transform_12(%arg0: i32) -> (i32, i32) {
    %c0_i32 = arith.constant 0 : i32
    %c0_i32_0 = arith.constant 0 : i32
    %c0_i32_1 = arith.constant 0 : i32
    return %c0_i32, %c0_i32_0 : i32, i32
  }
  func.func @transform_13(%arg0: i32) -> (i32, i32) {
    %c0_i32 = arith.constant 0 : i32
    %c0_i32_0 = arith.constant 0 : i32
    %c0_i32_1 = arith.constant 0 : i32
    return %c0_i32, %c0_i32_0 : i32, i32
  }
  func.func @transform_14(%arg0: i32) -> (i32, i32, i32) {
    %c0_i32 = arith.constant 0 : i32
    %c0_i32_0 = arith.constant 0 : i32
    %c0_i32_1 = arith.constant 0 : i32
    return %arg0, %c0_i32, %c0_i32_0 : i32, i32, i32
  }
  func.func @transform_15(%arg0: i32) -> (i32, i32, i32) {
    %c0_i32 = arith.constant 0 : i32
    %c0_i32_0 = arith.constant 0 : i32
    %c0_i32_1 = arith.constant 0 : i32
    return %arg0, %c0_i32, %c0_i32_0 : i32, i32, i32
  }
}

</mosaic_0001>

<bundles_post_ra>
// kernel: tpu_custom_call.1
= control target key start
LH: loop header
LB: loop body
LE: loop exit
PB: predicated region body
PF: predicated region fallthrough
CT: control target
= control target key end

     0   :  { %7 = vsyncpa [#allocation3], 0  ;;  %s633_s0 = inlined_call_operand.hbm [shape: f32[2,8,128], index: 0, kind: input, shape index: {}]   ;;  %s634_s1 = inlined_call_operand.hbm [shape: f32[1,8,128], index: 1, kind: input, shape index: {}]   ;;  %s635_s2 = inlined_call_operand.hbm [shape: f32[2,8,128], index: 2, kind: output, shape index: {}]  }
   0x1   :  { %9 = vsyncpa [#allocation3 + $0x1], 0 }
   0x2   :  { %10 = vsyncpa [#allocation6], 0 }
   0x3   :  { %11 = vsyncpa [#allocation4], 0 }
   0x4   :  { %13 = vsyncpa [#allocation4 + $0x1], 0  ;;  %s495_s9 = smov 0   ;;  %s497_s10 = smov 0  }
   0x5   :  { %s499_s11 = smov 0   ;;  %s501_s12 = smov 0  }
   0x6 LB: > { %s516_s13 = sadd.s32 4294967295, %s477_s12   ;;  %s276_s14 = sadd.s32 4294967294, %s477_s12   ;;  %s477_s12 = sphi %s501_s12, %s645_s12   ;;  %s473_s11 = sphi %s499_s11, %s644_s11   ;;  %s469_s10 = sphi %s497_s10, %s643_s10   ;;  %s465_s9 = sphi %s495_s9, %s642_s9  }
   0x7   : > { %p39_p0 = scmp.ne.s32.totalorder %s469_s10, %s465_s9  ;;  %p40_p1 = scmp.eq.s32.totalorder %s516_s13, 0 }
   0x8   : > { %p84_p2 = scmp.eq.s32.totalorder %s516_s13, 1  ;;  %p90_p3 = scmp.eq.s32.totalorder %s276_s14, 1 }
   0x9   : > { %p525_p4 = por %p40_p1, %p39_p0  ;;  %p277_p5 = scmp.ge.s32.totalorder %s477_s12, 1 }
   0xa   : > { %p530_p6 = por %p90_p3, %p39_p0  ;;  %p97_p7 = scmp.lt.s32.totalorder %s477_s12, 3 }
   0xb   : > { %s109_s19 = sshll.u32 %s634_s1, 4  ;;  %s479_s21 = smov [#allocation5]   ;;  %s110_s19 = int_to_ptr.hbm [resolvable:$true] %s109_s19 }
   0xc   : > { %p538_p8 = pnand %p277_p5, %p97_p7  ;;  %s111_s22 = sshll.u32 %s479_s21, 4  ;;  %s112_s22 = int_to_ptr.vmem [resolvable:$true] %s111_s22 }
   0xd   : > { %s548_s23 = sadd.s32 1, %s477_s12   ;;  %s26_s24 = sadd.s32 1, %s473_s11 }
   0xe   : > { %p298_p10 = pneg %p538_p8  ;;  %s23_s25 = ssub.s32 %s477_s12, %s548_s23 }
   0xf   : > { %p24_p12 = scmp.eq.s32.totalorder %s23_s25, 0  ;;  %p33_p13 = scmp.ne.s32.totalorder %s473_s11, %s469_s10 }
  0x10   : > { %p299_p11 = pnand %p298_p10, %p40_p1  ;;  %p34_p0 = scmp.eq.s32.totalorder %s477_s12, 0 }
  0x11   : > { %s557_s26 = scalar_select %p24_p12, %s473_s11, %s26_s24  }
  0x12   : > { %301 = dma.hbm_to_vmem [thread:$0]  (!%p299_p11), %s110_s19, 128, %s112_s22, [#allocation6]  }
  0x13   : > { %p561_p3 = por %p84_p2, %p33_p13  ;;  %p311_p5 = scmp.lt.s32.totalorder %s477_s12, 2 }
  0x14   : > { %s122_s28 = sand.u32 1, %s473_s11   ;;  %s281_s29 = sshll.u32 %s477_s12, 3 }
  0x15   : > { %p35_p7 = por %p34_p0, %p33_p13  ;;  %s280_s30 = sshll.u32 %s122_s28, 3 }
  0x16   : > { %s130_s5 = scalar_lea.hbm %s633_s0, %s281_s29  ;;  %s126_s7 = scalar_lea.vmem [#allocation2], %s280_s30 }
  0x17   : > { %s132_s6 = sshll.u32 %s130_s5, 4  ;;  %s134_s8 = sshll.u32 %s126_s7, 4  ;;  %s133_s6 = int_to_ptr.hbm [resolvable:$true] %s132_s6  ;;  %s135_s8 = int_to_ptr.vmem [resolvable:$true] %s134_s8 }
  0x18   : > { %p571_p10 = pnand %p311_p5, %p35_p7  ;;  %s123_s17 = scalar_lea.sflag [#allocation3], %s122_s28 }
  0x19   : > { %s377_s18 = sshra.s32 %s133_s6, 4  ;;  %s384_s24 = scalar_lea.hbm %s633_s0, 16  ;;  %s378_s18 = int_to_ptr.hbm [resolvable:$true] %s377_s18 }
  0x1a   : > { %s379_s19 = scalar_lea.hbm %s378_s18, 8  ;;  %p381_p11 = pneg %p571_p10 }
  0x1b   : > { %p380_p2 = scmp.ne.s32.totalorder %s378_s18, %s379_s19  ;;  %p385_p0 = scmp.lt.s32.totalorder %s378_s18, %s633_s0 }
  0x1c   : > { %p386_p5 = scmp.lt.s32.totalorder %s384_s24, %s379_s19 }
  0x1d   : > { %p382_p12 = pnand %p381_p11, %p380_p2 }
  0x1e   : > { %p387_p7 = por %p386_p5, %p385_p0 }
  0x1f   : > { %p383_p13 = pneg %p382_p12 }
  0x21   : > { %p388_p9 = pnand %p387_p7, %p383_p13 }
  0x23   : > { %391 = shalt.err (!%p388_p9)
}
  0x24   : > { %305 = dma.hbm_to_vmem [thread:$0]  (!%p571_p10), %s133_s6, 128, %s135_s8, %s123_s17  }
  0x25   : > { %143 = sbr.rel (%p538_p8) target bundleno = 60 (0x3c), region = 28  ;;  %s588_s28 = sand.u32 (!%p538_p8), 1, %s469_s10  }
  0x26   : > { %s283_s30 = sshll.u32 (!%p538_p8), %s588_s28, 3  ;;  %s146_s3 = scalar_lea.sflag (!%p538_p8), [#allocation3], %s588_s28 }
  0x27   : > { %s149_s4 = scalar_lea.vmem (!%p538_p8), [#allocation2], %s283_s30 }
  0x2a   : > { %452 = dma.done.wait (%p525_p4), %s146_s3, 128  }
  0x2b   : > { %454 = vsyncadd (%p525_p4), %s146_s3, 4294967168 }
  0x2c   : > { %456 = dma.done.wait (%p40_p1), [#allocation6], 128  }
  0x2d   : > { %458 = vsyncadd (%p40_p1), [#allocation6], 4294967168  ;;  %s287_s20 = sshll.u32 %s516_s13, 3  ;;  %s175_s8 = scalar_lea.vmem [#allocation7], %s283_s30  ;;  %v176_v0 = vld [vmem:[%s149_s4] sm:$0xff]  ;;  %v177_v1 = vld [vmem:[#allocation5] sm:$0xff] }
  0x2e   : > { %s191_s7 = scalar_lea.hbm %s635_s2, %s287_s20  ;;  %s193_s14 = sshll.u32 %s175_s8, 4  ;;  %v178_v2 = vadd.f32 %v177_v1, %v176_v0  ;;  %s194_s14 = int_to_ptr.vmem [resolvable:$true] %s193_s14 }
  0x2f   : > { %s195_s17 = sshll.u32 %s191_s7, 4  ;;  %s181_s15 = scalar_lea.sflag [#allocation4], %s588_s28  ;;  %s196_s17 = int_to_ptr.hbm [resolvable:$true] %s195_s17 }
  0x30   : > { %179 = vst [vmem:[%s175_s8] sm:$0xff] %v178_v2  ;;  %s421_s18 = sshra.s32 %s196_s17, 4  ;;  %s427_s22 = scalar_lea.hbm %s635_s2, 16  ;;  %s422_s18 = int_to_ptr.hbm [resolvable:$true] %s421_s18 }
  0x31   : > { %s423_s19 = scalar_lea.hbm %s422_s18, 8  ;;  %p428_p9 = scmp.lt.s32.totalorder %s422_s18, %s635_s2 }
  0x32   : > { %p424_p1 = scmp.ne.s32.totalorder %s422_s18, %s423_s19  ;;  %p429_p10 = scmp.lt.s32.totalorder %s427_s22, %s423_s19 }
  0x34   : > { %p425_p4 = pnand %p424_p1, %p561_p3  ;;  %p430_p2 = por %p429_p10, %p428_p9 }
  0x36   : > { %p426_p8 = pneg %p425_p4 }
  0x38   : > { %p431_p11 = pnand %p430_p2, %p426_p8 }
  0x3a   : > { %434 = shalt.err (!%p431_p11)
}
  0x3b   : > { %296 = dma.vmem_to_hbm [thread:$0]  (%p561_p3), %s194_s14, 128, %s196_s17, %s181_s15  }
  0x3c PF: > { %s207_s29 = sand.u32 1, %s465_s9   ;;  %p641_p12 = scmp.ge.s32.totalorder %s477_s12, 2 }
  0x3d   : > { %s208_s28 = scalar_lea.sflag [#allocation4], %s207_s29 }
  0x3e   : > { %p307_p13 = pnand %p641_p12, %p530_p6 }
  0x40   : > { %p308_p0 = pneg %p307_p13 }
  0x42   : > { %460 = dma.done.wait (%p308_p0), %s208_s28, 128  }
  0x43   : > { %462 = vsyncadd (%p308_p0), %s208_s28, 4294967168  ;;  %p16_p5 = scmp.ge.s32.totalorder %s548_s23, 4   ;;  %s642_s9 = smov %s469_s10 }
  0x44   : > { %s643_s10 = smov %s473_s11  ;;  %s644_s11 = smov %s557_s26 }
  0x45   : > { %s645_s12 = smov %s548_s23  ;;  %18 = sbr.rel (!%p16_p5) target bundleno = 6 (0x6), region = 77 }
  0x4a   :  { %214 = vsyncpa [#allocation3], 1 }
  0x4b   :  { %216 = vsyncpa [#allocation3 + $0x1], 1 }
  0x4c   :  { %217 = vsyncpa [#allocation6], 1 }
  0x4d   :  { %218 = vsyncpa [#allocation4], 1 }
  0x4e   :  { %220 = vsyncpa [#allocation4 + $0x1], 1 }

// kernel: bimca_ed_forward.2
= control target key start
LH: loop header
LB: loop body
LE: loop exit
PB: predicated region body
PF: predicated region fallthrough
CT: control target
= control target key end

     0   :  { %s2519_s18 = smov 0   ;;  %s2893_s0 = inlined_call_operand.vmem [shape: f32[2,8,32], index: 0, kind: input, shape index: {}]   ;;  %s2894_s1 = inlined_call_operand.vmem [shape: f32[2,8,32], index: 1, kind: input, shape index: {}]   ;;  %s2895_s2 = inlined_call_operand.vmem [shape: f32[2,1,8], index: 2, kind: input, shape index: {}]   ;;  %s2896_s3 = inlined_call_operand.vmem [shape: f32[2,1,8], index: 3, kind: input, shape index: {}]   ;;  %s2897_s4 = inlined_call_operand.vmem [shape: bf16[24,32,4], index: 4, kind: input, shape index: {}]   ;;  %s2898_s5 = inlined_call_operand.vmem [shape: bf16[8,4,32], index: 5, kind: input, shape index: {}]   ;;  %s2899_s6 = inlined_call_operand.vmem [shape: f32[24,1,4], index: 6, kind: input, shape index: {}]   ;;  %s2900_s7 = inlined_call_operand.vmem [shape: bf16[24,32,4], index: 7, kind: input, shape index: {}]   ;;  %s2901_s8 = inlined_call_operand.vmem [shape: bf16[8,4,32], index: 8, kind: input, shape index: {}]   ;;  %s2902_s9 = inlined_call_operand.vmem [shape: f32[24,1,4], index: 9, kind: input, shape index: {}]   ;;  %s2903_s10 = inlined_call_operand.vmem [shape: bf16[32,64], index: 10, kind: input, shape index: {}]   ;;  %s2904_s11 = inlined_call_operand.vmem [shape: f32[1,64], index: 11, kind: input, shape index: {}]   ;;  %s2905_s12 = inlined_call_operand.vmem [shape: bf16[64,32], index: 12, kind: input, shape index: {}]   ;;  %s2906_s13 = inlined_call_operand.vmem [shape: f32[9,32], index: 13, kind: input, shape index: {}]   ;;  %s2907_s14 = inlined_call_operand.vmem [shape: f32[2,8,32], index: 14, kind: output, shape index: {0}]   ;;  %s2908_s15 = inlined_call_operand.vmem [shape: f32[2,8,32], index: 15, kind: output, shape index: {1}]  }
   0x1   :  { %2909 = sst [smem:[#allocation2_spill]] %s2893_s0 }
   0x2   :  { %2910 = sst [smem:[#allocation3_spill]] %s2904_s11 }
   0x3 LB: > { %s1984_s19 = sadd.s32 4294967295, %s2404_s18   ;;  %p1988_p0 = scmp.ge.s32.totalorder %s2404_s18, 1  ;;  %s2404_s18 = sphi %s2519_s18, %s26_s18  }
   0x4   : > { %p464_p1 = scmp.lt.s32.totalorder %s2404_s18, 3 }
   0x6   : > { %p465_p2 = pnand %p1988_p0, %p464_p1 }
   0x7   : > { %p524_p3 = scmp.lt.s32.totalorder (!%p465_p2), %s1984_s19, 1  ;;  %s2911_s11 = sld [smem:[#allocation3_spill]] (!%p465_p2) }
   0x8   : > { %468 = sbr.rel (%p465_p2) target bundleno = 4923 (0x133b), region = 76  ;;  %s2912_s0 = sld [smem:[#allocation2_spill]] (!%p465_p2) }
   0xd   : > { %v2530_v0 = vld [vmem:[%s2906_s13] sm:$0xff]  ;;  %v2535_v1 = vld [vmem:[%s2906_s13 + $0x8] sm:$0x1]  ;;  %s2918_s19 = smov (!%p524_p3, %s1984_s19), 1  ;;  %v2582_v9 = vmov 0.0  }
   0xe   : > { %v2540_v2 = vld [vmem:[%s2911_s11] sm:$0x1]  ;;  %s2542_s26 = sshll.u32 %s2918_s19, 3  ;;  %s534_s29 = scalar_lea.vmem %s2895_s2, %s2918_s19 }
   0xf   : > { %s527_s17 = scalar_lea.vmem %s2912_s0, %s2542_s26  ;;  %s531_s22 = scalar_lea.vmem %s2894_s1, %s2542_s26  ;;  %v2555_v3 = vld [vmem:[%s534_s29] ss:$0 sm:$0xff] }
  0x10   : > { %s537_s25 = scalar_lea.vmem %s2896_s3, %s2918_s19  ;;  %s541_s11 = scalar_lea.vmem %s2907_s14, %s2542_s26  ;;  %v2564_v4 = vld [vmem:[%s527_s17] sm:$0xff] }
  0x11   : > { %v2566_v5 = vld [vmem:[%s531_s22] sm:$0xff]  ;;  %s545_s0 = scalar_lea.vmem %s2908_s15, %s2542_s26  ;;  %v2576_v7 = vpack.c.bf16 %v2564_v4, %v2564_v4  ;;  %s2584_s19 = smov 0  }
  0x12   : > { %v2572_v6 = vld [vmem:[%s537_s25] ss:$0 sm:$0xff]  ;;  %v2580_v8 = vpack.c.bf16 %v2566_v5, %v2566_v5 }
  0x13 LB: >> { %s2203_s29 = sshll.u32 %s2412_s19, 4  ;;  %s2597_s21 = scalar_lea.vmem %s2899_s6, %s2412_s19  ;;  %vm593_vm0 = vcmask 261120   ;;  %vm688_vm1 = vcmask 31744   ;;  %vm708_vm2 = vcmask 64512   ;;  %vm725_vm3 = vcmask 1043456   ;;  %s2412_s19 = sphi %s2584_s19, %s567_s19   ;;  %v2408_v9 = vphi %v2582_v9, %v2913_v9  }
  0x14   : >> { %s571_s24 = scalar_lea.vmem %s2897_s4, %s2203_s29  ;;  %v2313_v14 = vld [vmem:[%s2597_s21 + $0x8] ss:$0 sm:$0xff]  ;;  %v2312_v17 = vld [vmem:[%s2597_s21] ss:$0 sm:$0xff]  ;;  %v2314_v31 = vld [vmem:[%s2597_s21 + $0x10] ss:$0 sm:$0xff] }
  0x15   : >> { %v2205_v10 = vld [vmem:[%s571_s24 + $0x8] sm:$0xff]  ;;  %v2204_v12 = vld [vmem:[%s571_s24] sm:$0xff]  ;;  %s2036_s25 = sshll.u32 %s2412_s19, 1  ;;  %vm749_vm4 = vcmask 1041408   ;;  %s567_s19 = sadd.s32 1, %s2412_s19  }
  0x16   : >> { %v2207_v11 = vld [vmem:[%s571_s24 + $0x88] sm:$0xff]  ;;  %603 = vmatpush.bf16.msra.mxu0 %v2205_v10  ;;  %v2206_v13 = vld [vmem:[%s571_s24 + $0x80] sm:$0xff]  ;;  %s744_s30 = scalar_lea.vmem %s2898_s5, %s2036_s25  ;;  %p564_p4 = scmp.ge.s32.totalorder %s567_s19, 8  }
  0x17   : >> { %641 = vmatpush.bf16.msra.mxu1 %v2207_v11  ;;  %v2209_v25 = vld [vmem:[%s571_s24 + $0x108] sm:$0xff]  ;;  %v2208_v26 = vld [vmem:[%s571_s24 + $0x100] sm:$0xff]  ;;  %v767_v54 = vperm.slane (%p564_p4), %v2530_v0, 0  ;;  %v2438_v58 = vmov (%p564_p4), 32.0   ;;  %s2649_s16 = smov (%p564_p4), 0  }
  0x18   : >> { %679 = vmatpush.bf16.msra.mxu2 %v2209_v25  ;;  %v745_v42 = vld [vmem:[%s744_s30] sm:$0x3] }
  0x19   : >> { %v751_v43 = vsel %vm749_vm4, %v745_v42, 0 }
  0x1a   : >> { %604 = vmatpush.bf16.msra.mxu0 %v2204_v12 }
  0x1b   : >> { %642 = vmatpush.bf16.msra.mxu1 %v2206_v13 }
  0x1c   : >> { %680 = vmatpush.bf16.msra.mxu2 %v2208_v26 }
  0x1d   : >> { %2003 = vmatmul.msk.bf16.vlgmr.msra.gmra.mxu0 %vm593_vm0, %v2576_v7 }
  0x1e   : >> { %2018 = vmatmul.msk.bf16.vlgmr.msra.gmra.mxu1 %vm593_vm0, %v2576_v7 }
  0x1f   : >> { %2033 = vmatmul.msk.bf16.vlgmr.msra.gmra.mxu2 %vm593_vm0, %v2576_v7  ;;  %760 = vmatpush.bf16.msrb.mxu1 %v751_v43 }
  0x9a   : >> { %v606_v15 = vpop.f32.mrf.mxu0 }
  0x9b   : >> { %v644_v16 = vpop.f32.mrf.mxu1  ;;  %v607_v20 = vadd.f32 %v2312_v17, %v606_v15 }
  0x9c   : >> { %v645_v18 = vadd.f32 %v2313_v14, %v644_v16 }
  0x9d   : >> { %v686_v24 = vpack.c.bf16 %v607_v20, %v607_v20 }
  0x9e   : >> { %v687_v19 = vpack.c.bf16 %v645_v18, %v645_v18 }
  0xa0   : >> { %v693_v21 = vsel %vm688_vm1, %v687_v19, 0 }
  0xa1   : >> { %702 = vmatpush.bf16.xpose.msra.mxu3 %v693_v21 }
  0xa2   : >> { %v608_v22 = vpop.f32.mrf.mxu0  ;;  %v682_v32 = vpop.f32.mrf.mxu2 }
  0xa3   : >> { %v646_v23 = vpop.f32.mrf.mxu1  ;;  %v683_v33 = vadd.f32 %v2314_v31, %v682_v32 }
  0xa5   : >> { %v721_v35 = vpack.c.bf16 %v683_v33, %v683_v33 }
  0xa7   : >> { %v727_v37 = vsel %vm725_vm3, %v721_v35, 0 }
  0xa8   : >> { %2034 = vmatmul.msk.bf16.vlgmr.msra.gmra.mxu3 %vm688_vm1, %v686_v24  ;;  %736 = vmatpush.bf16.msrb.mxu0 %v727_v37 }
  0xaa   : >> { %v684_v39 = vpop.f32.mrf.mxu2 }
 0x12b   : >> { %v704_v27 = vpop.f32.mrf.mxu3 }
 0x12c   : >> { %v705_v28 = vadd.f32 %v2555_v3, %v704_v27 }
 0x12e   : >> { %v709_v29 = vsel %vm708_vm2, %v705_v28, -inf }
 0x12f   : >> { %710 = vmax.xlane.f32.xlu0 %v709_v29 }
 0x133   : >> { %v706_v30 = vpop.f32.mrf.mxu3 }
 0x134   : > { %v800_v30 = vperm.slane (%p564_p4), %v2530_v0, 3 }
 0x1a2   : >> { %v711_v34 = vpop.xlane.xlu0 %710 }
 0x1a3   : >> { %v712_v36 = vsub.f32 %v705_v28, %v711_v34 }
 0x1a5   : >> { %v713_v38 = vmul.f32 1.442695, %v712_v36  ;;  %v818_v36 = vperm.slane (%p564_p4), %v2530_v0, 4 }
 0x1a7   : >> { %2315 = vpow2.f32 %v713_v38 }
 0x1ad   : >> { %v2316_v40 = vpop.eup %2315 }
 0x1ae   : >> { %v715_v41 = vsel %vm708_vm2, %v2316_v40, 0.0 }
 0x1af   : >> { %716 = vadd.xlane.f32.xlu0 %v715_v41  ;;  %v2647_v41 = vmov (%p564_p4), 0.0  }
 0x222   : >> { %v717_v44 = vpop.xlane.xlu0 %716 }
 0x223   : >> { %2317 = vrcp.f32 %v717_v44 }
 0x224   : > { %2319 = vrcp.f32 (%p564_p4), %v2438_v58 }
 0x229   : >> { %v2318_v45 = vpop.eup %2317 }
 0x22a   : >> { %v719_v46 = vmul.f32 %v2318_v45, %v2316_v40  ;;  %v2320_v59 = vpop.eup (%p564_p4), %2319 }
 0x22b   : > { %v775_v60 = vmul.f32 (%p564_p4), 32.0, %v2320_v59  ;;  %vm779_vm5 = vweird.f32 (%p564_p4), %v2320_v59 }
 0x22c   : >> { %v720_v47 = vpack.c.bf16 %v719_v46, %v719_v46 }
 0x22d   : > { %v776_v61 = vsub.f32 (%p564_p4), 1.0, %v775_v60 }
 0x22e   : >> { %2035 = vmatmul.msk.bf16.vlgmr.msrb.gmra.mxu0 %vm708_vm2, %v720_v47 }
 0x22f   : > { %v777_v62 = vmul.f32 (%p564_p4), %v2320_v59, %v776_v61 }
 0x231   : > { %v778_v63 = vadd.f32 (%p564_p4), %v2320_v59, %v777_v62 }
 0x2ab   : >> { %v738_v48 = vpop.f32.mrf.mxu0 }
 0x2ac   : >> { %v742_v49 = vpack.c.bf16 %v738_v48, %v738_v48 }
 0x2ae   : >> { %2037 = vmatmul.msk.bf16.vlgmr.msrb.gmra.mxu1 %vm688_vm1, %v742_v49 }
 0x2b3   : >> { %v740_v50 = vpop.f32.mrf.mxu0 }
 0x32b   : >> { %v762_v51 = vpop.f32.mrf.mxu1 }
 0x32c   : >> { %v766_v52 = vadd.f32 %v2408_v9, %v762_v51  }
 0x32e   : >> { %v2913_v9 = vmov %v766_v52  ;;  %v768_v55 = vadd.f32 (%p564_p4), %v767_v54, %v766_v52 }
 0x32f   : > { %566 = sbr.rel (!%p564_p4) target bundleno = 19 (0x13), region = 183  ;;  %v2635_v9 = vsel (%p564_p4), %vm779_vm5, %v2320_v59, %v778_v63 }
 0x330   : > { %v769_v56 = vadd.f32 (%p564_p4), %v768_v55, %v2564_v4 }
 0x332   : > { %v771_v57 = vsel (%p564_p4), %vm593_vm0, %v769_v56, 0.0 }
 0x333   : >> { %v764_v53 = vpop.f32.mrf.mxu1  ;;  %772 = vadd.xlane.f32.xlu0 (%p564_p4), %v771_v57 }
 0x3a6   : > { %v773_v7 = vpop.xlane.xlu0 %772 }
 0x3a7   : > { %v781_v10 = vmul.f32 %v2635_v9, %v773_v7 }
 0x3a9   : > { %v782_v11 = vsub.f32 %v769_v56, %v781_v10 }
 0x3ab   : > { %v783_v12 = vmul.f32 %v782_v11, %v782_v11  ;;  %v801_v35 = vmul.f32 %v800_v30, %v782_v11 }
 0x3ad   : > { %v784_v4 = vsel %vm593_vm0, %v783_v12, 0.0 }
 0x3ae   : > { %785 = vadd.xlane.f32.xlu0 %v784_v4 }
 0x421   : > { %v786_v13 = vpop.xlane.xlu0 %785 }
 0x422   : > { %v787_v14 = vmul.f32 0.032258064, %v786_v13 }
 0x424   : > { %2321 = vrsqrt.f32 %v787_v14  ;;  %vm795_vm6 = vcmp.eq.f32.partialorder %v787_v14, inf  ;;  %v798_v22 = vand.u32 2147483648, %v787_v14  ;;  %vm797_vm7 = vcmp.eq.f32.partialorder %v787_v14, 0.0 }
 0x42a   : > { %v2322_v15 = vpop.eup %2321 }
 0x42b   : > { %v789_v16 = vmul.f32 %v2322_v15, %v787_v14 }
 0x42d   : > { %v790_v17 = vmul.f32 %v2322_v15, %v789_v16 }
 0x42f   : > { %v791_v18 = vmul.f32 0.5, %v790_v17 }
 0x431   : > { %v792_v19 = vsub.f32 1.5, %v791_v18 }
 0x433   : > { %v793_v20 = vmul.f32 %v2322_v15, %v792_v19 }
 0x435   : > { %v794_v21 = vmul.f32 %v793_v20, %v787_v14 }
 0x437   : > { %v796_v23 = vsel %vm795_vm6, %v787_v14, %v794_v21 }
 0x438   : > { %v799_v24 = vsel %vm797_vm7, %v798_v22, %v796_v23 }
 0x439   : > { %v802_v25 = vadd.f32 1e-06, %v799_v24 }
 0x43b   : > { %2323 = vrcp.f32 %v802_v25  ;;  %v814_v29 = vand.u32 2147483648, %v802_v25  ;;  %v812_v32 = vand.u32 2147483647, %v802_v25  ;;  %vm808_vm9 = vweird.f32 %v802_v25 }
 0x43d   : > { %v815_v34 = vor.u32 1.1754944e-38, %v814_v29  ;;  %vm813_vm11 = vcmp.eq.f32.partialorder %v812_v32, 8.507059e+37 }
 0x441   : > { %v2324_v26 = vpop.eup %2323 }
 0x442   : > { %v804_v27 = vmul.f32 %v2324_v26, %v802_v25  ;;  %vm809_vm8 = vweird.f32 %v2324_v26 }
 0x443   : > { %vm810_vm10 = vmor %vm808_vm9, %vm809_vm8 }
 0x444   : > { %v805_v28 = vsub.f32 1.0, %v804_v27 }
 0x446   : > { %v806_v31 = vmul.f32 %v2324_v26, %v805_v28 }
 0x448   : > { %v807_v33 = vadd.f32 %v2324_v26, %v806_v31 }
 0x44a   : > { %v811_v37 = vsel %vm810_vm10, %v2324_v26, %v807_v33 }
 0x44b   : > { %v816_v38 = vsel %vm813_vm11, %v815_v34, %v811_v37 }
 0x44c   : > { %v817_v39 = vmul.f32 %v816_v38, %v801_v35 }
 0x44e   : > { %v2645_v40 = vadd.f32 %v818_v36, %v817_v39 }
 0x44f LB: >> { %s2210_s19 = sshll.u32 %s2420_s16, 4  ;;  %s2662_s20 = scalar_lea.vmem %s2899_s6, %s2420_s16  ;;  %s2420_s16 = sphi %s2649_s16, %s825_s16   ;;  %v2416_v41 = vphi %v2647_v41, %v2914_v41  }
 0x450   : >> { %s829_s23 = scalar_lea.vmem %s2897_s4, %s2210_s19  ;;  %v2326_v46 = vld [vmem:[%s2662_s20 + $0x8] ss:$0 sm:$0xff]  ;;  %v2325_v49 = vld [vmem:[%s2662_s20] ss:$0 sm:$0xff]  ;;  %v2327_v7 = vld [vmem:[%s2662_s20 + $0x10] ss:$0 sm:$0xff] }
 0x451   : >> { %v2212_v42 = vld [vmem:[%s829_s23 + $0x8] sm:$0xff]  ;;  %v2211_v44 = vld [vmem:[%s829_s23] sm:$0xff]  ;;  %s2081_s24 = sshll.u32 %s2420_s16, 1  ;;  %s825_s16 = sadd.s32 1, %s2420_s16  }
 0x452   : >> { %v2214_v43 = vld [vmem:[%s829_s23 + $0x88] sm:$0xff]  ;;  %860 = vmatpush.bf16.msra.mxu0 %v2212_v42  ;;  %v2213_v45 = vld [vmem:[%s829_s23 + $0x80] sm:$0xff]  ;;  %s1001_s28 = scalar_lea.vmem %s2898_s5, %s2081_s24  ;;  %p822_p5 = scmp.ge.s32.totalorder %s825_s16, 8  }
 0x453   : >> { %898 = vmatpush.bf16.msra.mxu1 %v2214_v43  ;;  %v2216_v58 = vld [vmem:[%s829_s23 + $0x108] sm:$0xff]  ;;  %v2215_v59 = vld [vmem:[%s829_s23 + $0x100] sm:$0xff]  ;;  %s2715_s30 = smov (%p822_p5), 0  }
 0x454   : >> { %936 = vmatpush.bf16.msra.mxu2 %v2216_v58  ;;  %v1002_v19 = vld [vmem:[%s1001_s28] sm:$0x3] }
 0x455   : >> { %v1008_v20 = vsel %vm749_vm4, %v1002_v19, 0 }
 0x456   : >> { %861 = vmatpush.bf16.msra.mxu0 %v2211_v44 }
 0x457   : >> { %899 = vmatpush.bf16.msra.mxu1 %v2213_v45 }
 0x458   : >> { %937 = vmatpush.bf16.msra.mxu2 %v2215_v59 }
 0x459   : >> { %2048 = vmatmul.msk.bf16.vlgmr.msra.gmra.mxu0 %vm593_vm0, %v2580_v8 }
 0x45a   : >> { %2063 = vmatmul.msk.bf16.vlgmr.msra.gmra.mxu1 %vm593_vm0, %v2580_v8 }
 0x45b   : >> { %2078 = vmatmul.msk.bf16.vlgmr.msra.gmra.mxu2 %vm593_vm0, %v2580_v8  ;;  %1017 = vmatpush.bf16.msrb.mxu1 %v1008_v20 }
 0x4d6   : >> { %v863_v47 = vpop.f32.mrf.mxu0 }
 0x4d7   : >> { %v901_v48 = vpop.f32.mrf.mxu1  ;;  %v864_v52 = vadd.f32 %v2325_v49, %v863_v47 }
 0x4d8   : >> { %v902_v50 = vadd.f32 %v2326_v46, %v901_v48 }
 0x4d9   : >> { %v943_v57 = vpack.c.bf16 %v864_v52, %v864_v52 }
 0x4da   : >> { %v944_v51 = vpack.c.bf16 %v902_v50, %v902_v50 }
 0x4dc   : >> { %v950_v53 = vsel %vm688_vm1, %v944_v51, 0 }
 0x4dd   : >> { %959 = vmatpush.bf16.xpose.msra.mxu3 %v950_v53 }
 0x4de   : >> { %v865_v55 = vpop.f32.mrf.mxu0  ;;  %v939_v10 = vpop.f32.mrf.mxu2 }
 0x4df   : >> { %v903_v56 = vpop.f32.mrf.mxu1  ;;  %v940_v11 = vadd.f32 %v2327_v7, %v939_v10 }
 0x4e1   : >> { %v978_v4 = vpack.c.bf16 %v940_v11, %v940_v11 }
 0x4e3   : >> { %v984_v14 = vsel %vm725_vm3, %v978_v4, 0  ;;  %v2713_v4 = vmov (%p822_p5), 0.0  }
 0x4e4   : >> { %2079 = vmatmul.msk.bf16.vlgmr.msra.gmra.mxu3 %vm688_vm1, %v943_v57  ;;  %993 = vmatpush.bf16.msrb.mxu0 %v984_v14 }
 0x4e6   : >> { %v941_v16 = vpop.f32.mrf.mxu2 }
 0x567   : >> { %v961_v60 = vpop.f32.mrf.mxu3 }
 0x568   : >> { %v962_v61 = vadd.f32 %v2572_v6, %v961_v60 }
 0x56a   : >> { %v966_v62 = vsel %vm708_vm2, %v962_v61, -inf }
 0x56b   : >> { %967 = vmax.xlane.f32.xlu0 %v966_v62 }
 0x56f   : >> { %v963_v63 = vpop.f32.mrf.mxu3 }
 0x5de   : >> { %v968_v12 = vpop.xlane.xlu0 %967 }
 0x5df   : >> { %v969_v13 = vsub.f32 %v962_v61, %v968_v12 }
 0x5e1   : >> { %v970_v15 = vmul.f32 1.442695, %v969_v13 }
 0x5e3   : >> { %2328 = vpow2.f32 %v970_v15 }
 0x5e9   : >> { %v2329_v17 = vpop.eup %2328 }
 0x5ea   : >> { %v972_v18 = vsel %vm708_vm2, %v2329_v17, 0.0 }
 0x5eb   : >> { %973 = vadd.xlane.f32.xlu0 %v972_v18 }
 0x65e   : >> { %v974_v21 = vpop.xlane.xlu0 %973 }
 0x65f   : >> { %2330 = vrcp.f32 %v974_v21 }
 0x665   : >> { %v2331_v22 = vpop.eup %2330 }
 0x666   : >> { %v976_v23 = vmul.f32 %v2331_v22, %v2329_v17 }
 0x668   : >> { %v977_v24 = vpack.c.bf16 %v976_v23, %v976_v23 }
 0x66a   : >> { %2080 = vmatmul.msk.bf16.vlgmr.msrb.gmra.mxu0 %vm708_vm2, %v977_v24 }
 0x6e7   : >> { %v995_v25 = vpop.f32.mrf.mxu0 }
 0x6e8   : >> { %v999_v26 = vpack.c.bf16 %v995_v25, %v995_v25 }
 0x6ea   : >> { %2082 = vmatmul.msk.bf16.vlgmr.msrb.gmra.mxu1 %vm688_vm1, %v999_v26 }
 0x6ef   : >> { %v997_v27 = vpop.f32.mrf.mxu0 }
 0x767   : >> { %v1019_v28 = vpop.f32.mrf.mxu1 }
 0x768   : >> { %v1023_v29 = vadd.f32 %v2416_v41, %v1019_v28  }
 0x76a   : >> { %v2914_v41 = vmov %v1023_v29  ;;  %v1024_v32 = vadd.f32 (%p822_p5), %v1023_v29, %v767_v54 }
 0x76b   : > { %824 = sbr.rel (!%p822_p5) target bundleno = 1103 (0x44f), region = 194 }
 0x76c   : > { %v1025_v33 = vadd.f32 (%p822_p5), %v1024_v32, %v2566_v5  ;;  %v1066_v5 = vpack.c.bf16 (%p822_p5), %v2645_v40, %v2645_v40 }
 0x76e   : > { %v1026_v34 = vsel (%p822_p5), %vm593_vm0, %v1025_v33, 0.0 }
 0x76f   : >> { %v1021_v31 = vpop.f32.mrf.mxu1  ;;  %1027 = vadd.xlane.f32.xlu0 (%p822_p5), %v1026_v34 }
 0x7e2   : > { %v1028_v35 = vpop.xlane.xlu0 %1027 }
 0x7e3   : > { %v1029_v37 = vmul.f32 %v1028_v35, %v2635_v9 }
 0x7e5   : > { %v1030_v38 = vsub.f32 %v1025_v33, %v1029_v37 }
 0x7e7   : > { %v1031_v39 = vmul.f32 %v1030_v38, %v1030_v38  ;;  %v1048_v62 = vmul.f32 %v1030_v38, %v800_v30 }
 0x7e9   : > { %v1032_v41 = vsel %vm593_vm0, %v1031_v39, 0.0 }
 0x7ea   : > { %1033 = vadd.xlane.f32.xlu0 %v1032_v41 }
 0x85d   : > { %v1034_v42 = vpop.xlane.xlu0 %1033 }
 0x85e   : > { %v1035_v43 = vmul.f32 0.032258064, %v1034_v42 }
 0x860   : > { %2332 = vrsqrt.f32 %v1035_v43  ;;  %vm1043_vm12 = vcmp.eq.f32.partialorder %v1035_v43, inf  ;;  %v1046_v49 = vand.u32 2147483648, %v1035_v43  ;;  %vm1045_vm13 = vcmp.eq.f32.partialorder %v1035_v43, 0.0 }
 0x866   : > { %v2333_v44 = vpop.eup %2332 }
 0x867   : > { %v1037_v8 = vmul.f32 %v2333_v44, %v1035_v43 }
 0x869   : > { %v1038_v45 = vmul.f32 %v2333_v44, %v1037_v8 }
 0x86b   : > { %v1039_v54 = vmul.f32 0.5, %v1038_v45 }
 0x86d   : > { %v1040_v46 = vsub.f32 1.5, %v1039_v54 }
 0x86f   : > { %v1041_v47 = vmul.f32 %v2333_v44, %v1040_v46 }
 0x871   : > { %v1042_v48 = vmul.f32 %v1041_v47, %v1035_v43 }
 0x873   : > { %v1044_v50 = vsel %vm1043_vm12, %v1035_v43, %v1042_v48 }
 0x874   : > { %v1047_v51 = vsel %vm1045_vm13, %v1046_v49, %v1044_v50 }
 0x875   : > { %v1049_v52 = vadd.f32 1e-06, %v1047_v51 }
 0x877   : > { %2334 = vrcp.f32 %v1049_v52  ;;  %v1061_v57 = vand.u32 2147483648, %v1049_v52  ;;  %v1059_v59 = vand.u32 2147483647, %v1049_v52  ;;  %vm1055_vm15 = vweird.f32 %v1049_v52 }
 0x879   : > { %v1062_v61 = vor.u32 1.1754944e-38, %v1061_v57  ;;  %vm1060_vm6 = vcmp.eq.f32.partialorder %v1059_v59, 8.507059e+37 }
 0x87d   : > { %v2335_v53 = vpop.eup %2334 }
 0x87e   : > { %v1051_v55 = vmul.f32 %v2335_v53, %v1049_v52  ;;  %vm1056_vm14 = vweird.f32 %v2335_v53 }
 0x87f   : > { %vm1057_vm5 = vmor %vm1055_vm15, %vm1056_vm14 }
 0x880   : > { %v1052_v56 = vsub.f32 1.0, %v1051_v55 }
 0x882   : > { %v1053_v58 = vmul.f32 %v2335_v53, %v1052_v56 }
 0x884   : > { %v1054_v60 = vadd.f32 %v2335_v53, %v1053_v58 }
 0x886   : > { %v1058_v63 = vsel %vm1057_vm5, %v2335_v53, %v1054_v60 }
 0x887   : > { %v1063_v7 = vsel %vm1060_vm6, %v1062_v61, %v1058_v63 }
 0x888   : > { %v1064_v10 = vmul.f32 %v1063_v7, %v1048_v62 }
 0x88a   : > { %v2707_v11 = vadd.f32 %v1064_v10, %v818_v36 }
 0x88c   : > { %v2711_v12 = vpack.c.bf16 %v2707_v11, %v2707_v11 }
 0x88d LB: >> { %s2217_s16 = sshll.u32 %s2428_s30, 4  ;;  %s2728_s17 = scalar_lea.vmem %s2902_s9, %s2428_s30  ;;  %s2428_s30 = sphi %s2715_s30, %s1073_s30   ;;  %v2424_v4 = vphi %v2713_v4, %v2915_v4  }
 0x88e   : >> { %s1077_s22 = scalar_lea.vmem %s2900_s7, %s2217_s16  ;;  %v2337_v15 = vld [vmem:[%s2728_s17 + $0x8] ss:$0 sm:$0xff]  ;;  %v2336_v18 = vld [vmem:[%s2728_s17] ss:$0 sm:$0xff]  ;;  %v2338_v33 = vld [vmem:[%s2728_s17 + $0x10] ss:$0 sm:$0xff] }
 0x88f   : >> { %v2219_v30 = vld [vmem:[%s1077_s22 + $0x8] sm:$0xff]  ;;  %v2218_v13 = vld [vmem:[%s1077_s22] sm:$0xff]  ;;  %s2126_s23 = sshll.u32 %s2428_s30, 1  ;;  %s1073_s30 = sadd.s32 1, %s2428_s30  }
 0x890   : >> { %v2221_v36 = vld [vmem:[%s1077_s22 + $0x88] sm:$0xff]  ;;  %1108 = vmatpush.bf16.msra.mxu0 %v2219_v30  ;;  %v2220_v14 = vld [vmem:[%s1077_s22 + $0x80] sm:$0xff]  ;;  %s1252_s27 = scalar_lea.vmem %s2901_s8, %s2126_s23  ;;  %p1070_p6 = scmp.ge.s32.totalorder %s1073_s30, 8  }
 0x891   : >> { %1149 = vmatpush.bf16.msra.mxu1 %v2221_v36  ;;  %v2223_v26 = vld [vmem:[%s1077_s22 + $0x108] sm:$0xff]  ;;  %v2222_v27 = vld [vmem:[%s1077_s22 + $0x100] sm:$0xff]  ;;  %v1275_v57 = vperm.slane (%p1070_p6), %v2530_v0, 1  ;;  %s2784_s28 = smov (%p1070_p6), 0  }
 0x892   : >> { %1187 = vmatpush.bf16.msra.mxu2 %v2223_v26  ;;  %v1253_v45 = vld [vmem:[%s1252_s27] sm:$0x3] }
 0x893   : >> { %v1259_v54 = vsel %vm749_vm4, %v1253_v45, 0 }
 0x894   : >> { %1109 = vmatpush.bf16.msra.mxu0 %v2218_v13 }
 0x895   : >> { %1150 = vmatpush.bf16.msra.mxu1 %v2220_v14 }
 0x896   : >> { %1188 = vmatpush.bf16.msra.mxu2 %v2222_v27 }
 0x897   : >> { %2093 = vmatmul.msk.bf16.vlgmr.msra.gmra.mxu0 %vm593_vm0, %v1066_v5 }
 0x898   : >> { %2108 = vmatmul.msk.bf16.vlgmr.msra.gmra.mxu1 %vm593_vm0, %v2711_v12 }
 0x899   : >> { %2123 = vmatmul.msk.bf16.vlgmr.msra.gmra.mxu2 %vm593_vm0, %v2711_v12  ;;  %1268 = vmatpush.bf16.msrb.mxu1 %v1259_v54 }
 0x914   : >> { %v1111_v16 = vpop.f32.mrf.mxu0 }
 0x915   : >> { %v1152_v17 = vpop.f32.mrf.mxu1  ;;  %v1112_v21 = vadd.f32 %v2336_v18, %v1111_v16 }
 0x916   : >> { %v1153_v19 = vadd.f32 %v2337_v15, %v1152_v17 }
 0x917   : >> { %v1194_v25 = vpack.c.bf16 %v1112_v21, %v1112_v21 }
 0x918   : >> { %v1195_v20 = vpack.c.bf16 %v1153_v19, %v1153_v19 }
 0x91a   : >> { %v1201_v22 = vsel %vm688_vm1, %v1195_v20, 0 }
 0x91b   : >> { %1210 = vmatpush.bf16.xpose.msra.mxu3 %v1201_v22 }
 0x91c   : >> { %v1113_v23 = vpop.f32.mrf.mxu0  ;;  %v1190_v34 = vpop.f32.mrf.mxu2 }
 0x91d   : >> { %v1154_v24 = vpop.f32.mrf.mxu1  ;;  %v1191_v35 = vadd.f32 %v2338_v33, %v1190_v34 }
 0x91e   : > { %v1300_v24 = vperm.slane (%p1070_p6), %v2530_v0, 5 }
 0x91f   : >> { %v1229_v38 = vpack.c.bf16 %v1191_v35, %v1191_v35 }
 0x921   : >> { %v1235_v41 = vsel %vm725_vm3, %v1229_v38, 0  ;;  %v2782_v38 = vmov (%p1070_p6), 0.0  }
 0x922   : >> { %2124 = vmatmul.msk.bf16.vlgmr.msra.gmra.mxu3 %vm688_vm1, %v1194_v25  ;;  %1244 = vmatpush.bf16.msrb.mxu0 %v1235_v41 }
 0x924   : >> { %v1192_v43 = vpop.f32.mrf.mxu2 }
 0x9a5   : >> { %v1212_v28 = vpop.f32.mrf.mxu3 }
 0x9a6   : >> { %v1213_v29 = vadd.f32 %v2572_v6, %v1212_v28 }
 0x9a8   : >> { %v1217_v31 = vsel %vm708_vm2, %v1213_v29, -inf }
 0x9a9   : >> { %1218 = vmax.xlane.f32.xlu0 %v1217_v31  ;;  %v1318_v31 = vperm.slane (%p1070_p6), %v2530_v0, 6 }
 0x9ad   : >> { %v1214_v32 = vpop.f32.mrf.mxu3 }
 0xa1c   : >> { %v1219_v37 = vpop.xlane.xlu0 %1218 }
 0xa1d   : >> { %v1220_v39 = vsub.f32 %v1213_v29, %v1219_v37 }
 0xa1f   : >> { %v1221_v42 = vmul.f32 1.442695, %v1220_v39 }
 0xa21   : >> { %2339 = vpow2.f32 %v1221_v42 }
 0xa27   : >> { %v2340_v44 = vpop.eup %2339 }
 0xa28   : >> { %v1223_v8 = vsel %vm708_vm2, %v2340_v44, 0.0 }
 0xa29   : >> { %1224 = vadd.xlane.f32.xlu0 %v1223_v8 }
 0xa9c   : >> { %v1225_v46 = vpop.xlane.xlu0 %1224 }
 0xa9d   : >> { %2341 = vrcp.f32 %v1225_v46 }
 0xaa3   : >> { %v2342_v47 = vpop.eup %2341 }
 0xaa4   : >> { %v1227_v48 = vmul.f32 %v2342_v47, %v2340_v44 }
 0xaa6   : >> { %v1228_v49 = vpack.c.bf16 %v1227_v48, %v1227_v48 }
 0xaa8   : >> { %2125 = vmatmul.msk.bf16.vlgmr.msrb.gmra.mxu0 %vm708_vm2, %v1228_v49 }
 0xb25   : >> { %v1246_v50 = vpop.f32.mrf.mxu0 }
 0xb26   : >> { %v1250_v51 = vpack.c.bf16 %v1246_v50, %v1246_v50 }
 0xb28   : >> { %2127 = vmatmul.msk.bf16.vlgmr.msrb.gmra.mxu1 %vm688_vm1, %v1250_v51 }
 0xb2d   : >> { %v1248_v52 = vpop.f32.mrf.mxu0 }
 0xba5   : >> { %v1270_v53 = vpop.f32.mrf.mxu1 }
 0xba6   : >> { %v1274_v55 = vadd.f32 %v2424_v4, %v1270_v53  }
 0xba8   : >> { %v2915_v4 = vmov %v1274_v55  ;;  %v1276_v58 = vadd.f32 (%p1070_p6), %v1275_v57, %v1274_v55 }
 0xba9   : > { %1072 = sbr.rel (!%p1070_p6) target bundleno = 2189 (0x88d), region = 205 }
 0xbaa   : > { %v1277_v59 = vadd.f32 (%p1070_p6), %v1276_v58, %v2645_v40 }
 0xbac   : > { %v1278_v60 = vsel (%p1070_p6), %vm593_vm0, %v1277_v59, 0.0 }
 0xbad   : >> { %v1272_v56 = vpop.f32.mrf.mxu1  ;;  %1279 = vadd.xlane.f32.xlu0 (%p1070_p6), %v1278_v60 }
 0xc20   : > { %v1280_v61 = vpop.xlane.xlu0 %1279 }
 0xc21   : > { %v1281_v62 = vmul.f32 %v1280_v61, %v2635_v9 }
 0xc23   : > { %v1282_v63 = vsub.f32 %v1277_v59, %v1281_v62 }
 0xc25   : > { %v1283_v7 = vmul.f32 %v1282_v63, %v1282_v63  ;;  %v1301_v29 = vmul.f32 %v1300_v24, %v1282_v63 }
 0xc27   : > { %v1284_v10 = vsel %vm593_vm0, %v1283_v7, 0.0 }
 0xc28   : > { %1285 = vadd.xlane.f32.xlu0 %v1284_v10 }
 0xc9b   : > { %v1286_v4 = vpop.xlane.xlu0 %1285 }
 0xc9c   : > { %v1287_v30 = vmul.f32 0.032258064, %v1286_v4 }
 0xc9e   : > { %2343 = vrsqrt.f32 %v1287_v30  ;;  %vm1295_vm7 = vcmp.eq.f32.partialorder %v1287_v30, inf  ;;  %v1298_v16 = vand.u32 2147483648, %v1287_v30  ;;  %vm1297_vm8 = vcmp.eq.f32.partialorder %v1287_v30, 0.0 }
 0xca4   : > { %v2344_v6 = vpop.eup %2343 }
 0xca5   : > { %v1289_v5 = vmul.f32 %v2344_v6, %v1287_v30 }
 0xca7   : > { %v1290_v36 = vmul.f32 %v2344_v6, %v1289_v5 }
 0xca9   : > { %v1291_v13 = vmul.f32 0.5, %v1290_v36 }
 0xcab   : > { %v1292_v14 = vsub.f32 1.5, %v1291_v13 }
 0xcad   : > { %v1293_v40 = vmul.f32 %v2344_v6, %v1292_v14 }
 0xcaf   : > { %v1294_v15 = vmul.f32 %v1293_v40, %v1287_v30 }
 0xcb1   : > { %v1296_v17 = vsel %vm1295_vm7, %v1287_v30, %v1294_v15 }
 0xcb2   : > { %v1299_v18 = vsel %vm1297_vm8, %v1298_v16, %v1296_v17 }
 0xcb3   : > { %v1302_v19 = vadd.f32 1e-06, %v1299_v18 }
 0xcb5   : > { %2345 = vrcp.f32 %v1302_v19  ;;  %v1314_v23 = vand.u32 2147483648, %v1302_v19  ;;  %v1312_v26 = vand.u32 2147483647, %v1302_v19  ;;  %vm1308_vm10 = vweird.f32 %v1302_v19 }
 0xcb7   : > { %v1315_v28 = vor.u32 1.1754944e-38, %v1314_v23  ;;  %vm1313_vm12 = vcmp.eq.f32.partialorder %v1312_v26, 8.507059e+37 }
 0xcbb   : > { %v2346_v20 = vpop.eup %2345 }
 0xcbc   : > { %v1304_v21 = vmul.f32 %v2346_v20, %v1302_v19  ;;  %vm1309_vm9 = vweird.f32 %v2346_v20 }
 0xcbd   : > { %vm1310_vm11 = vmor %vm1308_vm10, %vm1309_vm9 }
 0xcbe   : > { %v1305_v22 = vsub.f32 1.0, %v1304_v21 }
 0xcc0   : > { %v1306_v25 = vmul.f32 %v2346_v20, %v1305_v22 }
 0xcc2   : > { %v1307_v27 = vadd.f32 %v2346_v20, %v1306_v25 }
 0xcc4   : > { %v1311_v32 = vsel %vm1310_vm11, %v2346_v20, %v1307_v27 }
 0xcc5   : > { %v1316_v33 = vsel %vm1313_vm12, %v1315_v28, %v1311_v32 }
 0xcc6   : > { %v1317_v34 = vmul.f32 %v1316_v33, %v1301_v29 }
 0xcc8   : > { %v2776_v35 = vadd.f32 %v1318_v31, %v1317_v34 }
 0xcca   : > { %v2780_v37 = vpack.c.bf16 %v2776_v35, %v2776_v35 }
 0xccb LB: >> { %s2224_s30 = sshll.u32 %s2436_s28, 4  ;;  %s2797_s29 = scalar_lea.vmem %s2902_s9, %s2436_s28  ;;  %s2436_s28 = sphi %s2784_s28, %s1326_s28   ;;  %v2432_v38 = vphi %v2782_v38, %v2916_v38  }
 0xccc   : >> { %s1330_s21 = scalar_lea.vmem %s2900_s7, %s2224_s30  ;;  %v2348_v44 = vld [vmem:[%s2797_s29 + $0x8] ss:$0 sm:$0xff]  ;;  %v2347_v54 = vld [vmem:[%s2797_s29] ss:$0 sm:$0xff]  ;;  %v2349_v61 = vld [vmem:[%s2797_s29 + $0x10] ss:$0 sm:$0xff] }
 0xccd   : >> { %v2226_v39 = vld [vmem:[%s1330_s21 + $0x8] sm:$0xff]  ;;  %v2225_v42 = vld [vmem:[%s1330_s21] sm:$0xff]  ;;  %s2171_s22 = sshll.u32 %s2436_s28, 1  ;;  %s1326_s28 = sadd.s32 1, %s2436_s28  }
 0xcce   : >> { %v2228_v41 = vld [vmem:[%s1330_s21 + $0x88] sm:$0xff]  ;;  %1361 = vmatpush.bf16.msra.mxu0 %v2226_v39  ;;  %v2227_v43 = vld [vmem:[%s1330_s21 + $0x80] sm:$0xff]  ;;  %s1505_s25 = scalar_lea.vmem %s2901_s8, %s2171_s22  ;;  %p1323_p7 = scmp.ge.s32.totalorder %s1326_s28, 8  }
 0xccf   : >> { %1402 = vmatpush.bf16.msra.mxu1 %v2228_v41  ;;  %v2230_v53 = vld [vmem:[%s1330_s21 + $0x108] sm:$0xff]  ;;  %v2229_v55 = vld [vmem:[%s1330_s21 + $0x100] sm:$0xff]  ;;  %v1575_v41 = vperm.slane (%p1323_p7), %v2540_v2, 0  ;;  %v1615_v2 = vperm.slane (%p1323_p7), %v2530_v0, 2 }
 0xcd0   : >> { %1440 = vmatpush.bf16.msra.mxu2 %v2230_v53  ;;  %v1506_v14 = vld [vmem:[%s1505_s25] sm:$0x3]  ;;  %v2232_v27 = vld [vmem:[%s2903_s10 + $0x8] sm:$0xff] (%p1323_p7) }
 0xcd1   : >> { %v1512_v40 = vsel %vm749_vm4, %v1506_v14, 0  ;;  %v2231_v29 = vld [vmem:[%s2903_s10] sm:$0xff] (%p1323_p7) }
 0xcd2   : >> { %1362 = vmatpush.bf16.msra.mxu0 %v2225_v42 }
 0xcd3   : >> { %1403 = vmatpush.bf16.msra.mxu1 %v2227_v43 }
 0xcd4   : >> { %1441 = vmatpush.bf16.msra.mxu2 %v2229_v55 }
 0xcd5   : >> { %2138 = vmatmul.msk.bf16.vlgmr.msra.gmra.mxu0 %vm593_vm0, %v2711_v12  ;;  %v2234_v12 = vld [vmem:[%s2905_s12 + $0x8] sm:$0xff] (%p1323_p7) }
 0xcd6   : >> { %2153 = vmatmul.msk.bf16.vlgmr.msra.gmra.mxu1 %vm593_vm0, %v2780_v37 }
 0xcd7   : >> { %2168 = vmatmul.msk.bf16.vlgmr.msra.gmra.mxu2 %vm593_vm0, %v2780_v37  ;;  %1521 = vmatpush.bf16.msrb.mxu1 %v1512_v40 }
 0xcd8   : > { %1710 = vmatpush.bf16.msra.mxu2 (%p1323_p7), %v2232_v27 }
 0xcdc   : > { %1711 = vmatpush.bf16.msra.mxu2 (%p1323_p7), %v2231_v29 }
 0xd52   : >> { %v1364_v8 = vpop.f32.mrf.mxu0 }
 0xd53   : >> { %v1405_v45 = vpop.f32.mrf.mxu1  ;;  %v1365_v48 = vadd.f32 %v2347_v54, %v1364_v8 }
 0xd54   : >> { %v1406_v46 = vadd.f32 %v2348_v44, %v1405_v45 }
 0xd55   : >> { %v1447_v52 = vpack.c.bf16 %v1365_v48, %v1365_v48 }
 0xd56   : >> { %v1448_v47 = vpack.c.bf16 %v1406_v46, %v1406_v46 }
 0xd58   : >> { %v1454_v49 = vsel %vm688_vm1, %v1448_v47, 0 }
 0xd59   : >> { %1463 = vmatpush.bf16.xpose.msra.mxu3 %v1454_v49 }
 0xd5a   : >> { %v1366_v50 = vpop.f32.mrf.mxu0  ;;  %v1443_v62 = vpop.f32.mrf.mxu2 }
 0xd5b   : >> { %v1407_v51 = vpop.f32.mrf.mxu1  ;;  %v1444_v63 = vadd.f32 %v2349_v61, %v1443_v62 }
 0xd5d   : >> { %v1482_v10 = vpack.c.bf16 %v1444_v63, %v1444_v63 }
 0xd5f   : >> { %v1488_v30 = vsel %vm725_vm3, %v1482_v10, 0 }
 0xd60   : >> { %2169 = vmatmul.msk.bf16.vlgmr.msra.gmra.mxu3 %vm688_vm1, %v1447_v52  ;;  %1497 = vmatpush.bf16.msrb.mxu0 %v1488_v30 }
 0xd62   : >> { %v1445_v5 = vpop.f32.mrf.mxu2 }
 0xd64   : > { %1598 = vmatpush.bf16.msra.mxu0 (%p1323_p7), %v2232_v27 }
 0xd68   : > { %1599 = vmatpush.bf16.msra.mxu0 (%p1323_p7), %v2231_v29 }
 0xde3   : >> { %v1465_v56 = vpop.f32.mrf.mxu3 }
 0xde4   : >> { %v1466_v58 = vadd.f32 %v2555_v3, %v1465_v56  ;;  %v2236_v3 = vld [vmem:[%s2905_s12 + $0x18] sm:$0xff] (%p1323_p7) }
 0xde5   : > { %1648 = vmatpush.bf16.msra.mxu1 (%p1323_p7), %v2236_v3  ;;  %1726 = vmatpush.bf16.msra.mxu3 (%p1323_p7), %v2236_v3 }
 0xde6   : >> { %v1470_v59 = vsel %vm708_vm2, %v1466_v58, -inf }
 0xde7   : >> { %1471 = vmax.xlane.f32.xlu0 %v1470_v59 }
 0xdeb   : >> { %v1467_v60 = vpop.f32.mrf.mxu3 }
 0xe5a   : >> { %v1472_v7 = vpop.xlane.xlu0 %1471 }
 0xe5b   : >> { %v1473_v4 = vsub.f32 %v1466_v58, %v1472_v7 }
 0xe5d   : >> { %v1474_v6 = vmul.f32 1.442695, %v1473_v4 }
 0xe5f   : >> { %2350 = vpow2.f32 %v1474_v6 }
 0xe65   : >> { %v2351_v36 = vpop.eup %2350 }
 0xe66   : >> { %v1476_v13 = vsel %vm708_vm2, %v2351_v36, 0.0 }
 0xe67   : >> { %1477 = vadd.xlane.f32.xlu0 %v1476_v13 }
 0xeda   : >> { %v1478_v15 = vpop.xlane.xlu0 %1477 }
 0xedb   : >> { %2352 = vrcp.f32 %v1478_v15 }
 0xee1   : >> { %v2353_v16 = vpop.eup %2352 }
 0xee2   : >> { %v1480_v17 = vmul.f32 %v2353_v16, %v2351_v36 }
 0xee4   : >> { %v1481_v18 = vpack.c.bf16 %v1480_v17, %v1480_v17 }
 0xee6   : >> { %2170 = vmatmul.msk.bf16.vlgmr.msrb.gmra.mxu0 %vm708_vm2, %v1481_v18 }
 0xef6   : > { %2181 = vmatmul.msk.bf16.vlgmr.msra.gmra.mxu0 (%p1323_p7), %vm593_vm0, %v2780_v37 }
 0xf63   : >> { %v1499_v19 = vpop.f32.mrf.mxu0 }
 0xf64   : >> { %v1503_v20 = vpack.c.bf16 %v1499_v19, %v1499_v19 }
 0xf66   : >> { %2172 = vmatmul.msk.bf16.vlgmr.msrb.gmra.mxu1 %vm688_vm1, %v1503_v20  ;;  %vm1640_vm1 = vcmask (%p1323_p7), 523264  }
 0xf6b   : >> { %v1501_v21 = vpop.f32.mrf.mxu0 }
 0xf73   : > { %v1601_v42 = vpop.f32.mrf.mxu0 (%p1323_p7) }
 0xf74   : > { %v1602_v43 = vadd.f32 (%p1323_p7), %v1601_v42, %v1575_v41 }
 0xf76   : > { %v1605_v44 = vmax.f32 (%p1323_p7), %v1602_v43, 0.0 }
 0xf78   : > { %v1606_v8 = vpack.c.bf16 (%p1323_p7), %v1605_v44, %v1605_v44  ;;  %v1680_v44 = vperm.slane (%p1323_p7), %v2530_v0, 7 }
 0xf7b   : > { %v1603_v45 = vpop.f32.mrf.mxu0 (%p1323_p7) }
 0xfe3   : >> { %v1523_v22 = vpop.f32.mrf.mxu1 }
 0xfe4   : >> { %v1527_v23 = vadd.f32 %v2432_v38, %v1523_v22  }
 0xfe6   : >> { %v2916_v38 = vmov %v1527_v23  ;;  %v1528_v26 = vadd.f32 (%p1323_p7), %v1527_v23, %v1275_v57  ;;  %v2233_v57 = vld [vmem:[%s2905_s12] sm:$0xff] (%p1323_p7) }
 0xfe7   : > { %1325 = sbr.rel (!%p1323_p7) target bundleno = 3275 (0xccb), region = 216 }
 0xfe8   : > { %v1529_v28 = vadd.f32 (%p1323_p7), %v1528_v26, %v2707_v11  ;;  %v2235_v11 = vld [vmem:[%s2905_s12 + $0x10] sm:$0xff] (%p1323_p7) }
 0xfe9   : > { %1649 = vmatpush.bf16.msra.mxu1 (%p1323_p7), %v2235_v11  ;;  %1727 = vmatpush.bf16.msra.mxu3 (%p1323_p7), %v2235_v11 }
 0xfea   : > { %v1530_v32 = vsel (%p1323_p7), %vm593_vm0, %v1529_v28, 0.0 }
 0xfeb   : >> { %v1525_v25 = vpop.f32.mrf.mxu1  ;;  %1531 = vadd.xlane.f32.xlu0 (%p1323_p7), %v1530_v32 }
 0xfed   : > { %1650 = vmatpush.bf16.msra.mxu1 %v2234_v12  ;;  %1728 = vmatpush.bf16.msra.mxu3 %v2234_v12 }
 0xff1   : > { %1651 = vmatpush.bf16.msra.mxu1 %v2233_v57  ;;  %1729 = vmatpush.bf16.msra.mxu3 %v2233_v57 }
 0xff4   : > { %2198 = vmatmul.msk.bf16.vlgmr.msra.gmra.mxu1 %vm1640_vm1, %v1606_v8 }
0x105e   : > { %v1532_v33 = vpop.xlane.xlu0 %1531 }
0x105f   : > { %v1533_v34 = vmul.f32 %v1532_v33, %v2635_v9 }
0x1061   : > { %v1534_v37 = vsub.f32 %v1529_v28, %v1533_v34 }
0x1063   : > { %v1535_v38 = vmul.f32 %v1534_v37, %v1534_v37  ;;  %v1552_v40 = vmul.f32 %v1534_v37, %v1300_v24 }
0x1065   : > { %v1536_v39 = vsel %vm593_vm0, %v1535_v38, 0.0 }
0x1066   : > { %1537 = vadd.xlane.f32.xlu0 %v1536_v39 }
0x1071   : > { %v1653_v58 = vpop.f32.mrf.mxu1 }
0x1072   : > { %v1654_v60 = vadd.f32 %v1653_v58, %v1615_v2 }
0x1074   : > { %v1657_v62 = vadd.f32 %v1654_v60, %v2776_v35 }
0x1076   : > { %v1658_v63 = vsel %vm593_vm0, %v1657_v62, 0.0 }
0x1077   : > { %1659 = vadd.xlane.f32.xlu1 %v1658_v63 }
0x1079   : > { %v1655_v7 = vpop.f32.mrf.mxu1 }
0x10d9   : > { %v1538_v54 = vpop.xlane.xlu0 %1537 }
0x10da   : > { %v1539_v46 = vmul.f32 0.032258064, %v1538_v54 }
0x10dc   : > { %2354 = vrsqrt.f32 %v1539_v46  ;;  %vm1547_vm2 = vcmp.eq.f32.partialorder %v1539_v46, inf  ;;  %v1550_v55 = vand.u32 2147483648, %v1539_v46  ;;  %vm1549_vm3 = vcmp.eq.f32.partialorder %v1539_v46, 0.0 }
0x10e2   : > { %v2355_v47 = vpop.eup %2354 }
0x10e3   : > { %v1541_v48 = vmul.f32 %v2355_v47, %v1539_v46 }
0x10e5   : > { %v1542_v49 = vmul.f32 %v2355_v47, %v1541_v48 }
0x10e7   : > { %v1543_v50 = vmul.f32 0.5, %v1542_v49 }
0x10e9   : > { %v1544_v51 = vsub.f32 1.5, %v1543_v50  ;;  %v1698_v50 = vperm.slane %v2535_v1, 0 }
0x10ea   : > { %v1660_v19 = vpop.xlane.xlu1 %1659 }
0x10eb   : > { %v1545_v52 = vmul.f32 %v2355_v47, %v1544_v51  ;;  %v1661_v20 = vmul.f32 %v1660_v19, %v2635_v9 }
0x10ed   : > { %v1546_v53 = vmul.f32 %v1545_v52, %v1539_v46  ;;  %v1662_v21 = vsub.f32 %v1657_v62, %v1661_v20 }
0x10ef   : > { %v1548_v56 = vsel %vm1547_vm2, %v1539_v46, %v1546_v53  ;;  %v1663_v22 = vmul.f32 %v1662_v21, %v1662_v21  ;;  %v1681_v48 = vmul.f32 %v1680_v44, %v1662_v21 }
0x10f0   : > { %v1551_v59 = vsel %vm1549_vm3, %v1550_v55, %v1548_v56 }
0x10f1   : > { %v1553_v61 = vadd.f32 1e-06, %v1551_v59  ;;  %v1664_v23 = vsel %vm593_vm0, %v1663_v22, 0.0 }
0x10f2   : > { %1665 = vadd.xlane.f32.xlu2 %v1664_v23 }
0x10f3   : > { %2356 = vrcp.f32 %v1553_v61  ;;  %v1565_v6 = vand.u32 2147483648, %v1553_v61  ;;  %v1563_v36 = vand.u32 2147483647, %v1553_v61  ;;  %vm1559_vm13 = vweird.f32 %v1553_v61 }
0x10f5   : > { %v1566_v14 = vor.u32 1.1754944e-38, %v1565_v6  ;;  %vm1564_vm15 = vcmp.eq.f32.partialorder %v1563_v36, 8.507059e+37 }
0x10f9   : > { %v2357_v10 = vpop.eup %2356 }
0x10fa   : > { %v1555_v4 = vmul.f32 %v2357_v10, %v1553_v61  ;;  %vm1560_vm4 = vweird.f32 %v2357_v10 }
0x10fb   : > { %vm1561_vm14 = vmor %vm1559_vm13, %vm1560_vm4 }
0x10fc   : > { %v1556_v30 = vsub.f32 1.0, %v1555_v4 }
0x10fe   : > { %v1557_v5 = vmul.f32 %v2357_v10, %v1556_v30 }
0x1100   : > { %v1558_v13 = vadd.f32 %v2357_v10, %v1557_v5 }
0x1102   : > { %v1562_v35 = vsel %vm1561_vm14, %v2357_v10, %v1558_v13 }
0x1103   : > { %v1567_v15 = vsel %vm1564_vm15, %v1566_v14, %v1562_v35 }
0x1104   : > { %v1568_v16 = vmul.f32 %v1567_v15, %v1552_v40 }
0x1106   : > { %v1569_v17 = vadd.f32 %v1568_v16, %v1318_v31 }
0x1108   : > { %v1700_v18 = vpack.c.bf16 %v1569_v17, %v1569_v17 }
0x110a   : > { %2199 = vmatmul.msk.bf16.vlgmr.msra.gmra.mxu2 %vm593_vm0, %v1700_v18 }
0x1165   : > { %v1666_v29 = vpop.xlane.xlu2 %1665 }
0x1166   : > { %v1667_v31 = vmul.f32 0.032258064, %v1666_v29 }
0x1168   : > { %2358 = vrsqrt.f32 %v1667_v31  ;;  %vm1675_vm5 = vcmp.eq.f32.partialorder %v1667_v31, inf  ;;  %v1678_v34 = vand.u32 2147483648, %v1667_v31  ;;  %vm1677_vm6 = vcmp.eq.f32.partialorder %v1667_v31, 0.0 }
0x116e   : > { %v2359_v32 = vpop.eup %2358 }
0x116f   : > { %v1669_v3 = vmul.f32 %v2359_v32, %v1667_v31 }
0x1171   : > { %v1670_v11 = vmul.f32 %v2359_v32, %v1669_v3 }
0x1173   : > { %v1671_v12 = vmul.f32 0.5, %v1670_v11 }
0x1175   : > { %v1672_v57 = vsub.f32 1.5, %v1671_v12 }
0x1177   : > { %v1673_v33 = vmul.f32 %v2359_v32, %v1672_v57 }
0x1179   : > { %v1674_v37 = vmul.f32 %v1673_v33, %v1667_v31 }
0x117b   : > { %v1676_v38 = vsel %vm1675_vm5, %v1667_v31, %v1674_v37 }
0x117c   : > { %v1679_v39 = vsel %vm1677_vm6, %v1678_v34, %v1676_v38 }
0x118d   : > { %v1713_v25 = vpop.f32.mrf.mxu2 }
0x118e   : > { %v1714_v24 = vadd.f32 %v1713_v25, %v1575_v41  ;;  %v1682_v41 = vadd.f32 1e-06, %v1679_v39 }
0x1190   : > { %v1717_v26 = vmax.f32 %v1714_v24, 0.0  ;;  %2360 = vrcp.f32 %v1682_v41  ;;  %v1694_v8 = vand.u32 2147483648, %v1682_v41  ;;  %vm1688_vm7 = vweird.f32 %v1682_v41 }
0x1191   : > { %v1692_v54 = vand.u32 2147483647, %v1682_v41 }
0x1192   : > { %v1718_v27 = vpack.c.bf16 %v1717_v26, %v1717_v26  ;;  %v1695_v47 = vor.u32 1.1754944e-38, %v1694_v8 }
0x1193   : > { %vm1693_vm10 = vcmp.eq.f32.partialorder %v1692_v54, 8.507059e+37 }
0x1194   : > { %2200 = vmatmul.msk.bf16.vlgmr.msra.gmra.mxu3 %vm1640_vm1, %v1718_v27 }
0x1195   : > { %v1715_v28 = vpop.f32.mrf.mxu2 }
0x1196   : > { %v2361_v42 = vpop.eup %2360 }
0x1197   : > { %v1684_v43 = vmul.f32 %v2361_v42, %v1682_v41  ;;  %vm1689_vm8 = vweird.f32 %v2361_v42 }
0x1198   : > { %vm1690_vm9 = vmor %vm1688_vm7, %vm1689_vm8 }
0x1199   : > { %v1685_v45 = vsub.f32 1.0, %v1684_v43 }
0x119b   : > { %v1686_v46 = vmul.f32 %v2361_v42, %v1685_v45 }
0x119d   : > { %v1687_v49 = vadd.f32 %v2361_v42, %v1686_v46 }
0x119f   : > { %v1691_v51 = vsel %vm1690_vm9, %v2361_v42, %v1687_v49 }
0x11a0   : > { %v1696_v52 = vsel %vm1693_vm10, %v1695_v47, %v1691_v51 }
0x11a1   : > { %v1697_v53 = vmul.f32 %v1696_v52, %v1681_v48 }
0x11a3   : > { %v1699_v55 = vadd.f32 %v1698_v50, %v1697_v53 }
0x11a5   : > { %1776 = vst.msk [vmem:[%s541_s11] sm:$0xff] %vm593_vm0, %v1699_v55 }
0x1217   : > { %v1731_v56 = vpop.f32.mrf.mxu3 }
0x1218   : > { %v1732_v58 = vadd.f32 %v1731_v56, %v1615_v2 }
0x121a   : > { %v1735_v59 = vadd.f32 %v1732_v58, %v1569_v17 }
0x121c   : > { %v1736_v60 = vsel %vm593_vm0, %v1735_v59, 0.0 }
0x121d   : > { %1737 = vadd.xlane.f32.xlu1 %v1736_v60 }
0x121f   : > { %v1733_v61 = vpop.f32.mrf.mxu3 }
0x1290   : > { %v1738_v1 = vpop.xlane.xlu1 %1737 }
0x1291   : > { %v1739_v62 = vmul.f32 %v1738_v1, %v2635_v9 }
0x1293   : > { %v1740_v63 = vsub.f32 %v1735_v59, %v1739_v62 }
0x1295   : > { %v1741_v7 = vmul.f32 %v1740_v63, %v1740_v63  ;;  %v1758_v25 = vmul.f32 %v1740_v63, %v1680_v44 }
0x1297   : > { %v1742_v10 = vsel %vm593_vm0, %v1741_v7, 0.0 }
0x1298   : > { %1743 = vadd.xlane.f32.xlu2 %v1742_v10 }
0x130b   : > { %v1744_v4 = vpop.xlane.xlu2 %1743 }
0x130c   : > { %v1745_v30 = vmul.f32 0.032258064, %v1744_v4 }
0x130e   : > { %2362 = vrsqrt.f32 %v1745_v30  ;;  %vm1753_vm11 = vcmp.eq.f32.partialorder %v1745_v30, inf  ;;  %v1756_v40 = vand.u32 2147483648, %v1745_v30  ;;  %vm1755_vm12 = vcmp.eq.f32.partialorder %v1745_v30, 0.0 }
0x1314   : > { %v2363_v6 = vpop.eup %2362 }
0x1315   : > { %v1747_v5 = vmul.f32 %v2363_v6, %v1745_v30 }
0x1317   : > { %v1748_v0 = vmul.f32 %v2363_v6, %v1747_v5 }
0x1319   : > { %v1749_v2 = vmul.f32 0.5, %v1748_v0 }
0x131b   : > { %v1750_v36 = vsub.f32 1.5, %v1749_v2 }
0x131d   : > { %v1751_v13 = vmul.f32 %v2363_v6, %v1750_v36 }
0x131f   : > { %v1752_v14 = vmul.f32 %v1751_v13, %v1745_v30 }
0x1321   : > { %v1754_v35 = vsel %vm1753_vm11, %v1745_v30, %v1752_v14 }
0x1322   : > { %v1757_v9 = vsel %vm1755_vm12, %v1756_v40, %v1754_v35 }
0x1323   : > { %v1759_v15 = vadd.f32 1e-06, %v1757_v9 }
0x1325   : > { %2364 = vrcp.f32 %v1759_v15  ;;  %v1771_v19 = vand.u32 2147483648, %v1759_v15  ;;  %v1769_v21 = vand.u32 2147483647, %v1759_v15  ;;  %vm1765_vm2 = vweird.f32 %v1759_v15 }
0x1327   : > { %v1772_v23 = vor.u32 1.1754944e-38, %v1771_v19  ;;  %vm1770_vm4 = vcmp.eq.f32.partialorder %v1769_v21, 8.507059e+37 }
0x132b   : > { %v2365_v16 = vpop.eup %2364 }
0x132c   : > { %v1761_v17 = vmul.f32 %v2365_v16, %v1759_v15  ;;  %vm1766_vm1 = vweird.f32 %v2365_v16 }
0x132d   : > { %vm1767_vm3 = vmor %vm1765_vm2, %vm1766_vm1 }
0x132e   : > { %v1762_v18 = vsub.f32 1.0, %v1761_v17 }
0x1330   : > { %v1763_v20 = vmul.f32 %v2365_v16, %v1762_v18 }
0x1332   : > { %v1764_v22 = vadd.f32 %v2365_v16, %v1763_v20 }
0x1334   : > { %v1768_v24 = vsel %vm1767_vm3, %v2365_v16, %v1764_v22 }
0x1335   : > { %v1773_v26 = vsel %vm1770_vm4, %v1772_v23, %v1768_v24 }
0x1336   : > { %v1774_v27 = vmul.f32 %v1773_v26, %v1758_v25 }
0x1338   : > { %v1775_v28 = vadd.f32 %v1774_v27, %v1698_v50 }
0x133a   : > { %1777 = vst.msk [vmem:[%s545_s0] sm:$0xff] %vm593_vm0, %v1775_v28 }
0x133b PF: > { %s26_s18 = sadd.s32 1, %s2404_s18  }
0x133c   : > { %p23_p8 = scmp.ge.s32.totalorder %s26_s18, 4  }
0x133e   :  { %25 = sbr.rel (!%p23_p8) target bundleno = 3 (0x3), region = 227 }

// kernel: bimca_ed_forward.3
= control target key start
LH: loop header
LB: loop body
LE: loop exit
PB: predicated region body
PF: predicated region fallthrough
CT: control target
= control target key end

     0   :  { %s3150_s0 = inlined_call_operand.vmem [shape: f32[2,8,32], index: 0, kind: input, shape index: {}]   ;;  %s3151_s1 = inlined_call_operand.vmem [shape: f32[2,8,32], index: 1, kind: input, shape index: {}]   ;;  %s3152_s2 = inlined_call_operand.vmem [shape: f32[2,1,8], index: 2, kind: input, shape index: {}]   ;;  %s3153_s3 = inlined_call_operand.vmem [shape: f32[2,1,8], index: 3, kind: input, shape index: {}]   ;;  %s3154_s4 = inlined_call_operand.vmem [shape: bf16[24,32,4], index: 4, kind: input, shape index: {}]   ;;  %s3155_s5 = inlined_call_operand.vmem [shape: bf16[8,4,32], index: 5, kind: input, shape index: {}]   ;;  %s3156_s6 = inlined_call_operand.vmem [shape: f32[24,1,4], index: 6, kind: input, shape index: {}]   ;;  %s3157_s7 = inlined_call_operand.vmem [shape: bf16[24,32,4], index: 7, kind: input, shape index: {}]   ;;  %s3158_s8 = inlined_call_operand.vmem [shape: bf16[8,4,32], index: 8, kind: input, shape index: {}]   ;;  %s3159_s9 = inlined_call_operand.vmem [shape: f32[24,1,4], index: 9, kind: input, shape index: {}]   ;;  %s3160_s10 = inlined_call_operand.vmem [shape: bf16[32,64], index: 10, kind: input, shape index: {}]   ;;  %s3161_s11 = inlined_call_operand.vmem [shape: f32[1,64], index: 11, kind: input, shape index: {}]   ;;  %s3162_s12 = inlined_call_operand.vmem [shape: bf16[64,32], index: 12, kind: input, shape index: {}]   ;;  %s3163_s13 = inlined_call_operand.vmem [shape: f32[9,32], index: 13, kind: input, shape index: {}]   ;;  %s3164_s14 = inlined_call_operand.hbm [shape: f32[2,8,32], index: 14, kind: output, shape index: {0}]   ;;  %s3165_s15 = inlined_call_operand.hbm [shape: f32[2,8,32], index: 15, kind: output, shape index: {1}]  }
   0x1   :  { %3175 = sst [smem:[#allocation15_spill]] %s3150_s0 }
   0x2   :  { %3176 = sst [smem:[#allocation16_spill]] %s3151_s1 }
   0x3   :  { %3177 = sst [smem:[#allocation17_spill]] %s3163_s13 }
   0x4   :  { %3178 = sst [smem:[#allocation18_spill]] %s3164_s14 }
   0x5   :  { %3179 = sst [smem:[#allocation19_spill]] %s3165_s15 }
   0x6   :  { %21 = vsyncpa [#allocation3], 0 }
   0x7   :  { %23 = vsyncpa [#allocation3 + $0x1], 0 }
   0x8   :  { %24 = vsyncpa [#allocation5], 0 }
   0x9   :  { %26 = vsyncpa [#allocation5 + $0x1], 0  ;;  %s2689_s18 = smov 0   ;;  %s2691_s19 = smov 0  }
   0xa   :  { %s2693_s20 = smov 0   ;;  %s2695_s21 = smov 0  }
   0xb LB: > { %3180 = sst [smem:[#allocation8_spill]] %s2562_s18  ;;  %s2710_s22 = sadd.s32 4294967295, %s2574_s21   ;;  %s2574_s21 = sphi %s2695_s21, %s3201_s21   ;;  %s2570_s20 = sphi %s2693_s20, %s3204_s20   ;;  %s2566_s19 = sphi %s2691_s19, %s3203_s19   ;;  %s2562_s18 = sphi %s2689_s18, %s3202_s18  }
   0xc   : > { %3181 = sst [smem:[#allocation9_spill]] %s2566_s19  ;;  %s2027_s23 = sadd.s32 4294967294, %s2574_s21  }
   0xd   : > { %3182 = sst [smem:[#allocation10_spill]] %s2570_s20  ;;  %s2714_s24 = sadd.s32 1, %s2574_s21  }
   0xe   : > { %3183 = sst [smem:[#allocation11_spill]] %s2574_s21  ;;  %s353_s25 = sadd.s32 1, %s2570_s20 }
   0xf   : > { %3184 = sst [smem:[#allocation12_spill]] %s2714_s24  ;;  %s350_s26 = ssub.s32 %s2574_s21, %s2714_s24 }
  0x10   : > { %p363_p0 = scmp.ne.s32.totalorder %s2570_s20, %s2566_s19  ;;  %p351_p1 = scmp.eq.s32.totalorder %s350_s26, 0 }
  0x11   : > { %p364_p2 = scmp.eq.s32.totalorder %s2710_s22, 1  ;;  %p369_p3 = scmp.ne.s32.totalorder %s2566_s19, %s2562_s18 }
  0x12   : > { %p370_p4 = scmp.eq.s32.totalorder %s2027_s23, 1  ;;  %p2030_p7 = scmp.ge.s32.totalorder %s2574_s21, 1 }
  0x13   : > { %s2725_s27 = scalar_select %p351_p1, %s2570_s20, %s353_s25  }
  0x14   : > { %p2727_p5 = por %p364_p2, %p363_p0  ;;  %p2731_p6 = por %p370_p4, %p369_p3 }
  0x15   : > { %3185 = sst [smem:[#allocation13_spill]] %s2725_s27  ;;  %p470_p8 = scmp.lt.s32.totalorder %s2574_s21, 3 }
  0x16   : > { %s3187_s29 = scalar_select %p2731_p6, 1, 0 }
  0x17   : > { %p471_p9 = pnand %p2030_p7, %p470_p8 }
  0x18   : > { %3188 = sst [smem:[#allocation14_spill]] %s3187_s29  ;;  %s2738_s30 = sand.u32 (!%p471_p9), 1, %s2566_s19  }
  0x19   : > { %474 = sbr.rel (%p471_p9) target bundleno = 4943 (0x134f), region = 76  ;;  %p532_p10 = scmp.lt.s32.totalorder (!%p471_p9), %s2710_s22, 1 }
  0x1a   : > { %s3189_s13 = sld [smem:[#allocation17_spill]] (!%p471_p9)  ;;  %s2031_s26 = sshll.u32 (!%p471_p9), %s2738_s30, 3 }
  0x1b   : > { %s3190_s0 = sld [smem:[#allocation15_spill]] (!%p471_p9)  ;;  %s2786_s14 = scalar_lea.vmem (!%p471_p9), [#allocation2], %s2031_s26 }
  0x1c   : > { %s3191_s1 = sld [smem:[#allocation16_spill]] (!%p471_p9)  ;;  %s2788_s18 = scalar_lea.vmem (!%p471_p9), [#allocation4], %s2031_s26 }
  0x1e   : > { %v2755_v2 = vld [vmem:[%s3161_s11] sm:$0x1]  ;;  %s533_s19 = scalar_select %p532_p10, %s2710_s22, 1  ;;  %v2790_v9 = vmov 0.0  }
  0x20   : > { %v2744_v0 = vld [vmem:[%s3189_s13] sm:$0xff]  ;;  %v2749_v1 = vld [vmem:[%s3189_s13 + $0x8] sm:$0x1]  ;;  %s2033_s24 = sshll.u32 %s533_s19, 3  ;;  %s542_s21 = scalar_lea.vmem %s3152_s2, %s533_s19 }
  0x21   : > { %s535_s15 = scalar_lea.vmem %s3190_s0, %s2033_s24  ;;  %v2767_v3 = vld [vmem:[%s542_s21] ss:$0 sm:$0xff]  ;;  %s545_s27 = scalar_lea.vmem %s3153_s3, %s533_s19 }
  0x22   : > { %s539_s25 = scalar_lea.vmem %s3191_s1, %s2033_s24  ;;  %v2772_v4 = vld [vmem:[%s535_s15] sm:$0xff]  ;;  %s2792_s13 = smov 0  }
  0x23   : > { %v2774_v5 = vld [vmem:[%s539_s25] sm:$0xff]  ;;  %v2780_v7 = vpack.c.bf16 %v2772_v4, %v2772_v4 }
  0x24   : > { %v2776_v6 = vld [vmem:[%s545_s27] ss:$0 sm:$0xff]  ;;  %v2784_v8 = vpack.c.bf16 %v2774_v5, %v2774_v5 }
  0x25 LB: >> { %s2249_s15 = sshll.u32 %s2582_s13, 4  ;;  %s2805_s24 = scalar_lea.vmem %s3156_s6, %s2582_s13  ;;  %vm593_vm0 = vcmask 261120   ;;  %vm688_vm1 = vcmask 31744   ;;  %vm708_vm2 = vcmask 64512   ;;  %vm725_vm3 = vcmask 1043456   ;;  %s2582_s13 = sphi %s2792_s13, %s567_s13   ;;  %v2578_v9 = vphi %v2790_v9, %v3192_v9  }
  0x26   : >> { %s571_s16 = scalar_lea.vmem %s3154_s4, %s2249_s15  ;;  %v2395_v14 = vld [vmem:[%s2805_s24 + $0x8] ss:$0 sm:$0xff]  ;;  %v2394_v17 = vld [vmem:[%s2805_s24] ss:$0 sm:$0xff]  ;;  %v2396_v31 = vld [vmem:[%s2805_s24 + $0x10] ss:$0 sm:$0xff] }
  0x27   : >> { %v2251_v10 = vld [vmem:[%s571_s16 + $0x8] sm:$0xff]  ;;  %v2250_v12 = vld [vmem:[%s571_s16] sm:$0xff]  ;;  %s2078_s17 = sshll.u32 %s2582_s13, 1  ;;  %vm749_vm4 = vcmask 1041408   ;;  %s567_s13 = sadd.s32 1, %s2582_s13  }
  0x28   : >> { %v2253_v11 = vld [vmem:[%s571_s16 + $0x88] sm:$0xff]  ;;  %603 = vmatpush.bf16.msra.mxu0 %v2251_v10  ;;  %v2252_v13 = vld [vmem:[%s571_s16 + $0x80] sm:$0xff]  ;;  %s744_s20 = scalar_lea.vmem %s3155_s5, %s2078_s17  ;;  %p564_p11 = scmp.ge.s32.totalorder %s567_s13, 8  }
  0x29   : >> { %641 = vmatpush.bf16.msra.mxu1 %v2253_v11  ;;  %v2255_v25 = vld [vmem:[%s571_s16 + $0x108] sm:$0xff]  ;;  %v2254_v26 = vld [vmem:[%s571_s16 + $0x100] sm:$0xff]  ;;  %v767_v54 = vperm.slane (%p564_p11), %v2744_v0, 0  ;;  %v2608_v58 = vmov (%p564_p11), 32.0   ;;  %s2857_s27 = smov (%p564_p11), 0  }
  0x2a   : >> { %679 = vmatpush.bf16.msra.mxu2 %v2255_v25  ;;  %v745_v42 = vld [vmem:[%s744_s20] sm:$0x3] }
  0x2b   : >> { %v751_v43 = vsel %vm749_vm4, %v745_v42, 0 }
  0x2c   : >> { %604 = vmatpush.bf16.msra.mxu0 %v2250_v12 }
  0x2d   : >> { %642 = vmatpush.bf16.msra.mxu1 %v2252_v13 }
  0x2e   : >> { %680 = vmatpush.bf16.msra.mxu2 %v2254_v26 }
  0x2f   : >> { %2045 = vmatmul.msk.bf16.vlgmr.msra.gmra.mxu0 %vm593_vm0, %v2780_v7 }
  0x30   : >> { %2060 = vmatmul.msk.bf16.vlgmr.msra.gmra.mxu1 %vm593_vm0, %v2780_v7 }
  0x31   : >> { %2075 = vmatmul.msk.bf16.vlgmr.msra.gmra.mxu2 %vm593_vm0, %v2780_v7  ;;  %760 = vmatpush.bf16.msrb.mxu1 %v751_v43 }
  0xac   : >> { %v606_v15 = vpop.f32.mrf.mxu0 }
  0xad   : >> { %v644_v16 = vpop.f32.mrf.mxu1  ;;  %v607_v20 = vadd.f32 %v2394_v17, %v606_v15 }
  0xae   : >> { %v645_v18 = vadd.f32 %v2395_v14, %v644_v16 }
  0xaf   : >> { %v686_v24 = vpack.c.bf16 %v607_v20, %v607_v20 }
  0xb0   : >> { %v687_v19 = vpack.c.bf16 %v645_v18, %v645_v18 }
  0xb2   : >> { %v693_v21 = vsel %vm688_vm1, %v687_v19, 0 }
  0xb3   : >> { %702 = vmatpush.bf16.xpose.msra.mxu3 %v693_v21 }
  0xb4   : >> { %v608_v22 = vpop.f32.mrf.mxu0  ;;  %v682_v32 = vpop.f32.mrf.mxu2 }
  0xb5   : >> { %v646_v23 = vpop.f32.mrf.mxu1  ;;  %v683_v33 = vadd.f32 %v2396_v31, %v682_v32 }
  0xb7   : >> { %v721_v35 = vpack.c.bf16 %v683_v33, %v683_v33 }
  0xb9   : >> { %v727_v37 = vsel %vm725_vm3, %v721_v35, 0 }
  0xba   : >> { %2076 = vmatmul.msk.bf16.vlgmr.msra.gmra.mxu3 %vm688_vm1, %v686_v24  ;;  %736 = vmatpush.bf16.msrb.mxu0 %v727_v37 }
  0xbc   : >> { %v684_v39 = vpop.f32.mrf.mxu2 }
 0x13d   : >> { %v704_v27 = vpop.f32.mrf.mxu3 }
 0x13e   : >> { %v705_v28 = vadd.f32 %v2767_v3, %v704_v27 }
 0x140   : >> { %v709_v29 = vsel %vm708_vm2, %v705_v28, -inf }
 0x141   : >> { %710 = vmax.xlane.f32.xlu0 %v709_v29 }
 0x145   : >> { %v706_v30 = vpop.f32.mrf.mxu3 }
 0x146   : > { %v800_v30 = vperm.slane (%p564_p11), %v2744_v0, 3 }
 0x1b4   : >> { %v711_v34 = vpop.xlane.xlu0 %710 }
 0x1b5   : >> { %v712_v36 = vsub.f32 %v705_v28, %v711_v34 }
 0x1b7   : >> { %v713_v38 = vmul.f32 1.442695, %v712_v36  ;;  %v818_v36 = vperm.slane (%p564_p11), %v2744_v0, 4 }
 0x1b9   : >> { %2397 = vpow2.f32 %v713_v38 }
 0x1bf   : >> { %v2398_v40 = vpop.eup %2397 }
 0x1c0   : >> { %v715_v41 = vsel %vm708_vm2, %v2398_v40, 0.0 }
 0x1c1   : >> { %716 = vadd.xlane.f32.xlu0 %v715_v41  ;;  %v2855_v41 = vmov (%p564_p11), 0.0  }
 0x234   : >> { %v717_v44 = vpop.xlane.xlu0 %716 }
 0x235   : >> { %2399 = vrcp.f32 %v717_v44 }
 0x236   : > { %2401 = vrcp.f32 (%p564_p11), %v2608_v58 }
 0x23b   : >> { %v2400_v45 = vpop.eup %2399 }
 0x23c   : >> { %v719_v46 = vmul.f32 %v2400_v45, %v2398_v40  ;;  %v2402_v59 = vpop.eup (%p564_p11), %2401 }
 0x23d   : > { %v775_v60 = vmul.f32 (%p564_p11), 32.0, %v2402_v59  ;;  %vm779_vm5 = vweird.f32 (%p564_p11), %v2402_v59 }
 0x23e   : >> { %v720_v47 = vpack.c.bf16 %v719_v46, %v719_v46 }
 0x23f   : > { %v776_v61 = vsub.f32 (%p564_p11), 1.0, %v775_v60 }
 0x240   : >> { %2077 = vmatmul.msk.bf16.vlgmr.msrb.gmra.mxu0 %vm708_vm2, %v720_v47 }
 0x241   : > { %v777_v62 = vmul.f32 (%p564_p11), %v2402_v59, %v776_v61 }
 0x243   : > { %v778_v63 = vadd.f32 (%p564_p11), %v2402_v59, %v777_v62 }
 0x2bd   : >> { %v738_v48 = vpop.f32.mrf.mxu0 }
 0x2be   : >> { %v742_v49 = vpack.c.bf16 %v738_v48, %v738_v48 }
 0x2c0   : >> { %2079 = vmatmul.msk.bf16.vlgmr.msrb.gmra.mxu1 %vm688_vm1, %v742_v49 }
 0x2c5   : >> { %v740_v50 = vpop.f32.mrf.mxu0 }
 0x33d   : >> { %v762_v51 = vpop.f32.mrf.mxu1 }
 0x33e   : >> { %v766_v52 = vadd.f32 %v2578_v9, %v762_v51  }
 0x340   : >> { %v3192_v9 = vmov %v766_v52  ;;  %v768_v55 = vadd.f32 (%p564_p11), %v767_v54, %v766_v52 }
 0x341   : > { %566 = sbr.rel (!%p564_p11) target bundleno = 37 (0x25), region = 193  ;;  %v2843_v9 = vsel (%p564_p11), %vm779_vm5, %v2402_v59, %v778_v63 }
 0x342   : > { %v769_v56 = vadd.f32 (%p564_p11), %v768_v55, %v2772_v4 }
 0x344   : > { %v771_v57 = vsel (%p564_p11), %vm593_vm0, %v769_v56, 0.0 }
 0x345   : >> { %v764_v53 = vpop.f32.mrf.mxu1  ;;  %772 = vadd.xlane.f32.xlu0 (%p564_p11), %v771_v57 }
 0x3b8   : > { %v773_v7 = vpop.xlane.xlu0 %772 }
 0x3b9   : > { %v781_v10 = vmul.f32 %v2843_v9, %v773_v7 }
 0x3bb   : > { %v782_v11 = vsub.f32 %v769_v56, %v781_v10 }
 0x3bd   : > { %v783_v12 = vmul.f32 %v782_v11, %v782_v11  ;;  %v801_v35 = vmul.f32 %v800_v30, %v782_v11 }
 0x3bf   : > { %v784_v4 = vsel %vm593_vm0, %v783_v12, 0.0 }
 0x3c0   : > { %785 = vadd.xlane.f32.xlu0 %v784_v4 }
 0x433   : > { %v786_v13 = vpop.xlane.xlu0 %785 }
 0x434   : > { %v787_v14 = vmul.f32 0.032258064, %v786_v13 }
 0x436   : > { %2403 = vrsqrt.f32 %v787_v14  ;;  %vm795_vm6 = vcmp.eq.f32.partialorder %v787_v14, inf  ;;  %v798_v22 = vand.u32 2147483648, %v787_v14  ;;  %vm797_vm7 = vcmp.eq.f32.partialorder %v787_v14, 0.0 }
 0x43c   : > { %v2404_v15 = vpop.eup %2403 }
 0x43d   : > { %v789_v16 = vmul.f32 %v2404_v15, %v787_v14 }
 0x43f   : > { %v790_v17 = vmul.f32 %v2404_v15, %v789_v16 }
 0x441   : > { %v791_v18 = vmul.f32 0.5, %v790_v17 }
 0x443   : > { %v792_v19 = vsub.f32 1.5, %v791_v18 }
 0x445   : > { %v793_v20 = vmul.f32 %v2404_v15, %v792_v19 }
 0x447   : > { %v794_v21 = vmul.f32 %v793_v20, %v787_v14 }
 0x449   : > { %v796_v23 = vsel %vm795_vm6, %v787_v14, %v794_v21 }
 0x44a   : > { %v799_v24 = vsel %vm797_vm7, %v798_v22, %v796_v23 }
 0x44b   : > { %v802_v25 = vadd.f32 1e-06, %v799_v24 }
 0x44d   : > { %2405 = vrcp.f32 %v802_v25  ;;  %v814_v29 = vand.u32 2147483648, %v802_v25  ;;  %v812_v32 = vand.u32 2147483647, %v802_v25  ;;  %vm808_vm9 = vweird.f32 %v802_v25 }
 0x44f   : > { %v815_v34 = vor.u32 1.1754944e-38, %v814_v29  ;;  %vm813_vm11 = vcmp.eq.f32.partialorder %v812_v32, 8.507059e+37 }
 0x453   : > { %v2406_v26 = vpop.eup %2405 }
 0x454   : > { %v804_v27 = vmul.f32 %v2406_v26, %v802_v25  ;;  %vm809_vm8 = vweird.f32 %v2406_v26 }
 0x455   : > { %vm810_vm10 = vmor %vm808_vm9, %vm809_vm8 }
 0x456   : > { %v805_v28 = vsub.f32 1.0, %v804_v27 }
 0x458   : > { %v806_v31 = vmul.f32 %v2406_v26, %v805_v28 }
 0x45a   : > { %v807_v33 = vadd.f32 %v2406_v26, %v806_v31 }
 0x45c   : > { %v811_v37 = vsel %vm810_vm10, %v2406_v26, %v807_v33 }
 0x45d   : > { %v816_v38 = vsel %vm813_vm11, %v815_v34, %v811_v37 }
 0x45e   : > { %v817_v39 = vmul.f32 %v816_v38, %v801_v35 }
 0x460   : > { %v2853_v40 = vadd.f32 %v818_v36, %v817_v39 }
 0x461 LB: >> { %s2256_s13 = sshll.u32 %s2590_s27, 4  ;;  %s2870_s21 = scalar_lea.vmem %s3156_s6, %s2590_s27  ;;  %s2590_s27 = sphi %s2857_s27, %s825_s27   ;;  %v2586_v41 = vphi %v2855_v41, %v3193_v41  }
 0x462   : >> { %s829_s26 = scalar_lea.vmem %s3154_s4, %s2256_s13  ;;  %v2408_v46 = vld [vmem:[%s2870_s21 + $0x8] ss:$0 sm:$0xff]  ;;  %v2407_v49 = vld [vmem:[%s2870_s21] ss:$0 sm:$0xff]  ;;  %v2409_v7 = vld [vmem:[%s2870_s21 + $0x10] ss:$0 sm:$0xff] }
 0x463   : >> { %v2258_v42 = vld [vmem:[%s829_s26 + $0x8] sm:$0xff]  ;;  %v2257_v44 = vld [vmem:[%s829_s26] sm:$0xff]  ;;  %s2123_s16 = sshll.u32 %s2590_s27, 1  ;;  %s825_s27 = sadd.s32 1, %s2590_s27  }
 0x464   : >> { %v2260_v43 = vld [vmem:[%s829_s26 + $0x88] sm:$0xff]  ;;  %860 = vmatpush.bf16.msra.mxu0 %v2258_v42  ;;  %v2259_v45 = vld [vmem:[%s829_s26 + $0x80] sm:$0xff]  ;;  %s1001_s25 = scalar_lea.vmem %s3155_s5, %s2123_s16  ;;  %p822_p12 = scmp.ge.s32.totalorder %s825_s27, 8  }
 0x465   : >> { %898 = vmatpush.bf16.msra.mxu1 %v2260_v43  ;;  %v2262_v58 = vld [vmem:[%s829_s26 + $0x108] sm:$0xff]  ;;  %v2261_v59 = vld [vmem:[%s829_s26 + $0x100] sm:$0xff]  ;;  %s2923_s20 = smov (%p822_p12), 0  }
 0x466   : >> { %936 = vmatpush.bf16.msra.mxu2 %v2262_v58  ;;  %v1002_v19 = vld [vmem:[%s1001_s25] sm:$0x3] }
 0x467   : >> { %v1008_v20 = vsel %vm749_vm4, %v1002_v19, 0 }
 0x468   : >> { %861 = vmatpush.bf16.msra.mxu0 %v2257_v44 }
 0x469   : >> { %899 = vmatpush.bf16.msra.mxu1 %v2259_v45 }
 0x46a   : >> { %937 = vmatpush.bf16.msra.mxu2 %v2261_v59 }
 0x46b   : >> { %2090 = vmatmul.msk.bf16.vlgmr.msra.gmra.mxu0 %vm593_vm0, %v2784_v8 }
 0x46c   : >> { %2105 = vmatmul.msk.bf16.vlgmr.msra.gmra.mxu1 %vm593_vm0, %v2784_v8 }
 0x46d   : >> { %2120 = vmatmul.msk.bf16.vlgmr.msra.gmra.mxu2 %vm593_vm0, %v2784_v8  ;;  %1017 = vmatpush.bf16.msrb.mxu1 %v1008_v20 }
 0x4e8   : >> { %v863_v47 = vpop.f32.mrf.mxu0 }
 0x4e9   : >> { %v901_v48 = vpop.f32.mrf.mxu1  ;;  %v864_v52 = vadd.f32 %v2407_v49, %v863_v47 }
 0x4ea   : >> { %v902_v50 = vadd.f32 %v2408_v46, %v901_v48 }
 0x4eb   : >> { %v943_v57 = vpack.c.bf16 %v864_v52, %v864_v52 }
 0x4ec   : >> { %v944_v51 = vpack.c.bf16 %v902_v50, %v902_v50 }
 0x4ee   : >> { %v950_v53 = vsel %vm688_vm1, %v944_v51, 0 }
 0x4ef   : >> { %959 = vmatpush.bf16.xpose.msra.mxu3 %v950_v53 }
 0x4f0   : >> { %v865_v55 = vpop.f32.mrf.mxu0  ;;  %v939_v10 = vpop.f32.mrf.mxu2 }
 0x4f1   : >> { %v903_v56 = vpop.f32.mrf.mxu1  ;;  %v940_v11 = vadd.f32 %v2409_v7, %v939_v10 }
 0x4f3   : >> { %v978_v4 = vpack.c.bf16 %v940_v11, %v940_v11 }
 0x4f5   : >> { %v984_v14 = vsel %vm725_vm3, %v978_v4, 0  ;;  %v2921_v4 = vmov (%p822_p12), 0.0  }
 0x4f6   : >> { %2121 = vmatmul.msk.bf16.vlgmr.msra.gmra.mxu3 %vm688_vm1, %v943_v57  ;;  %993 = vmatpush.bf16.msrb.mxu0 %v984_v14 }
 0x4f8   : >> { %v941_v16 = vpop.f32.mrf.mxu2 }
 0x579   : >> { %v961_v60 = vpop.f32.mrf.mxu3 }
 0x57a   : >> { %v962_v61 = vadd.f32 %v2776_v6, %v961_v60 }
 0x57c   : >> { %v966_v62 = vsel %vm708_vm2, %v962_v61, -inf }
 0x57d   : >> { %967 = vmax.xlane.f32.xlu0 %v966_v62 }
 0x581   : >> { %v963_v63 = vpop.f32.mrf.mxu3 }
 0x5f0   : >> { %v968_v12 = vpop.xlane.xlu0 %967 }
 0x5f1   : >> { %v969_v13 = vsub.f32 %v962_v61, %v968_v12 }
 0x5f3   : >> { %v970_v15 = vmul.f32 1.442695, %v969_v13 }
 0x5f5   : >> { %2410 = vpow2.f32 %v970_v15 }
 0x5fb   : >> { %v2411_v17 = vpop.eup %2410 }
 0x5fc   : >> { %v972_v18 = vsel %vm708_vm2, %v2411_v17, 0.0 }
 0x5fd   : >> { %973 = vadd.xlane.f32.xlu0 %v972_v18 }
 0x670   : >> { %v974_v21 = vpop.xlane.xlu0 %973 }
 0x671   : >> { %2412 = vrcp.f32 %v974_v21 }
 0x677   : >> { %v2413_v22 = vpop.eup %2412 }
 0x678   : >> { %v976_v23 = vmul.f32 %v2413_v22, %v2411_v17 }
 0x67a   : >> { %v977_v24 = vpack.c.bf16 %v976_v23, %v976_v23 }
 0x67c   : >> { %2122 = vmatmul.msk.bf16.vlgmr.msrb.gmra.mxu0 %vm708_vm2, %v977_v24 }
 0x6f9   : >> { %v995_v25 = vpop.f32.mrf.mxu0 }
 0x6fa   : >> { %v999_v26 = vpack.c.bf16 %v995_v25, %v995_v25 }
 0x6fc   : >> { %2124 = vmatmul.msk.bf16.vlgmr.msrb.gmra.mxu1 %vm688_vm1, %v999_v26 }
 0x701   : >> { %v997_v27 = vpop.f32.mrf.mxu0 }
 0x779   : >> { %v1019_v28 = vpop.f32.mrf.mxu1 }
 0x77a   : >> { %v1023_v29 = vadd.f32 %v2586_v41, %v1019_v28  }
 0x77c   : >> { %v3193_v41 = vmov %v1023_v29  ;;  %v1024_v32 = vadd.f32 (%p822_p12), %v1023_v29, %v767_v54 }
 0x77d   : > { %824 = sbr.rel (!%p822_p12) target bundleno = 1121 (0x461), region = 204 }
 0x77e   : > { %v1025_v33 = vadd.f32 (%p822_p12), %v1024_v32, %v2774_v5  ;;  %v1066_v5 = vpack.c.bf16 (%p822_p12), %v2853_v40, %v2853_v40 }
 0x780   : > { %v1026_v34 = vsel (%p822_p12), %vm593_vm0, %v1025_v33, 0.0 }
 0x781   : >> { %v1021_v31 = vpop.f32.mrf.mxu1  ;;  %1027 = vadd.xlane.f32.xlu0 (%p822_p12), %v1026_v34 }
 0x7f4   : > { %v1028_v35 = vpop.xlane.xlu0 %1027 }
 0x7f5   : > { %v1029_v37 = vmul.f32 %v1028_v35, %v2843_v9 }
 0x7f7   : > { %v1030_v38 = vsub.f32 %v1025_v33, %v1029_v37 }
 0x7f9   : > { %v1031_v39 = vmul.f32 %v1030_v38, %v1030_v38  ;;  %v1048_v62 = vmul.f32 %v1030_v38, %v800_v30 }
 0x7fb   : > { %v1032_v41 = vsel %vm593_vm0, %v1031_v39, 0.0 }
 0x7fc   : > { %1033 = vadd.xlane.f32.xlu0 %v1032_v41 }
 0x86f   : > { %v1034_v42 = vpop.xlane.xlu0 %1033 }
 0x870   : > { %v1035_v43 = vmul.f32 0.032258064, %v1034_v42 }
 0x872   : > { %2414 = vrsqrt.f32 %v1035_v43  ;;  %vm1043_vm12 = vcmp.eq.f32.partialorder %v1035_v43, inf  ;;  %v1046_v49 = vand.u32 2147483648, %v1035_v43  ;;  %vm1045_vm13 = vcmp.eq.f32.partialorder %v1035_v43, 0.0 }
 0x878   : > { %v2415_v44 = vpop.eup %2414 }
 0x879   : > { %v1037_v8 = vmul.f32 %v2415_v44, %v1035_v43 }
 0x87b   : > { %v1038_v45 = vmul.f32 %v2415_v44, %v1037_v8 }
 0x87d   : > { %v1039_v54 = vmul.f32 0.5, %v1038_v45 }
 0x87f   : > { %v1040_v46 = vsub.f32 1.5, %v1039_v54 }
 0x881   : > { %v1041_v47 = vmul.f32 %v2415_v44, %v1040_v46 }
 0x883   : > { %v1042_v48 = vmul.f32 %v1041_v47, %v1035_v43 }
 0x885   : > { %v1044_v50 = vsel %vm1043_vm12, %v1035_v43, %v1042_v48 }
 0x886   : > { %v1047_v51 = vsel %vm1045_vm13, %v1046_v49, %v1044_v50 }
 0x887   : > { %v1049_v52 = vadd.f32 1e-06, %v1047_v51 }
 0x889   : > { %2416 = vrcp.f32 %v1049_v52  ;;  %v1061_v57 = vand.u32 2147483648, %v1049_v52  ;;  %v1059_v59 = vand.u32 2147483647, %v1049_v52  ;;  %vm1055_vm15 = vweird.f32 %v1049_v52 }
 0x88b   : > { %v1062_v61 = vor.u32 1.1754944e-38, %v1061_v57  ;;  %vm1060_vm6 = vcmp.eq.f32.partialorder %v1059_v59, 8.507059e+37 }
 0x88f   : > { %v2417_v53 = vpop.eup %2416 }
 0x890   : > { %v1051_v55 = vmul.f32 %v2417_v53, %v1049_v52  ;;  %vm1056_vm14 = vweird.f32 %v2417_v53 }
 0x891   : > { %vm1057_vm5 = vmor %vm1055_vm15, %vm1056_vm14 }
 0x892   : > { %v1052_v56 = vsub.f32 1.0, %v1051_v55 }
 0x894   : > { %v1053_v58 = vmul.f32 %v2417_v53, %v1052_v56 }
 0x896   : > { %v1054_v60 = vadd.f32 %v2417_v53, %v1053_v58 }
 0x898   : > { %v1058_v63 = vsel %vm1057_vm5, %v2417_v53, %v1054_v60 }
 0x899   : > { %v1063_v7 = vsel %vm1060_vm6, %v1062_v61, %v1058_v63 }
 0x89a   : > { %v1064_v10 = vmul.f32 %v1063_v7, %v1048_v62 }
 0x89c   : > { %v2915_v11 = vadd.f32 %v1064_v10, %v818_v36 }
 0x89e   : > { %v2919_v12 = vpack.c.bf16 %v2915_v11, %v2915_v11 }
 0x89f LB: >> { %s2263_s27 = sshll.u32 %s2598_s20, 4  ;;  %s2936_s19 = scalar_lea.vmem %s3159_s9, %s2598_s20  ;;  %s2598_s20 = sphi %s2923_s20, %s1073_s20   ;;  %v2594_v4 = vphi %v2921_v4, %v3194_v4  }
 0x8a0   : >> { %s1077_s29 = scalar_lea.vmem %s3157_s7, %s2263_s27  ;;  %v2419_v15 = vld [vmem:[%s2936_s19 + $0x8] ss:$0 sm:$0xff]  ;;  %v2418_v18 = vld [vmem:[%s2936_s19] ss:$0 sm:$0xff]  ;;  %v2420_v33 = vld [vmem:[%s2936_s19 + $0x10] ss:$0 sm:$0xff] }
 0x8a1   : >> { %v2265_v30 = vld [vmem:[%s1077_s29 + $0x8] sm:$0xff]  ;;  %v2264_v13 = vld [vmem:[%s1077_s29] sm:$0xff]  ;;  %s2168_s26 = sshll.u32 %s2598_s20, 1  ;;  %s1073_s20 = sadd.s32 1, %s2598_s20  }
 0x8a2   : >> { %v2267_v36 = vld [vmem:[%s1077_s29 + $0x88] sm:$0xff]  ;;  %1108 = vmatpush.bf16.msra.mxu0 %v2265_v30  ;;  %v2266_v14 = vld [vmem:[%s1077_s29 + $0x80] sm:$0xff]  ;;  %s1252_s23 = scalar_lea.vmem %s3158_s8, %s2168_s26  ;;  %p1070_p13 = scmp.ge.s32.totalorder %s1073_s20, 8  }
 0x8a3   : >> { %1149 = vmatpush.bf16.msra.mxu1 %v2267_v36  ;;  %v2269_v26 = vld [vmem:[%s1077_s29 + $0x108] sm:$0xff]  ;;  %v2268_v27 = vld [vmem:[%s1077_s29 + $0x100] sm:$0xff]  ;;  %v1275_v57 = vperm.slane (%p1070_p13), %v2744_v0, 1  ;;  %s2992_s25 = smov (%p1070_p13), 0  }
 0x8a4   : >> { %1187 = vmatpush.bf16.msra.mxu2 %v2269_v26  ;;  %v1253_v45 = vld [vmem:[%s1252_s23] sm:$0x3] }
 0x8a5   : >> { %v1259_v54 = vsel %vm749_vm4, %v1253_v45, 0 }
 0x8a6   : >> { %1109 = vmatpush.bf16.msra.mxu0 %v2264_v13 }
 0x8a7   : >> { %1150 = vmatpush.bf16.msra.mxu1 %v2266_v14 }
 0x8a8   : >> { %1188 = vmatpush.bf16.msra.mxu2 %v2268_v27 }
 0x8a9   : >> { %2135 = vmatmul.msk.bf16.vlgmr.msra.gmra.mxu0 %vm593_vm0, %v1066_v5 }
 0x8aa   : >> { %2150 = vmatmul.msk.bf16.vlgmr.msra.gmra.mxu1 %vm593_vm0, %v2919_v12 }
 0x8ab   : >> { %2165 = vmatmul.msk.bf16.vlgmr.msra.gmra.mxu2 %vm593_vm0, %v2919_v12  ;;  %1268 = vmatpush.bf16.msrb.mxu1 %v1259_v54 }
 0x926   : >> { %v1111_v16 = vpop.f32.mrf.mxu0 }
 0x927   : >> { %v1152_v17 = vpop.f32.mrf.mxu1  ;;  %v1112_v21 = vadd.f32 %v2418_v18, %v1111_v16 }
 0x928   : >> { %v1153_v19 = vadd.f32 %v2419_v15, %v1152_v17 }
 0x929   : >> { %v1194_v25 = vpack.c.bf16 %v1112_v21, %v1112_v21 }
 0x92a   : >> { %v1195_v20 = vpack.c.bf16 %v1153_v19, %v1153_v19 }
 0x92c   : >> { %v1201_v22 = vsel %vm688_vm1, %v1195_v20, 0 }
 0x92d   : >> { %1210 = vmatpush.bf16.xpose.msra.mxu3 %v1201_v22 }
 0x92e   : >> { %v1113_v23 = vpop.f32.mrf.mxu0  ;;  %v1190_v34 = vpop.f32.mrf.mxu2 }
 0x92f   : >> { %v1154_v24 = vpop.f32.mrf.mxu1  ;;  %v1191_v35 = vadd.f32 %v2420_v33, %v1190_v34 }
 0x930   : > { %v1300_v24 = vperm.slane (%p1070_p13), %v2744_v0, 5 }
 0x931   : >> { %v1229_v38 = vpack.c.bf16 %v1191_v35, %v1191_v35 }
 0x933   : >> { %v1235_v41 = vsel %vm725_vm3, %v1229_v38, 0  ;;  %v2990_v38 = vmov (%p1070_p13), 0.0  }
 0x934   : >> { %2166 = vmatmul.msk.bf16.vlgmr.msra.gmra.mxu3 %vm688_vm1, %v1194_v25  ;;  %1244 = vmatpush.bf16.msrb.mxu0 %v1235_v41 }
 0x936   : >> { %v1192_v43 = vpop.f32.mrf.mxu2 }
 0x9b7   : >> { %v1212_v28 = vpop.f32.mrf.mxu3 }
 0x9b8   : >> { %v1213_v29 = vadd.f32 %v2776_v6, %v1212_v28 }
 0x9ba   : >> { %v1217_v31 = vsel %vm708_vm2, %v1213_v29, -inf }
 0x9bb   : >> { %1218 = vmax.xlane.f32.xlu0 %v1217_v31  ;;  %v1318_v31 = vperm.slane (%p1070_p13), %v2744_v0, 6 }
 0x9bf   : >> { %v1214_v32 = vpop.f32.mrf.mxu3 }
 0xa2e   : >> { %v1219_v37 = vpop.xlane.xlu0 %1218 }
 0xa2f   : >> { %v1220_v39 = vsub.f32 %v1213_v29, %v1219_v37 }
 0xa31   : >> { %v1221_v42 = vmul.f32 1.442695, %v1220_v39 }
 0xa33   : >> { %2421 = vpow2.f32 %v1221_v42 }
 0xa39   : >> { %v2422_v44 = vpop.eup %2421 }
 0xa3a   : >> { %v1223_v8 = vsel %vm708_vm2, %v2422_v44, 0.0 }
 0xa3b   : >> { %1224 = vadd.xlane.f32.xlu0 %v1223_v8 }
 0xaae   : >> { %v1225_v46 = vpop.xlane.xlu0 %1224 }
 0xaaf   : >> { %2423 = vrcp.f32 %v1225_v46 }
 0xab5   : >> { %v2424_v47 = vpop.eup %2423 }
 0xab6   : >> { %v1227_v48 = vmul.f32 %v2424_v47, %v2422_v44 }
 0xab8   : >> { %v1228_v49 = vpack.c.bf16 %v1227_v48, %v1227_v48 }
 0xaba   : >> { %2167 = vmatmul.msk.bf16.vlgmr.msrb.gmra.mxu0 %vm708_vm2, %v1228_v49 }
 0xb37   : >> { %v1246_v50 = vpop.f32.mrf.mxu0 }
 0xb38   : >> { %v1250_v51 = vpack.c.bf16 %v1246_v50, %v1246_v50 }
 0xb3a   : >> { %2169 = vmatmul.msk.bf16.vlgmr.msrb.gmra.mxu1 %vm688_vm1, %v1250_v51 }
 0xb3f   : >> { %v1248_v52 = vpop.f32.mrf.mxu0 }
 0xbb7   : >> { %v1270_v53 = vpop.f32.mrf.mxu1 }
 0xbb8   : >> { %v1274_v55 = vadd.f32 %v2594_v4, %v1270_v53  }
 0xbba   : >> { %v3194_v4 = vmov %v1274_v55  ;;  %v1276_v58 = vadd.f32 (%p1070_p13), %v1275_v57, %v1274_v55 }
 0xbbb   : > { %1072 = sbr.rel (!%p1070_p13) target bundleno = 2207 (0x89f), region = 215 }
 0xbbc   : > { %v1277_v59 = vadd.f32 (%p1070_p13), %v1276_v58, %v2853_v40 }
 0xbbe   : > { %v1278_v60 = vsel (%p1070_p13), %vm593_vm0, %v1277_v59, 0.0 }
 0xbbf   : >> { %v1272_v56 = vpop.f32.mrf.mxu1  ;;  %1279 = vadd.xlane.f32.xlu0 (%p1070_p13), %v1278_v60 }
 0xc32   : > { %v1280_v61 = vpop.xlane.xlu0 %1279 }
 0xc33   : > { %v1281_v62 = vmul.f32 %v1280_v61, %v2843_v9 }
 0xc35   : > { %v1282_v63 = vsub.f32 %v1277_v59, %v1281_v62 }
 0xc37   : > { %v1283_v7 = vmul.f32 %v1282_v63, %v1282_v63  ;;  %v1301_v29 = vmul.f32 %v1300_v24, %v1282_v63 }
 0xc39   : > { %v1284_v10 = vsel %vm593_vm0, %v1283_v7, 0.0 }
 0xc3a   : > { %1285 = vadd.xlane.f32.xlu0 %v1284_v10 }
 0xcad   : > { %v1286_v4 = vpop.xlane.xlu0 %1285 }
 0xcae   : > { %v1287_v30 = vmul.f32 0.032258064, %v1286_v4 }
 0xcb0   : > { %2425 = vrsqrt.f32 %v1287_v30  ;;  %vm1295_vm7 = vcmp.eq.f32.partialorder %v1287_v30, inf  ;;  %v1298_v16 = vand.u32 2147483648, %v1287_v30  ;;  %vm1297_vm8 = vcmp.eq.f32.partialorder %v1287_v30, 0.0 }
 0xcb6   : > { %v2426_v6 = vpop.eup %2425 }
 0xcb7   : > { %v1289_v5 = vmul.f32 %v2426_v6, %v1287_v30 }
 0xcb9   : > { %v1290_v36 = vmul.f32 %v2426_v6, %v1289_v5 }
 0xcbb   : > { %v1291_v13 = vmul.f32 0.5, %v1290_v36 }
 0xcbd   : > { %v1292_v14 = vsub.f32 1.5, %v1291_v13 }
 0xcbf   : > { %v1293_v40 = vmul.f32 %v2426_v6, %v1292_v14 }
 0xcc1   : > { %v1294_v15 = vmul.f32 %v1293_v40, %v1287_v30 }
 0xcc3   : > { %v1296_v17 = vsel %vm1295_vm7, %v1287_v30, %v1294_v15 }
 0xcc4   : > { %v1299_v18 = vsel %vm1297_vm8, %v1298_v16, %v1296_v17 }
 0xcc5   : > { %v1302_v19 = vadd.f32 1e-06, %v1299_v18 }
 0xcc7   : > { %2427 = vrcp.f32 %v1302_v19  ;;  %v1314_v23 = vand.u32 2147483648, %v1302_v19  ;;  %v1312_v26 = vand.u32 2147483647, %v1302_v19  ;;  %vm1308_vm10 = vweird.f32 %v1302_v19 }
 0xcc9   : > { %v1315_v28 = vor.u32 1.1754944e-38, %v1314_v23  ;;  %vm1313_vm12 = vcmp.eq.f32.partialorder %v1312_v26, 8.507059e+37 }
 0xccd   : > { %v2428_v20 = vpop.eup %2427 }
 0xcce   : > { %v1304_v21 = vmul.f32 %v2428_v20, %v1302_v19  ;;  %vm1309_vm9 = vweird.f32 %v2428_v20 }
 0xccf   : > { %vm1310_vm11 = vmor %vm1308_vm10, %vm1309_vm9 }
 0xcd0   : > { %v1305_v22 = vsub.f32 1.0, %v1304_v21 }
 0xcd2   : > { %v1306_v25 = vmul.f32 %v2428_v20, %v1305_v22 }
 0xcd4   : > { %v1307_v27 = vadd.f32 %v2428_v20, %v1306_v25 }
 0xcd6   : > { %v1311_v32 = vsel %vm1310_vm11, %v2428_v20, %v1307_v27 }
 0xcd7   : > { %v1316_v33 = vsel %vm1313_vm12, %v1315_v28, %v1311_v32 }
 0xcd8   : > { %v1317_v34 = vmul.f32 %v1316_v33, %v1301_v29 }
 0xcda   : > { %v2984_v35 = vadd.f32 %v1318_v31, %v1317_v34 }
 0xcdc   : > { %v2988_v37 = vpack.c.bf16 %v2984_v35, %v2984_v35 }
 0xcdd LB: >> { %s2270_s20 = sshll.u32 %s2606_s25, 4  ;;  %s3005_s15 = scalar_lea.vmem %s3159_s9, %s2606_s25  ;;  %s2606_s25 = sphi %s2992_s25, %s1326_s25   ;;  %v2602_v38 = vphi %v2990_v38, %v3195_v38  }
 0xcde   : >> { %s1330_s24 = scalar_lea.vmem %s3157_s7, %s2270_s20  ;;  %v2430_v44 = vld [vmem:[%s3005_s15 + $0x8] ss:$0 sm:$0xff]  ;;  %v2429_v54 = vld [vmem:[%s3005_s15] ss:$0 sm:$0xff]  ;;  %v2431_v61 = vld [vmem:[%s3005_s15 + $0x10] ss:$0 sm:$0xff] }
 0xcdf   : >> { %v2272_v39 = vld [vmem:[%s1330_s24 + $0x8] sm:$0xff]  ;;  %v2271_v42 = vld [vmem:[%s1330_s24] sm:$0xff]  ;;  %s2213_s29 = sshll.u32 %s2606_s25, 1  ;;  %s1326_s25 = sadd.s32 1, %s2606_s25  }
 0xce0   : >> { %v2274_v41 = vld [vmem:[%s1330_s24 + $0x88] sm:$0xff]  ;;  %1361 = vmatpush.bf16.msra.mxu0 %v2272_v39  ;;  %v2273_v43 = vld [vmem:[%s1330_s24 + $0x80] sm:$0xff]  ;;  %s1505_s17 = scalar_lea.vmem %s3158_s8, %s2213_s29  ;;  %p1323_p0 = scmp.ge.s32.totalorder %s1326_s25, 8  }
 0xce1   : >> { %1402 = vmatpush.bf16.msra.mxu1 %v2274_v41  ;;  %v2276_v53 = vld [vmem:[%s1330_s24 + $0x108] sm:$0xff]  ;;  %v2275_v55 = vld [vmem:[%s1330_s24 + $0x100] sm:$0xff]  ;;  %v1575_v41 = vperm.slane (%p1323_p0), %v2755_v2, 0  ;;  %v1615_v2 = vperm.slane (%p1323_p0), %v2744_v0, 2  ;;  %s3196_s27 = sld [smem:[#allocation18_spill]] (%p1323_p0)  ;;  %s1796_s25 = sshll.u32 (%p1323_p0), %s2786_s14, 4  ;;  %s1797_s25 = int_to_ptr.vmem [resolvable:$true] %s1796_s25 }
 0xce2   : >> { %1440 = vmatpush.bf16.msra.mxu2 %v2276_v53  ;;  %v1506_v14 = vld [vmem:[%s1505_s17] sm:$0x3]  ;;  %v2278_v27 = vld [vmem:[%s3160_s10 + $0x8] sm:$0xff] (%p1323_p0)  ;;  %s2245_s17 = sshll.u32 (%p1323_p0), %s2710_s22, 3  ;;  %s1779_s19 = scalar_lea.sflag (%p1323_p0), [#allocation3], %s2738_s30 }
 0xce3   : >> { %v1512_v40 = vsel %vm749_vm4, %v1506_v14, 0  ;;  %v2277_v29 = vld [vmem:[%s3160_s10] sm:$0xff] (%p1323_p0) }
 0xce4   : >> { %1362 = vmatpush.bf16.msra.mxu0 %v2271_v42 }
 0xce5   : >> { %1403 = vmatpush.bf16.msra.mxu1 %v2273_v43 }
 0xce6   : >> { %1441 = vmatpush.bf16.msra.mxu2 %v2275_v55 }
 0xce7   : >> { %2180 = vmatmul.msk.bf16.vlgmr.msra.gmra.mxu0 %vm593_vm0, %v2919_v12  ;;  %v2280_v12 = vld [vmem:[%s3162_s12 + $0x8] sm:$0xff] (%p1323_p0)  ;;  %s1794_s13 = scalar_lea.hbm (%p1323_p0), %s3196_s27, %s2245_s17  ;;  %s2468_s16 = scalar_lea.hbm (%p1323_p0), %s3196_s27, 16 }
 0xce8   : >> { %2195 = vmatmul.msk.bf16.vlgmr.msra.gmra.mxu1 %vm593_vm0, %v2988_v37  ;;  %s1798_s15 = sshll.u32 (%p1323_p0), %s1794_s13, 4  ;;  %s1799_s15 = int_to_ptr.hbm [resolvable:$true] %s1798_s15 }
 0xce9   : >> { %2210 = vmatmul.msk.bf16.vlgmr.msra.gmra.mxu2 %vm593_vm0, %v2988_v37  ;;  %1521 = vmatpush.bf16.msrb.mxu1 %v1512_v40  ;;  %s2462_s21 = sshra.s32 (%p1323_p0), %s1799_s15, 4  ;;  %s2463_s21 = int_to_ptr.hbm [resolvable:$true] %s2462_s21 }
 0xcea   : > { %1710 = vmatpush.bf16.msra.mxu2 (%p1323_p0), %v2278_v27  ;;  %s2464_s24 = scalar_lea.hbm (%p1323_p0), %s2463_s21, 8  ;;  %p2469_p4 = scmp.lt.s32.totalorder (%p1323_p0), %s2463_s21, %s3196_s27 }
 0xceb   : > { %p2465_p1 = scmp.ne.s32.totalorder (%p1323_p0), %s2463_s21, %s2464_s24  ;;  %p2470_p7 = scmp.lt.s32.totalorder (%p1323_p0), %s2468_s16, %s2464_s24 }
 0xced   : > { %p2466_p2 = pnand (%p1323_p0), %p2465_p1, %p2727_p5  ;;  %p2471_p8 = por (%p1323_p0), %p2470_p7, %p2469_p4 }
 0xcee   : > { %1711 = vmatpush.bf16.msra.mxu2 (%p1323_p0), %v2277_v29 }
 0xcef   : > { %p2467_p3 = pneg (%p1323_p0), %p2466_p2 }
 0xcf1   : > { %p2472_p9 = pnand (%p1323_p0), %p2471_p8, %p2467_p3 }
 0xd64   : >> { %v1364_v8 = vpop.f32.mrf.mxu0 }
 0xd65   : >> { %v1405_v45 = vpop.f32.mrf.mxu1  ;;  %v1365_v48 = vadd.f32 %v2429_v54, %v1364_v8 }
 0xd66   : >> { %v1406_v46 = vadd.f32 %v2430_v44, %v1405_v45 }
 0xd67   : >> { %v1447_v52 = vpack.c.bf16 %v1365_v48, %v1365_v48 }
 0xd68   : >> { %v1448_v47 = vpack.c.bf16 %v1406_v46, %v1406_v46 }
 0xd6a   : >> { %v1454_v49 = vsel %vm688_vm1, %v1448_v47, 0 }
 0xd6b   : >> { %1463 = vmatpush.bf16.xpose.msra.mxu3 %v1454_v49 }
 0xd6c   : >> { %v1366_v50 = vpop.f32.mrf.mxu0  ;;  %v1443_v62 = vpop.f32.mrf.mxu2 }
 0xd6d   : >> { %v1407_v51 = vpop.f32.mrf.mxu1  ;;  %v1444_v63 = vadd.f32 %v2431_v61, %v1443_v62 }
 0xd6f   : >> { %v1482_v10 = vpack.c.bf16 %v1444_v63, %v1444_v63 }
 0xd71   : >> { %v1488_v30 = vsel %vm725_vm3, %v1482_v10, 0 }
 0xd72   : >> { %2211 = vmatmul.msk.bf16.vlgmr.msra.gmra.mxu3 %vm688_vm1, %v1447_v52  ;;  %1497 = vmatpush.bf16.msrb.mxu0 %v1488_v30 }
 0xd74   : >> { %v1445_v5 = vpop.f32.mrf.mxu2 }
 0xd76   : > { %1598 = vmatpush.bf16.msra.mxu0 (%p1323_p0), %v2278_v27 }
 0xd7a   : > { %1599 = vmatpush.bf16.msra.mxu0 (%p1323_p0), %v2277_v29 }
 0xdf5   : >> { %v1465_v56 = vpop.f32.mrf.mxu3 }
 0xdf6   : >> { %v1466_v58 = vadd.f32 %v2767_v3, %v1465_v56  ;;  %v2282_v3 = vld [vmem:[%s3162_s12 + $0x18] sm:$0xff] (%p1323_p0) }
 0xdf7   : > { %1648 = vmatpush.bf16.msra.mxu1 (%p1323_p0), %v2282_v3  ;;  %1726 = vmatpush.bf16.msra.mxu3 (%p1323_p0), %v2282_v3 }
 0xdf8   : >> { %v1470_v59 = vsel %vm708_vm2, %v1466_v58, -inf }
 0xdf9   : >> { %1471 = vmax.xlane.f32.xlu0 %v1470_v59 }
 0xdfd   : >> { %v1467_v60 = vpop.f32.mrf.mxu3 }
 0xe6c   : >> { %v1472_v7 = vpop.xlane.xlu0 %1471 }
 0xe6d   : >> { %v1473_v4 = vsub.f32 %v1466_v58, %v1472_v7 }
 0xe6f   : >> { %v1474_v6 = vmul.f32 1.442695, %v1473_v4 }
 0xe71   : >> { %2432 = vpow2.f32 %v1474_v6 }
 0xe77   : >> { %v2433_v36 = vpop.eup %2432 }
 0xe78   : >> { %v1476_v13 = vsel %vm708_vm2, %v2433_v36, 0.0 }
 0xe79   : >> { %1477 = vadd.xlane.f32.xlu0 %v1476_v13 }
 0xeec   : >> { %v1478_v15 = vpop.xlane.xlu0 %1477 }
 0xeed   : >> { %2434 = vrcp.f32 %v1478_v15 }
 0xef3   : >> { %v2435_v16 = vpop.eup %2434 }
 0xef4   : >> { %v1480_v17 = vmul.f32 %v2435_v16, %v2433_v36 }
 0xef6   : >> { %v1481_v18 = vpack.c.bf16 %v1480_v17, %v1480_v17 }
 0xef8   : >> { %2212 = vmatmul.msk.bf16.vlgmr.msrb.gmra.mxu0 %vm708_vm2, %v1481_v18 }
 0xf08   : > { %2223 = vmatmul.msk.bf16.vlgmr.msra.gmra.mxu0 (%p1323_p0), %vm593_vm0, %v2988_v37 }
 0xf75   : >> { %v1499_v19 = vpop.f32.mrf.mxu0 }
 0xf76   : >> { %v1503_v20 = vpack.c.bf16 %v1499_v19, %v1499_v19 }
 0xf78   : >> { %2214 = vmatmul.msk.bf16.vlgmr.msrb.gmra.mxu1 %vm688_vm1, %v1503_v20  ;;  %vm1640_vm1 = vcmask (%p1323_p0), 523264  }
 0xf7d   : >> { %v1501_v21 = vpop.f32.mrf.mxu0 }
 0xf85   : > { %v1601_v42 = vpop.f32.mrf.mxu0 (%p1323_p0) }
 0xf86   : > { %v1602_v43 = vadd.f32 (%p1323_p0), %v1601_v42, %v1575_v41 }
 0xf88   : > { %v1605_v44 = vmax.f32 (%p1323_p0), %v1602_v43, 0.0 }
 0xf8a   : > { %v1606_v8 = vpack.c.bf16 (%p1323_p0), %v1605_v44, %v1605_v44  ;;  %v1680_v44 = vperm.slane (%p1323_p0), %v2744_v0, 7 }
 0xf8d   : > { %v1603_v45 = vpop.f32.mrf.mxu0 (%p1323_p0) }
 0xff5   : >> { %v1523_v22 = vpop.f32.mrf.mxu1 }
 0xff6   : >> { %v1527_v23 = vadd.f32 %v2602_v38, %v1523_v22  }
 0xff8   : >> { %v3195_v38 = vmov %v1527_v23  ;;  %v1528_v26 = vadd.f32 (%p1323_p0), %v1527_v23, %v1275_v57  ;;  %v2279_v57 = vld [vmem:[%s3162_s12] sm:$0xff] (%p1323_p0) }
 0xff9   : > { %1325 = sbr.rel (!%p1323_p0) target bundleno = 3293 (0xcdd), region = 226 }
 0xffa   : > { %v1529_v28 = vadd.f32 (%p1323_p0), %v1528_v26, %v2915_v11  ;;  %v2281_v11 = vld [vmem:[%s3162_s12 + $0x10] sm:$0xff] (%p1323_p0) }
 0xffb   : > { %1649 = vmatpush.bf16.msra.mxu1 (%p1323_p0), %v2281_v11  ;;  %1727 = vmatpush.bf16.msra.mxu3 (%p1323_p0), %v2281_v11 }
 0xffc   : > { %v1530_v32 = vsel (%p1323_p0), %vm593_vm0, %v1529_v28, 0.0 }
 0xffd   : >> { %v1525_v25 = vpop.f32.mrf.mxu1  ;;  %1531 = vadd.xlane.f32.xlu0 (%p1323_p0), %v1530_v32 }
 0xfff   : > { %1650 = vmatpush.bf16.msra.mxu1 %v2280_v12  ;;  %1728 = vmatpush.bf16.msra.mxu3 %v2280_v12 }
0x1003   : > { %1651 = vmatpush.bf16.msra.mxu1 %v2279_v57  ;;  %1729 = vmatpush.bf16.msra.mxu3 %v2279_v57 }
0x1006   : > { %2240 = vmatmul.msk.bf16.vlgmr.msra.gmra.mxu1 %vm1640_vm1, %v1606_v8 }
0x1070   : > { %v1532_v33 = vpop.xlane.xlu0 %1531 }
0x1071   : > { %v1533_v34 = vmul.f32 %v1532_v33, %v2843_v9 }
0x1073   : > { %v1534_v37 = vsub.f32 %v1529_v28, %v1533_v34 }
0x1075   : > { %v1535_v38 = vmul.f32 %v1534_v37, %v1534_v37  ;;  %v1552_v40 = vmul.f32 %v1534_v37, %v1300_v24 }
0x1077   : > { %v1536_v39 = vsel %vm593_vm0, %v1535_v38, 0.0 }
0x1078   : > { %1537 = vadd.xlane.f32.xlu0 %v1536_v39 }
0x1083   : > { %v1653_v58 = vpop.f32.mrf.mxu1 }
0x1084   : > { %v1654_v60 = vadd.f32 %v1653_v58, %v1615_v2 }
0x1086   : > { %v1657_v62 = vadd.f32 %v1654_v60, %v2984_v35 }
0x1088   : > { %v1658_v63 = vsel %vm593_vm0, %v1657_v62, 0.0 }
0x1089   : > { %1659 = vadd.xlane.f32.xlu1 %v1658_v63 }
0x108b   : > { %v1655_v7 = vpop.f32.mrf.mxu1 }
0x10eb   : > { %v1538_v54 = vpop.xlane.xlu0 %1537 }
0x10ec   : > { %v1539_v46 = vmul.f32 0.032258064, %v1538_v54 }
0x10ee   : > { %2436 = vrsqrt.f32 %v1539_v46  ;;  %vm1547_vm2 = vcmp.eq.f32.partialorder %v1539_v46, inf  ;;  %v1550_v55 = vand.u32 2147483648, %v1539_v46  ;;  %vm1549_vm3 = vcmp.eq.f32.partialorder %v1539_v46, 0.0 }
0x10f4   : > { %v2437_v47 = vpop.eup %2436 }
0x10f5   : > { %v1541_v48 = vmul.f32 %v2437_v47, %v1539_v46 }
0x10f7   : > { %v1542_v49 = vmul.f32 %v2437_v47, %v1541_v48 }
0x10f9   : > { %v1543_v50 = vmul.f32 0.5, %v1542_v49 }
0x10fb   : > { %v1544_v51 = vsub.f32 1.5, %v1543_v50 }
0x10fc   : > { %v1660_v19 = vpop.xlane.xlu1 %1659 }
0x10fd   : > { %v1545_v52 = vmul.f32 %v2437_v47, %v1544_v51  ;;  %v1661_v20 = vmul.f32 %v1660_v19, %v2843_v9  ;;  %v1698_v51 = vperm.slane %v2749_v1, 0 }
0x10ff   : > { %v1546_v53 = vmul.f32 %v1545_v52, %v1539_v46  ;;  %v1662_v21 = vsub.f32 %v1657_v62, %v1661_v20 }
0x1101   : > { %v1548_v56 = vsel %vm1547_vm2, %v1539_v46, %v1546_v53  ;;  %v1663_v22 = vmul.f32 %v1662_v21, %v1662_v21  ;;  %v1681_v48 = vmul.f32 %v1680_v44, %v1662_v21 }
0x1102   : > { %v1551_v59 = vsel %vm1549_vm3, %v1550_v55, %v1548_v56 }
0x1103   : > { %v1553_v61 = vadd.f32 1e-06, %v1551_v59  ;;  %v1664_v23 = vsel %vm593_vm0, %v1663_v22, 0.0 }
0x1104   : > { %1665 = vadd.xlane.f32.xlu2 %v1664_v23 }
0x1105   : > { %2438 = vrcp.f32 %v1553_v61  ;;  %v1565_v6 = vand.u32 2147483648, %v1553_v61  ;;  %v1563_v36 = vand.u32 2147483647, %v1553_v61  ;;  %vm1559_vm13 = vweird.f32 %v1553_v61 }
0x1107   : > { %v1566_v14 = vor.u32 1.1754944e-38, %v1565_v6  ;;  %vm1564_vm15 = vcmp.eq.f32.partialorder %v1563_v36, 8.507059e+37 }
0x110b   : > { %v2439_v10 = vpop.eup %2438 }
0x110c   : > { %v1555_v4 = vmul.f32 %v2439_v10, %v1553_v61  ;;  %vm1560_vm4 = vweird.f32 %v2439_v10 }
0x110d   : > { %vm1561_vm14 = vmor %vm1559_vm13, %vm1560_vm4 }
0x110e   : > { %v1556_v30 = vsub.f32 1.0, %v1555_v4 }
0x1110   : > { %v1557_v5 = vmul.f32 %v2439_v10, %v1556_v30 }
0x1112   : > { %v1558_v13 = vadd.f32 %v2439_v10, %v1557_v5 }
0x1114   : > { %v1562_v35 = vsel %vm1561_vm14, %v2439_v10, %v1558_v13 }
0x1115   : > { %v1567_v15 = vsel %vm1564_vm15, %v1566_v14, %v1562_v35 }
0x1116   : > { %v1568_v16 = vmul.f32 %v1567_v15, %v1552_v40 }
0x1118   : > { %v1569_v17 = vadd.f32 %v1568_v16, %v1318_v31 }
0x111a   : > { %v1700_v18 = vpack.c.bf16 %v1569_v17, %v1569_v17 }
0x111c   : > { %2241 = vmatmul.msk.bf16.vlgmr.msra.gmra.mxu2 %vm593_vm0, %v1700_v18 }
0x1177   : > { %v1666_v29 = vpop.xlane.xlu2 %1665 }
0x1178   : > { %v1667_v31 = vmul.f32 0.032258064, %v1666_v29 }
0x117a   : > { %2440 = vrsqrt.f32 %v1667_v31  ;;  %vm1675_vm5 = vcmp.eq.f32.partialorder %v1667_v31, inf  ;;  %v1678_v34 = vand.u32 2147483648, %v1667_v31  ;;  %vm1677_vm6 = vcmp.eq.f32.partialorder %v1667_v31, 0.0 }
0x1180   : > { %v2441_v32 = vpop.eup %2440 }
0x1181   : > { %v1669_v3 = vmul.f32 %v2441_v32, %v1667_v31 }
0x1183   : > { %v1670_v11 = vmul.f32 %v2441_v32, %v1669_v3 }
0x1185   : > { %v1671_v12 = vmul.f32 0.5, %v1670_v11 }
0x1187   : > { %v1672_v57 = vsub.f32 1.5, %v1671_v12 }
0x1189   : > { %v1673_v33 = vmul.f32 %v2441_v32, %v1672_v57 }
0x118b   : > { %v1674_v37 = vmul.f32 %v1673_v33, %v1667_v31 }
0x118d   : > { %v1676_v38 = vsel %vm1675_vm5, %v1667_v31, %v1674_v37 }
0x118e   : > { %v1679_v39 = vsel %vm1677_vm6, %v1678_v34, %v1676_v38 }
0x119f   : > { %v1713_v25 = vpop.f32.mrf.mxu2 }
0x11a0   : > { %v1714_v24 = vadd.f32 %v1713_v25, %v1575_v41  ;;  %v1682_v41 = vadd.f32 1e-06, %v1679_v39 }
0x11a2   : > { %v1717_v26 = vmax.f32 %v1714_v24, 0.0  ;;  %2442 = vrcp.f32 %v1682_v41  ;;  %v1694_v8 = vand.u32 2147483648, %v1682_v41  ;;  %vm1688_vm7 = vweird.f32 %v1682_v41 }
0x11a3   : > { %v1692_v54 = vand.u32 2147483647, %v1682_v41 }
0x11a4   : > { %v1718_v27 = vpack.c.bf16 %v1717_v26, %v1717_v26  ;;  %v1695_v47 = vor.u32 1.1754944e-38, %v1694_v8 }
0x11a5   : > { %vm1693_vm10 = vcmp.eq.f32.partialorder %v1692_v54, 8.507059e+37 }
0x11a6   : > { %2242 = vmatmul.msk.bf16.vlgmr.msra.gmra.mxu3 %vm1640_vm1, %v1718_v27 }
0x11a7   : > { %v1715_v28 = vpop.f32.mrf.mxu2 }
0x11a8   : > { %v2443_v42 = vpop.eup %2442 }
0x11a9   : > { %v1684_v43 = vmul.f32 %v2443_v42, %v1682_v41  ;;  %vm1689_vm8 = vweird.f32 %v2443_v42 }
0x11aa   : > { %vm1690_vm9 = vmor %vm1688_vm7, %vm1689_vm8 }
0x11ab   : > { %v1685_v45 = vsub.f32 1.0, %v1684_v43 }
0x11ad   : > { %v1686_v46 = vmul.f32 %v2443_v42, %v1685_v45 }
0x11af   : > { %v1687_v49 = vadd.f32 %v2443_v42, %v1686_v46 }
0x11b1   : > { %v1691_v50 = vsel %vm1690_vm9, %v2443_v42, %v1687_v49 }
0x11b2   : > { %v1696_v52 = vsel %vm1693_vm10, %v1695_v47, %v1691_v50 }
0x11b3   : > { %v1697_v53 = vmul.f32 %v1696_v52, %v1681_v48 }
0x11b5   : > { %v1699_v55 = vadd.f32 %v1698_v51, %v1697_v53 }
0x11b7   : > { %1776 = vst.msk [vmem:[%s2786_s14] sm:$0xff] %vm593_vm0, %v1699_v55 }
0x1229   : > { %v1731_v56 = vpop.f32.mrf.mxu3 }
0x122a   : > { %v1732_v58 = vadd.f32 %v1731_v56, %v1615_v2 }
0x122c   : > { %v1735_v59 = vadd.f32 %v1732_v58, %v1569_v17 }
0x122e   : > { %v1736_v60 = vsel %vm593_vm0, %v1735_v59, 0.0 }
0x122f   : > { %1737 = vadd.xlane.f32.xlu1 %v1736_v60 }
0x1231   : > { %v1733_v61 = vpop.f32.mrf.mxu3 }
0x12a2   : > { %v1738_v62 = vpop.xlane.xlu1 %1737 }
0x12a3   : > { %v1739_v63 = vmul.f32 %v1738_v62, %v2843_v9 }
0x12a5   : > { %v1740_v7 = vsub.f32 %v1735_v59, %v1739_v63 }
0x12a7   : > { %v1741_v10 = vmul.f32 %v1740_v7, %v1740_v7 }
0x12a9   : > { %v1742_v4 = vsel %vm593_vm0, %v1741_v10, 0.0 }
0x12aa   : > { %1743 = vadd.xlane.f32.xlu2 %v1742_v4 }
0x12ab   : > { %2475 = shalt.err (!%p2472_p9)
}
0x12ac   : > { %2283 = dma.vmem_to_hbm [thread:$0]  (%p2727_p5), %s1797_s25, 128, %s1799_s15, %s1779_s19   ;;  %v1758_v26 = vmul.f32 %v1740_v7, %v1680_v44 }
0x12ad   : > { %s3197_s14 = sld [smem:[#allocation19_spill]]  ;;  %s1810_s20 = sshll.u32 %s2788_s18, 4  ;;  %s1811_s20 = int_to_ptr.vmem [resolvable:$true] %s1810_s20 }
0x12ae   : > { %s1784_s22 = scalar_lea.sflag [#allocation5], %s2738_s30 }
0x12b3   : > { %s1808_s23 = scalar_lea.hbm %s3197_s14, %s2245_s17  ;;  %s2496_s21 = scalar_lea.hbm %s3197_s14, 16 }
0x12b4   : > { %s1812_s13 = sshll.u32 %s1808_s23, 4  ;;  %s1813_s13 = int_to_ptr.hbm [resolvable:$true] %s1812_s13 }
0x12b5   : > { %s2490_s17 = sshra.s32 %s1813_s13, 4  ;;  %s2491_s17 = int_to_ptr.hbm [resolvable:$true] %s2490_s17 }
0x12b6   : > { %s2492_s25 = scalar_lea.hbm %s2491_s17, 8  ;;  %p2497_p13 = scmp.lt.s32.totalorder %s2491_s17, %s3197_s14 }
0x12b7   : > { %p2493_p10 = scmp.ne.s32.totalorder %s2491_s17, %s2492_s25  ;;  %p2498_p0 = scmp.lt.s32.totalorder %s2496_s21, %s2492_s25 }
0x12b9   : > { %p2494_p11 = pnand %p2493_p10, %p2727_p5  ;;  %p2499_p1 = por %p2498_p0, %p2497_p13 }
0x12bb   : > { %p2495_p12 = pneg %p2494_p11 }
0x12bd   : > { %p2500_p2 = pnand %p2499_p1, %p2495_p12 }
0x131d   : > { %v1744_v9 = vpop.xlane.xlu2 %1743 }
0x131e   : > { %v1745_v2 = vmul.f32 0.032258064, %v1744_v9 }
0x1320   : > { %2444 = vrsqrt.f32 %v1745_v2  ;;  %vm1753_vm11 = vcmp.eq.f32.partialorder %v1745_v2, inf  ;;  %v1756_v35 = vand.u32 2147483648, %v1745_v2  ;;  %vm1755_vm12 = vcmp.eq.f32.partialorder %v1745_v2, 0.0 }
0x1326   : > { %v2445_v30 = vpop.eup %2444 }
0x1327   : > { %v1747_v6 = vmul.f32 %v2445_v30, %v1745_v2 }
0x1329   : > { %v1748_v5 = vmul.f32 %v2445_v30, %v1747_v6 }
0x132b   : > { %v1749_v36 = vmul.f32 0.5, %v1748_v5 }
0x132d   : > { %v1750_v13 = vsub.f32 1.5, %v1749_v36 }
0x132f   : > { %v1751_v14 = vmul.f32 %v2445_v30, %v1750_v13 }
0x1331   : > { %v1752_v40 = vmul.f32 %v1751_v14, %v1745_v2 }
0x1333   : > { %v1754_v15 = vsel %vm1753_vm11, %v1745_v2, %v1752_v40 }
0x1334   : > { %v1757_v16 = vsel %vm1755_vm12, %v1756_v35, %v1754_v15 }
0x1335   : > { %v1759_v17 = vadd.f32 1e-06, %v1757_v16 }
0x1337   : > { %2446 = vrcp.f32 %v1759_v17  ;;  %v1771_v21 = vand.u32 2147483648, %v1759_v17  ;;  %v1769_v23 = vand.u32 2147483647, %v1759_v17  ;;  %vm1765_vm2 = vweird.f32 %v1759_v17 }
0x1339   : > { %v1772_v24 = vor.u32 1.1754944e-38, %v1771_v21  ;;  %vm1770_vm4 = vcmp.eq.f32.partialorder %v1769_v23, 8.507059e+37 }
0x133d   : > { %v2447_v18 = vpop.eup %2446 }
0x133e   : > { %v1761_v19 = vmul.f32 %v2447_v18, %v1759_v17  ;;  %vm1766_vm1 = vweird.f32 %v2447_v18 }
0x133f   : > { %vm1767_vm3 = vmor %vm1765_vm2, %vm1766_vm1 }
0x1340   : > { %v1762_v20 = vsub.f32 1.0, %v1761_v19 }
0x1342   : > { %v1763_v22 = vmul.f32 %v2447_v18, %v1762_v20 }
0x1344   : > { %v1764_v25 = vadd.f32 %v2447_v18, %v1763_v22 }
0x1346   : > { %v1768_v27 = vsel %vm1767_vm3, %v2447_v18, %v1764_v25 }
0x1347   : > { %v1773_v28 = vsel %vm1770_vm4, %v1772_v24, %v1768_v27 }
0x1348   : > { %v1774_v29 = vmul.f32 %v1773_v28, %v1758_v26 }
0x134a   : > { %v1775_v31 = vadd.f32 %v1774_v29, %v1698_v51 }
0x134c   : > { %1777 = vst.msk [vmem:[%s2788_s18] sm:$0xff] %vm593_vm0, %v1775_v31 }
0x134d   : > { %2503 = shalt.err (!%p2500_p2)
}
0x134e   : > { %2284 = dma.vmem_to_hbm [thread:$0]  (%p2727_p5), %s1811_s20, 128, %s1813_s13, %s1784_s22  }
0x134f PF: > { %s3198_s30 = sld [smem:[#allocation11_spill]] }
0x1350   : > { %s3199_s18 = sld [smem:[#allocation8_spill]] }
0x1355   : > { %p2294_p3 = scmp.ge.s32.totalorder %s3198_s30, 2 }
0x1356   : > { %s1824_s16 = sand.u32 1, %s3199_s18  }
0x1357   : > { %p2288_p4 = pnand %p2294_p3, %p2731_p6  ;;  %s1825_s0 = scalar_lea.sflag [#allocation3], %s1824_s16 }
0x1359   : > { %p2289_p7 = pneg %p2288_p4 }
0x135b   : > { %2553 = dma.done.wait (%p2289_p7), %s1825_s0, 128  }
0x135c   : > { %2555 = vsyncadd (%p2289_p7), %s1825_s0, 4294967168  ;;  %s1835_s1 = scalar_lea.sflag [#allocation5], %s1824_s16 }
0x135d   : > { %2557 = dma.done.wait (%p2289_p7), %s1835_s1, 128  }
0x135e   : > { %2559 = vsyncadd (%p2289_p7), %s1835_s1, 4294967168  ;;  %s3201_s21 = sld [smem:[#allocation12_spill]] }
0x135f   : > { %s3202_s18 = sld [smem:[#allocation9_spill]] }
0x1360   : > { %s3203_s19 = sld [smem:[#allocation10_spill]] }
0x1361   : > { %s3204_s20 = sld [smem:[#allocation13_spill]] }
0x1364   : > { %p29_p5 = scmp.ge.s32.totalorder %s3201_s21, 4  }
0x1366   :  { %31 = sbr.rel (!%p29_p5) target bundleno = 11 (0xb), region = 237 }
0x136b   :  { %1841 = vsyncpa [#allocation3], 1 }
0x136c   :  { %1843 = vsyncpa [#allocation3 + $0x1], 1 }
0x136d   :  { %1844 = vsyncpa [#allocation5], 1 }
0x136e   :  { %1846 = vsyncpa [#allocation5 + $0x1], 1 }

</bundles_post_ra>
